<compile_context>
chip_gen: v5e
topology: v5e:2x2
jax: 0.10.0
libtpu: 0.0.40
codegen_flags: <defaults>
</compile_context>

<pallas_src>
import functools

import numpy as np
import jax
import jax.numpy as jnp
from jax import lax
from jax.experimental import pallas as pl
from jax.experimental.pallas import tpu as pltpu


def _ode_block_kernel(xT_ref, w1t_ref, b1t_ref, At_ref, ct_ref, wh_ref,
                      b3t_ref, ws2t_ref, bs2_ref, out_ref,
                      *, n_tile, hidden1, T, dt):
    """One grid step == one tile of N (all T time points handled in-kernel)."""
    Nt = n_tile
    H = hidden1

    # ---- hoisted parameter loads (used every RK4 stage / every time step) ----
    At = At_ref[...]        # (H, H)  == A^T    (synthetic odefunc)
    ct = ct_ref[...]        # (H, 1)  == c^T
    wh = wh_ref[...]        # (4, H)  == linear3 weight (out=4, in=H)
    b3t = b3t_ref[...]      # (4, 1)  == linear3 bias^T
    ws2t = ws2t_ref[...]    # (4, 1)  == linearS2 weight^T
    bs2 = bs2_ref[0]        # scalar  == linearS2 bias (from SMEM; shared by
                            #            S/I/R so it cancels in the softmax,
                            #            kept for semantic transparency)

    # ---- build initial state y0^T = [relu(linS1(S0)) | relu(linS1(I0)) | 0 | bg]^T
    xT = xT_ref[...]                        # (3 + H, Nt)
    S0 = xT[0:1, :]                         # (1, Nt)
    I0 = xT[1:2, :]                         # (1, Nt)
    # NOTE: column 2 of x (R0 slot) is intentionally unused — the torch module
    # sets R0 = zeros regardless of x[:, 2].
    bgT = xT[3:3 + H, :]                    # (H, Nt)
    w1t = w1t_ref[...]                      # (H, 1)  Linear(1, H) weight
    b1t = b1t_ref[...]                      # (H, 1)
    ST = jnp.maximum(w1t * S0 + b1t, 0.0)   # (H, Nt)  relu(linearS1(S0))^T
    IT = jnp.maximum(w1t * I0 + b1t, 0.0)   # (H, Nt)  relu(linearS1(I0))^T
    RT = jnp.zeros((H, Nt), jnp.float32)
    y = jnp.concatenate([ST, IT, RT, bgT], axis=1)   # (H, 4*Nt), cols S|I|R|bg

    def odefunc(yv):
        # TODO(synk): synthetic odefunc (see header); dy/dt = tanh(y @ A + c)
        # expressed in transposed space: tanh(A^T @ y^T + c^T).
        return jnp.tanh(
            jnp.dot(At, yv, preferred_element_type=jnp.float32) + ct)

    def write_probs(t, yv):
        # Fused head: linear3 -> relu -> linearS2 on the S|I|R columns at once.
        h = jnp.dot(wh, yv[:, 0:3 * Nt],
                    preferred_element_type=jnp.float32) + b3t      # (4, 3Nt)
        h = jnp.maximum(h, 0.0)
        logits = jnp.sum(h * ws2t, axis=0, keepdims=True) + bs2    # (1, 3Nt)
        lS = logits[:, 0:Nt]
        lI = logits[:, Nt:2 * Nt]
        lR = logits[:, 2 * Nt:3 * Nt]
        # softmax over the 3 logits (dim=2 of (T, N, 3) in the torch code)
        m = jnp.maximum(jnp.maximum(lS, lI), lR)
        eS = jnp.exp(lS - m)
        eI = jnp.exp(lI - m)
        eR = jnp.exp(lR - m)
        inv = pl.reciprocal(eS + eI + eR, approx=True)             # EUP slot
        probs = jnp.concatenate([eS * inv, eI * inv, eR * inv], axis=0)  # (3,Nt)
        out_ref[t] = probs

    # sol[0] = y0 (odeint semantics), then one RK4 step per interval.
    write_probs(0, y)

    def body(t, yv):
        k1 = odefunc(yv)
        k2 = odefunc(yv + (0.5 * dt) * k1)
        k3 = odefunc(yv + (0.5 * dt) * k2)
        k4 = odefunc(yv + dt * k3)
        y_new = yv + (dt / 6.0) * (k1 + 2.0 * k2 + 2.0 * k3 + k4)
        write_probs(t, y_new)
        return y_new

    lax.fori_loop(1, T, body, y, unroll=(T <= 32))


def ode_block_forward(x, params, *, max_time, delta_t, n_tile=None):
    """x: (batch, n_nodes, 3 + hidden1) float32. Returns (S, I, R) each (T, N, 1)."""
    B, nodes, F = x.shape
    H = params["w1"].shape[1]
    assert F == 3 + H, "beta_gamma width must equal hidden1 (torch.cat dim=0)"
    N = B * nodes
    x_flat = x.reshape(N, F)                  # == x.view(-1, x.size(2))
    xT = x_flat.T                             # (F, N): node rows on lanes

    # T derived exactly like the torch module (np.arange on the float grid).
    T = int(np.arange(0.0, max_time, delta_t).shape[0])
    assert T >= 1

    # N tiling: default one tile (full N). For production sizes pick a tile
    # that is a multiple of 128 and keeps 4*H*n_tile state + T*3*n_tile output
    # (f32) well inside VMEM (64 MiB on v7x, 128 MiB on v5e/v6e); tiles are
    # fully independent so the grid axis is "parallel" (2 TCs on v7x).
    if n_tile is None:
        n_tile = N
    assert N % n_tile == 0
    assert n_tile == N or n_tile % 128 == 0, "tile last dim must be full or 128-aligned"
    n_tiles = N // n_tile

    # Transposed parameter views (zero-cost layout plumbing in the wrapper).
    w1t = params["w1"].T          # (H, 1)
    b1t = params["b1"].T          # (H, 1)
    At = params["A"].T            # (H, H)
    ct = params["c"].T            # (H, 1)
    wh = params["w3t"].T          # (4, H)
    b3t = params["b3"].T          # (4, 1)
    ws2t = params["ws2"].T        # (4, 1)
    bs2 = params["bs2"].reshape(1)  # (1,)  -> SMEM scalar

    kernel = functools.partial(_ode_block_kernel, n_tile=n_tile, hidden1=H,
                               T=T, dt=float(delta_t))

    rep = lambda i: (0, 0)
    grid_spec = pltpu.PrefetchScalarGridSpec(
        num_scalar_prefetch=0,
        grid=(n_tiles,),
        in_specs=[
            pl.BlockSpec((F, n_tile), lambda i: (0, i)),   # x^T tile
            pl.BlockSpec((H, 1), rep),                     # linearS1 weight^T
            pl.BlockSpec((H, 1), rep),                     # linearS1 bias^T
            pl.BlockSpec((H, H), rep),                     # odefunc A^T
            pl.BlockSpec((H, 1), rep),                     # odefunc c^T
            pl.BlockSpec((4, H), rep),                     # linear3 weight
            pl.BlockSpec((4, 1), rep),                     # linear3 bias^T
            pl.BlockSpec((4, 1), rep),                     # linearS2 weight^T
            pl.BlockSpec(memory_space=pltpu.MemorySpace.SMEM),  # linearS2 bias
        ],
        out_specs=pl.BlockSpec((T, 3, n_tile), lambda i: (0, 0, i)),
    )

    out = pl.pallas_call(
        kernel,
        out_shape=jax.ShapeDtypeStruct((T, 3, N), jnp.float32),
        grid_spec=grid_spec,
        compiler_params=pltpu.CompilerParams(
            # Tiles over N are independent (time carry is inside the kernel),
            # so "parallel" is safe and shards tiles across TCs on v7x.
            dimension_semantics=("parallel",),
            vmem_limit_bytes=48 * 1024 * 1024,  # headroom, < v7x 64 MiB physical
        ),
    )(xT, w1t, b1t, At, ct, wh, b3t, ws2t, bs2)

    # Split the lane-dense (T, 3, N) result back into the torch output shapes.
    S = out[:, 0, :, None]
    I = out[:, 1, :, None]
    R = out[:, 2, :, None]
    return S, I, R


def _reference_forward(x, params, *, max_time, delta_t):
    """Pure-JAX mirror of the forward pass (original row-major layout)."""
    B, nodes, F = x.shape
    x = x.reshape(B * nodes, F)
    N = x.shape[0]
    H = params["w1"].shape[1]
    T = int(np.arange(0.0, max_time, delta_t).shape[0])
    dt = float(delta_t)

    S = jnp.maximum(x[:, 0:1] * params["w1"] + params["b1"], 0.0)
    I = jnp.maximum(x[:, 1:2] * params["w1"] + params["b1"], 0.0)
    R = jnp.zeros((N, H), jnp.float32)
    y = jnp.concatenate([S, I, R, x[:, 3:3 + H]], axis=0)

    f = lambda y: jnp.tanh(y @ params["A"] + params["c"])
    sols = [y]
    for _ in range(T - 1):
        k1 = f(y)
        k2 = f(y + 0.5 * dt * k1)
        k3 = f(y + 0.5 * dt * k2)
        k4 = f(y + dt * k3)
        y = y + (dt / 6.0) * (k1 + 2.0 * k2 + 2.0 * k3 + k4)
        sols.append(y)
    sol = jnp.stack(sols)                     # (T, 4N, H)

    def head(p):
        h = jnp.maximum(p @ params["w3t"] + params["b3"], 0.0)
        return jnp.sum(h * params["ws2"], axis=-1, keepdims=True) + params["bs2"][0, 0]

    v = jnp.concatenate(
        [head(sol[:, :N]), head(sol[:, N:2 * N]), head(sol[:, 2 * N:3 * N])], axis=-1)
    v = jax.nn.softmax(v, axis=2)
    return v[..., 0:1], v[..., 1:2], v[..., 2:3]


if __name__ == "__main__":
    # Small, deterministic config.
    batch, n_nodes, hidden1 = 2, 4, 32
    max_time, delta_t = 0.8, 0.1              # -> T = 8 integration points
    F = 3 + hidden1                            # cols: S0, I0, (unused), beta_gamma[hidden1]

    key = jax.random.PRNGKey(0)
    kx, k1, k2, k3, k4, k5, k6, k7, k8 = jax.random.split(key, 9)

    x = jax.random.normal(kx, (batch, n_nodes, F), jnp.float32)

    params = {
        # linearS1: Linear(1, hidden1); init_weights -> weight ~ N(0, 1)
        "w1": jax.random.normal(k1, (1, hidden1), jnp.float32),
        "b1": 0.1 * jax.random.normal(k2, (1, hidden1), jnp.float32),
        # synthetic odefunc params (see TODO in kernel header)
        "A": 0.1 * jax.random.normal(k3, (hidden1, hidden1), jnp.float32),
        "c": 0.1 * jax.random.normal(k4, (1, hidden1), jnp.float32),
        # linear3: Linear(hidden1, 4) stored transposed (H, 4)
        "w3t": (1.0 / jnp.sqrt(hidden1)) *
               jax.random.normal(k5, (hidden1, 4), jnp.float32),
        "b3": 0.1 * jax.random.normal(k6, (1, 4), jnp.float32),
        # linearS2: Linear(4, 1) stored as a (1, 4) row + scalar bias
        "ws2": 0.5 * jax.random.normal(k7, (1, 4), jnp.float32),
        "bs2": 0.1 * jax.random.normal(k8, (1, 1), jnp.float32),
    }

    S, I, R = ode_block_forward(x, params, max_time=max_time, delta_t=delta_t)
    jax.block_until_ready((S, I, R))

    Sr, Ir, Rr = _reference_forward(x, params, max_time=max_time, delta_t=delta_t)
    assert S.shape == Sr.shape == (8, batch * n_nodes, 1)
    # Slightly looser tolerance: softmax denominator uses the EUP approximate
    # reciprocal (pl.reciprocal(approx=True)).
    assert jnp.allclose(S, Sr, atol=2e-3, rtol=2e-3)
    assert jnp.allclose(I, Ir, atol=2e-3, rtol=2e-3)
    assert jnp.allclose(R, Rr, atol=2e-3, rtol=2e-3)

    print("KERNEL_OK")
</pallas_src>

<mosaic_0001>
module attributes {stable_mosaic.version = 11 : i64} {
  func.func @_ode_block_kernel(%arg0: i32, %arg1: memref<35x8xf32, #tpu.memory_space<vmem>>, %arg2: memref<32x1xf32, #tpu.memory_space<vmem>>, %arg3: memref<32x1xf32, #tpu.memory_space<vmem>>, %arg4: memref<32x32xf32, #tpu.memory_space<vmem>>, %arg5: memref<32x1xf32, #tpu.memory_space<vmem>>, %arg6: memref<4x32xf32, #tpu.memory_space<vmem>>, %arg7: memref<4x1xf32, #tpu.memory_space<vmem>>, %arg8: memref<4x1xf32, #tpu.memory_space<vmem>>, %arg9: memref<1xf32, #tpu.memory_space<smem>>, %arg10: memref<8x3x8xf32, #tpu.memory_space<vmem>>) attributes {dimension_semantics = [#tpu.dimension_semantics<parallel>], iteration_bounds = array<i64: 1>, scalar_prefetch = 0 : i64, scratch_operands = 0 : i64, tpu.core_type = #tpu.core_type<tc>, window_params = [{transform_indices = @transform_0, window_bounds = array<i64: 35, 8>}, {pipeline_mode = #tpu.pipeline_mode<synchronous>, transform_indices = @transform_1, window_bounds = array<i64: 32, 1>}, {pipeline_mode = #tpu.pipeline_mode<synchronous>, transform_indices = @transform_2, window_bounds = array<i64: 32, 1>}, {pipeline_mode = #tpu.pipeline_mode<synchronous>, transform_indices = @transform_3, window_bounds = array<i64: 32, 32>}, {pipeline_mode = #tpu.pipeline_mode<synchronous>, transform_indices = @transform_4, window_bounds = array<i64: 32, 1>}, {pipeline_mode = #tpu.pipeline_mode<synchronous>, transform_indices = @transform_5, window_bounds = array<i64: 4, 32>}, {pipeline_mode = #tpu.pipeline_mode<synchronous>, transform_indices = @transform_6, window_bounds = array<i64: 4, 1>}, {pipeline_mode = #tpu.pipeline_mode<synchronous>, transform_indices = @transform_7, window_bounds = array<i64: 4, 1>}, {transform_indices = @transform_8, window_bounds = array<i64: 1>}, {transform_indices = @transform_9, window_bounds = array<i64: 8, 3, 8>}]} {
    %c0 = arith.constant 0 : index
    %c0_0 = arith.constant 0 : index
    %0 = vector.load %arg4[%c0, %c0_0] : memref<32x32xf32, #tpu.memory_space<vmem>>, vector<32x32xf32>
    %c0_1 = arith.constant 0 : index
    %c0_2 = arith.constant 0 : index
    %1 = vector.load %arg5[%c0_1, %c0_2] : memref<32x1xf32, #tpu.memory_space<vmem>>, vector<32x1xf32>
    %c0_3 = arith.constant 0 : index
    %c0_4 = arith.constant 0 : index
    %2 = vector.load %arg6[%c0_3, %c0_4] : memref<4x32xf32, #tpu.memory_space<vmem>>, vector<4x32xf32>
    %c0_5 = arith.constant 0 : index
    %c0_6 = arith.constant 0 : index
    %3 = vector.load %arg7[%c0_5, %c0_6] : memref<4x1xf32, #tpu.memory_space<vmem>>, vector<4x1xf32>
    %c0_7 = arith.constant 0 : index
    %c0_8 = arith.constant 0 : index
    %4 = vector.load %arg8[%c0_7, %c0_8] : memref<4x1xf32, #tpu.memory_space<vmem>>, vector<4x1xf32>
    %c0_9 = arith.constant 0 : index
    %5 = memref.load %arg9[%c0_9] : memref<1xf32, #tpu.memory_space<smem>>
    %c0_10 = arith.constant 0 : index
    %c0_11 = arith.constant 0 : index
    %6 = vector.load %arg1[%c0_10, %c0_11] : memref<35x8xf32, #tpu.memory_space<vmem>>, vector<35x8xf32>
    %7 = vector.extract_strided_slice %6 {offsets = [0, 0], sizes = [1, 8], strides = [1, 1]} : vector<35x8xf32> to vector<1x8xf32>
    %8 = vector.extract_strided_slice %6 {offsets = [1, 0], sizes = [1, 8], strides = [1, 1]} : vector<35x8xf32> to vector<1x8xf32>
    %9 = vector.extract_strided_slice %6 {offsets = [3, 0], sizes = [32, 8], strides = [1, 1]} : vector<35x8xf32> to vector<32x8xf32>
    %c0_12 = arith.constant 0 : index
    %c0_13 = arith.constant 0 : index
    %10 = vector.load %arg2[%c0_12, %c0_13] : memref<32x1xf32, #tpu.memory_space<vmem>>, vector<32x1xf32>
    %c0_14 = arith.constant 0 : index
    %c0_15 = arith.constant 0 : index
    %11 = vector.load %arg3[%c0_14, %c0_15] : memref<32x1xf32, #tpu.memory_space<vmem>>, vector<32x1xf32>
    %12 = vector.broadcast %10 : vector<32x1xf32> to vector<32x8xf32>
    %13 = vector.broadcast %7 : vector<1x8xf32> to vector<32x8xf32>
    %14 = arith.mulf %12, %13 : vector<32x8xf32>
    %15 = vector.broadcast %11 : vector<32x1xf32> to vector<32x8xf32>
    %16 = arith.addf %14, %15 : vector<32x8xf32>
    %cst = arith.constant 0.000000e+00 : f32
    %17 = vector.broadcast %cst : f32 to vector<32x8xf32>
    %18 = arith.maximumf %16, %17 : vector<32x8xf32>
    %19 = vector.broadcast %10 : vector<32x1xf32> to vector<32x8xf32>
    %20 = vector.broadcast %8 : vector<1x8xf32> to vector<32x8xf32>
    %21 = arith.mulf %19, %20 : vector<32x8xf32>
    %22 = vector.broadcast %11 : vector<32x1xf32> to vector<32x8xf32>
    %23 = arith.addf %21, %22 : vector<32x8xf32>
    %cst_16 = arith.constant 0.000000e+00 : f32
    %24 = vector.broadcast %cst_16 : f32 to vector<32x8xf32>
    %25 = arith.maximumf %23, %24 : vector<32x8xf32>
    %cst_17 = arith.constant 0.000000e+00 : f32
    %26 = vector.broadcast %cst_17 : f32 to vector<32x8xf32>
    %27 = tpu.concatenate %18, %25, %26, %9 in 1 : vector<32x8xf32>, vector<32x8xf32>, vector<32x8xf32>, vector<32x8xf32> -> vector<32x32xf32>
    %28 = vector.extract_strided_slice %27 {offsets = [0, 0], sizes = [32, 24], strides = [1, 1]} : vector<32x32xf32> to vector<32x24xf32>
    %cst_18 = arith.constant dense<0.000000e+00> : vector<4x24xf32>
    %29 = tpu.matmul %2, %28, %cst_18 {dimension_numbers = #tpu.dot_dimension_numbers<[1], [0], [0], [1], [0, 0, 1, 1], [], []>} : vector<4x32xf32>, vector<32x24xf32>, vector<4x24xf32> -> vector<4x24xf32>
    %30 = vector.broadcast %3 : vector<4x1xf32> to vector<4x24xf32>
    %31 = arith.addf %29, %30 : vector<4x24xf32>
    %cst_19 = arith.constant 0.000000e+00 : f32
    %32 = vector.broadcast %cst_19 : f32 to vector<4x24xf32>
    %33 = arith.maximumf %31, %32 : vector<4x24xf32>
    %34 = vector.broadcast %4 : vector<4x1xf32> to vector<4x24xf32>
    %35 = arith.mulf %33, %34 : vector<4x24xf32>
    %cst_20 = arith.constant dense<0.000000e+00> : vector<24xf32>
    %36 = vector.multi_reduction <add>, %35, %cst_20 [0] : vector<4x24xf32> to vector<24xf32>
    %37 = vector.shape_cast %36 : vector<24xf32> to vector<1x24xf32>
    %38 = vector.broadcast %5 : f32 to vector<1x24xf32>
    %39 = arith.addf %37, %38 : vector<1x24xf32>
    %40 = vector.extract_strided_slice %39 {offsets = [0, 0], sizes = [1, 8], strides = [1, 1]} : vector<1x24xf32> to vector<1x8xf32>
    %41 = vector.extract_strided_slice %39 {offsets = [0, 8], sizes = [1, 8], strides = [1, 1]} : vector<1x24xf32> to vector<1x8xf32>
    %42 = vector.extract_strided_slice %39 {offsets = [0, 16], sizes = [1, 8], strides = [1, 1]} : vector<1x24xf32> to vector<1x8xf32>
    %43 = arith.maximumf %40, %41 : vector<1x8xf32>
    %44 = arith.maximumf %43, %42 : vector<1x8xf32>
    %45 = arith.subf %40, %44 : vector<1x8xf32>
    %46 = math.exp %45 : vector<1x8xf32>
    %47 = arith.subf %41, %44 : vector<1x8xf32>
    %48 = math.exp %47 : vector<1x8xf32>
    %49 = arith.subf %42, %44 : vector<1x8xf32>
    %50 = math.exp %49 : vector<1x8xf32>
    %51 = arith.addf %46, %48 : vector<1x8xf32>
    %52 = arith.addf %51, %50 : vector<1x8xf32>
    %53 = tpu.reciprocal %52 {approx = true} : vector<1x8xf32> -> vector<1x8xf32>
    %54 = arith.mulf %46, %53 : vector<1x8xf32>
    %55 = arith.mulf %48, %53 : vector<1x8xf32>
    %56 = arith.mulf %50, %53 : vector<1x8xf32>
    %57 = tpu.concatenate %54, %55, %56 in 0 : vector<1x8xf32>, vector<1x8xf32>, vector<1x8xf32> -> vector<3x8xf32>
    %c0_21 = arith.constant 0 : index
    %c0_22 = arith.constant 0 : index
    %c0_23 = arith.constant 0 : index
    %58 = vector.load %arg10[%c0_21, %c0_22, %c0_23] : memref<8x3x8xf32, #tpu.memory_space<vmem>>, vector<1x3x8xf32>
    %59 = vector.shape_cast %58 : vector<1x3x8xf32> to vector<3x8xf32>
    %60 = vector.shape_cast %57 : vector<3x8xf32> to vector<1x3x8xf32>
    tpu.vector_store %arg10[%c0_21, %c0_22, %c0_23], %60 {strides = array<i32>} : memref<8x3x8xf32, #tpu.memory_space<vmem>>, vector<1x3x8xf32>,
    %c1_i32 = arith.constant 1 : i32
    %cst_24 = arith.constant dense<0.000000e+00> : vector<32x32xf32>
    %61 = tpu.matmul %0, %27, %cst_24 {dimension_numbers = #tpu.dot_dimension_numbers<[1], [0], [0], [1], [0, 0, 1, 1], [], []>} : vector<32x32xf32>, vector<32x32xf32>, vector<32x32xf32> -> vector<32x32xf32>
    %62 = vector.broadcast %1 : vector<32x1xf32> to vector<32x32xf32>
    %63 = arith.addf %61, %62 : vector<32x32xf32>
    %64 = math.tanh %63 : vector<32x32xf32>
    %cst_25 = arith.constant 5.000000e-02 : f32
    %65 = vector.broadcast %cst_25 : f32 to vector<32x32xf32>
    %66 = arith.mulf %65, %64 : vector<32x32xf32>
    %67 = arith.addf %27, %66 : vector<32x32xf32>
    %cst_26 = arith.constant dense<0.000000e+00> : vector<32x32xf32>
    %68 = tpu.matmul %0, %67, %cst_26 {dimension_numbers = #tpu.dot_dimension_numbers<[1], [0], [0], [1], [0, 0, 1, 1], [], []>} : vector<32x32xf32>, vector<32x32xf32>, vector<32x32xf32> -> vector<32x32xf32>
    %69 = vector.broadcast %1 : vector<32x1xf32> to vector<32x32xf32>
    %70 = arith.addf %68, %69 : vector<32x32xf32>
    %71 = math.tanh %70 : vector<32x32xf32>
    %cst_27 = arith.constant 5.000000e-02 : f32
    %72 = vector.broadcast %cst_27 : f32 to vector<32x32xf32>
    %73 = arith.mulf %72, %71 : vector<32x32xf32>
    %74 = arith.addf %27, %73 : vector<32x32xf32>
    %cst_28 = arith.constant dense<0.000000e+00> : vector<32x32xf32>
    %75 = tpu.matmul %0, %74, %cst_28 {dimension_numbers = #tpu.dot_dimension_numbers<[1], [0], [0], [1], [0, 0, 1, 1], [], []>} : vector<32x32xf32>, vector<32x32xf32>, vector<32x32xf32> -> vector<32x32xf32>
    %76 = vector.broadcast %1 : vector<32x1xf32> to vector<32x32xf32>
    %77 = arith.addf %75, %76 : vector<32x32xf32>
    %78 = math.tanh %77 : vector<32x32xf32>
    %cst_29 = arith.constant 1.000000e-01 : f32
    %79 = vector.broadcast %cst_29 : f32 to vector<32x32xf32>
    %80 = arith.mulf %79, %78 : vector<32x32xf32>
    %81 = arith.addf %27, %80 : vector<32x32xf32>
    %cst_30 = arith.constant dense<0.000000e+00> : vector<32x32xf32>
    %82 = tpu.matmul %0, %81, %cst_30 {dimension_numbers = #tpu.dot_dimension_numbers<[1], [0], [0], [1], [0, 0, 1, 1], [], []>} : vector<32x32xf32>, vector<32x32xf32>, vector<32x32xf32> -> vector<32x32xf32>
    %83 = vector.broadcast %1 : vector<32x1xf32> to vector<32x32xf32>
    %84 = arith.addf %82, %83 : vector<32x32xf32>
    %85 = math.tanh %84 : vector<32x32xf32>
    %cst_31 = arith.constant 2.000000e+00 : f32
    %86 = vector.broadcast %cst_31 : f32 to vector<32x32xf32>
    %87 = arith.mulf %86, %71 : vector<32x32xf32>
    %88 = arith.addf %64, %87 : vector<32x32xf32>
    %cst_32 = arith.constant 2.000000e+00 : f32
    %89 = vector.broadcast %cst_32 : f32 to vector<32x32xf32>
    %90 = arith.mulf %89, %78 : vector<32x32xf32>
    %91 = arith.addf %88, %90 : vector<32x32xf32>
    %92 = arith.addf %91, %85 : vector<32x32xf32>
    %cst_33 = arith.constant 0.0166666675 : f32
    %93 = vector.broadcast %cst_33 : f32 to vector<32x32xf32>
    %94 = arith.mulf %93, %92 : vector<32x32xf32>
    %95 = arith.addf %27, %94 : vector<32x32xf32>
    %96 = vector.extract_strided_slice %95 {offsets = [0, 0], sizes = [32, 24], strides = [1, 1]} : vector<32x32xf32> to vector<32x24xf32>
    %cst_34 = arith.constant dense<0.000000e+00> : vector<4x24xf32>
    %97 = tpu.matmul %2, %96, %cst_34 {dimension_numbers = #tpu.dot_dimension_numbers<[1], [0], [0], [1], [0, 0, 1, 1], [], []>} : vector<4x32xf32>, vector<32x24xf32>, vector<4x24xf32> -> vector<4x24xf32>
    %98 = vector.broadcast %3 : vector<4x1xf32> to vector<4x24xf32>
    %99 = arith.addf %97, %98 : vector<4x24xf32>
    %cst_35 = arith.constant 0.000000e+00 : f32
    %100 = vector.broadcast %cst_35 : f32 to vector<4x24xf32>
    %101 = arith.maximumf %99, %100 : vector<4x24xf32>
    %102 = vector.broadcast %4 : vector<4x1xf32> to vector<4x24xf32>
    %103 = arith.mulf %101, %102 : vector<4x24xf32>
    %cst_36 = arith.constant dense<0.000000e+00> : vector<24xf32>
    %104 = vector.multi_reduction <add>, %103, %cst_36 [0] : vector<4x24xf32> to vector<24xf32>
    %105 = vector.shape_cast %104 : vector<24xf32> to vector<1x24xf32>
    %106 = vector.broadcast %5 : f32 to vector<1x24xf32>
    %107 = arith.addf %105, %106 : vector<1x24xf32>
    %108 = vector.extract_strided_slice %107 {offsets = [0, 0], sizes = [1, 8], strides = [1, 1]} : vector<1x24xf32> to vector<1x8xf32>
    %109 = vector.extract_strided_slice %107 {offsets = [0, 8], sizes = [1, 8], strides = [1, 1]} : vector<1x24xf32> to vector<1x8xf32>
    %110 = vector.extract_strided_slice %107 {offsets = [0, 16], sizes = [1, 8], strides = [1, 1]} : vector<1x24xf32> to vector<1x8xf32>
    %111 = arith.maximumf %108, %109 : vector<1x8xf32>
    %112 = arith.maximumf %111, %110 : vector<1x8xf32>
    %113 = arith.subf %108, %112 : vector<1x8xf32>
    %114 = math.exp %113 : vector<1x8xf32>
    %115 = arith.subf %109, %112 : vector<1x8xf32>
    %116 = math.exp %115 : vector<1x8xf32>
    %117 = arith.subf %110, %112 : vector<1x8xf32>
    %118 = math.exp %117 : vector<1x8xf32>
    %119 = arith.addf %114, %116 : vector<1x8xf32>
    %120 = arith.addf %119, %118 : vector<1x8xf32>
    %121 = tpu.reciprocal %120 {approx = true} : vector<1x8xf32> -> vector<1x8xf32>
    %122 = arith.mulf %114, %121 : vector<1x8xf32>
    %123 = arith.mulf %116, %121 : vector<1x8xf32>
    %124 = arith.mulf %118, %121 : vector<1x8xf32>
    %125 = tpu.concatenate %122, %123, %124 in 0 : vector<1x8xf32>, vector<1x8xf32>, vector<1x8xf32> -> vector<3x8xf32>
    %126 = arith.index_cast %c1_i32 : i32 to index
    %c0_37 = arith.constant 0 : index
    %c0_38 = arith.constant 0 : index
    %127 = vector.load %arg10[%126, %c0_37, %c0_38] : memref<8x3x8xf32, #tpu.memory_space<vmem>>, vector<1x3x8xf32>
    %128 = vector.shape_cast %127 : vector<1x3x8xf32> to vector<3x8xf32>
    %129 = vector.shape_cast %125 : vector<3x8xf32> to vector<1x3x8xf32>
    tpu.vector_store %arg10[%126, %c0_37, %c0_38], %129 {strides = array<i32>} : memref<8x3x8xf32, #tpu.memory_space<vmem>>, vector<1x3x8xf32>,
    %c2_i32 = arith.constant 2 : i32
    %cst_39 = arith.constant dense<0.000000e+00> : vector<32x32xf32>
    %130 = tpu.matmul %0, %95, %cst_39 {dimension_numbers = #tpu.dot_dimension_numbers<[1], [0], [0], [1], [0, 0, 1, 1], [], []>} : vector<32x32xf32>, vector<32x32xf32>, vector<32x32xf32> -> vector<32x32xf32>
    %131 = vector.broadcast %1 : vector<32x1xf32> to vector<32x32xf32>
    %132 = arith.addf %130, %131 : vector<32x32xf32>
    %133 = math.tanh %132 : vector<32x32xf32>
    %cst_40 = arith.constant 5.000000e-02 : f32
    %134 = vector.broadcast %cst_40 : f32 to vector<32x32xf32>
    %135 = arith.mulf %134, %133 : vector<32x32xf32>
    %136 = arith.addf %95, %135 : vector<32x32xf32>
    %cst_41 = arith.constant dense<0.000000e+00> : vector<32x32xf32>
    %137 = tpu.matmul %0, %136, %cst_41 {dimension_numbers = #tpu.dot_dimension_numbers<[1], [0], [0], [1], [0, 0, 1, 1], [], []>} : vector<32x32xf32>, vector<32x32xf32>, vector<32x32xf32> -> vector<32x32xf32>
    %138 = vector.broadcast %1 : vector<32x1xf32> to vector<32x32xf32>
    %139 = arith.addf %137, %138 : vector<32x32xf32>
    %140 = math.tanh %139 : vector<32x32xf32>
    %cst_42 = arith.constant 5.000000e-02 : f32
    %141 = vector.broadcast %cst_42 : f32 to vector<32x32xf32>
    %142 = arith.mulf %141, %140 : vector<32x32xf32>
    %143 = arith.addf %95, %142 : vector<32x32xf32>
    %cst_43 = arith.constant dense<0.000000e+00> : vector<32x32xf32>
    %144 = tpu.matmul %0, %143, %cst_43 {dimension_numbers = #tpu.dot_dimension_numbers<[1], [0], [0], [1], [0, 0, 1, 1], [], []>} : vector<32x32xf32>, vector<32x32xf32>, vector<32x32xf32> -> vector<32x32xf32>
    %145 = vector.broadcast %1 : vector<32x1xf32> to vector<32x32xf32>
    %146 = arith.addf %144, %145 : vector<32x32xf32>
    %147 = math.tanh %146 : vector<32x32xf32>
    %cst_44 = arith.constant 1.000000e-01 : f32
    %148 = vector.broadcast %cst_44 : f32 to vector<32x32xf32>
    %149 = arith.mulf %148, %147 : vector<32x32xf32>
    %150 = arith.addf %95, %149 : vector<32x32xf32>
    %cst_45 = arith.constant dense<0.000000e+00> : vector<32x32xf32>
    %151 = tpu.matmul %0, %150, %cst_45 {dimension_numbers = #tpu.dot_dimension_numbers<[1], [0], [0], [1], [0, 0, 1, 1], [], []>} : vector<32x32xf32>, vector<32x32xf32>, vector<32x32xf32> -> vector<32x32xf32>
    %152 = vector.broadcast %1 : vector<32x1xf32> to vector<32x32xf32>
    %153 = arith.addf %151, %152 : vector<32x32xf32>
    %154 = math.tanh %153 : vector<32x32xf32>
    %cst_46 = arith.constant 2.000000e+00 : f32
    %155 = vector.broadcast %cst_46 : f32 to vector<32x32xf32>
    %156 = arith.mulf %155, %140 : vector<32x32xf32>
    %157 = arith.addf %133, %156 : vector<32x32xf32>
    %cst_47 = arith.constant 2.000000e+00 : f32
    %158 = vector.broadcast %cst_47 : f32 to vector<32x32xf32>
    %159 = arith.mulf %158, %147 : vector<32x32xf32>
    %160 = arith.addf %157, %159 : vector<32x32xf32>
    %161 = arith.addf %160, %154 : vector<32x32xf32>
    %cst_48 = arith.constant 0.0166666675 : f32
    %162 = vector.broadcast %cst_48 : f32 to vector<32x32xf32>
    %163 = arith.mulf %162, %161 : vector<32x32xf32>
    %164 = arith.addf %95, %163 : vector<32x32xf32>
    %165 = vector.extract_strided_slice %164 {offsets = [0, 0], sizes = [32, 24], strides = [1, 1]} : vector<32x32xf32> to vector<32x24xf32>
    %cst_49 = arith.constant dense<0.000000e+00> : vector<4x24xf32>
    %166 = tpu.matmul %2, %165, %cst_49 {dimension_numbers = #tpu.dot_dimension_numbers<[1], [0], [0], [1], [0, 0, 1, 1], [], []>} : vector<4x32xf32>, vector<32x24xf32>, vector<4x24xf32> -> vector<4x24xf32>
    %167 = vector.broadcast %3 : vector<4x1xf32> to vector<4x24xf32>
    %168 = arith.addf %166, %167 : vector<4x24xf32>
    %cst_50 = arith.constant 0.000000e+00 : f32
    %169 = vector.broadcast %cst_50 : f32 to vector<4x24xf32>
    %170 = arith.maximumf %168, %169 : vector<4x24xf32>
    %171 = vector.broadcast %4 : vector<4x1xf32> to vector<4x24xf32>
    %172 = arith.mulf %170, %171 : vector<4x24xf32>
    %cst_51 = arith.constant dense<0.000000e+00> : vector<24xf32>
    %173 = vector.multi_reduction <add>, %172, %cst_51 [0] : vector<4x24xf32> to vector<24xf32>
    %174 = vector.shape_cast %173 : vector<24xf32> to vector<1x24xf32>
    %175 = vector.broadcast %5 : f32 to vector<1x24xf32>
    %176 = arith.addf %174, %175 : vector<1x24xf32>
    %177 = vector.extract_strided_slice %176 {offsets = [0, 0], sizes = [1, 8], strides = [1, 1]} : vector<1x24xf32> to vector<1x8xf32>
    %178 = vector.extract_strided_slice %176 {offsets = [0, 8], sizes = [1, 8], strides = [1, 1]} : vector<1x24xf32> to vector<1x8xf32>
    %179 = vector.extract_strided_slice %176 {offsets = [0, 16], sizes = [1, 8], strides = [1, 1]} : vector<1x24xf32> to vector<1x8xf32>
    %180 = arith.maximumf %177, %178 : vector<1x8xf32>
    %181 = arith.maximumf %180, %179 : vector<1x8xf32>
    %182 = arith.subf %177, %181 : vector<1x8xf32>
    %183 = math.exp %182 : vector<1x8xf32>
    %184 = arith.subf %178, %181 : vector<1x8xf32>
    %185 = math.exp %184 : vector<1x8xf32>
    %186 = arith.subf %179, %181 : vector<1x8xf32>
    %187 = math.exp %186 : vector<1x8xf32>
    %188 = arith.addf %183, %185 : vector<1x8xf32>
    %189 = arith.addf %188, %187 : vector<1x8xf32>
    %190 = tpu.reciprocal %189 {approx = true} : vector<1x8xf32> -> vector<1x8xf32>
    %191 = arith.mulf %183, %190 : vector<1x8xf32>
    %192 = arith.mulf %185, %190 : vector<1x8xf32>
    %193 = arith.mulf %187, %190 : vector<1x8xf32>
    %194 = tpu.concatenate %191, %192, %193 in 0 : vector<1x8xf32>, vector<1x8xf32>, vector<1x8xf32> -> vector<3x8xf32>
    %195 = arith.index_cast %c2_i32 : i32 to index
    %c0_52 = arith.constant 0 : index
    %c0_53 = arith.constant 0 : index
    %196 = vector.load %arg10[%195, %c0_52, %c0_53] : memref<8x3x8xf32, #tpu.memory_space<vmem>>, vector<1x3x8xf32>
    %197 = vector.shape_cast %196 : vector<1x3x8xf32> to vector<3x8xf32>
    %198 = vector.shape_cast %194 : vector<3x8xf32> to vector<1x3x8xf32>
    tpu.vector_store %arg10[%195, %c0_52, %c0_53], %198 {strides = array<i32>} : memref<8x3x8xf32, #tpu.memory_space<vmem>>, vector<1x3x8xf32>,
    %c3_i32 = arith.constant 3 : i32
    %cst_54 = arith.constant dense<0.000000e+00> : vector<32x32xf32>
    %199 = tpu.matmul %0, %164, %cst_54 {dimension_numbers = #tpu.dot_dimension_numbers<[1], [0], [0], [1], [0, 0, 1, 1], [], []>} : vector<32x32xf32>, vector<32x32xf32>, vector<32x32xf32> -> vector<32x32xf32>
    %200 = vector.broadcast %1 : vector<32x1xf32> to vector<32x32xf32>
    %201 = arith.addf %199, %200 : vector<32x32xf32>
    %202 = math.tanh %201 : vector<32x32xf32>
    %cst_55 = arith.constant 5.000000e-02 : f32
    %203 = vector.broadcast %cst_55 : f32 to vector<32x32xf32>
    %204 = arith.mulf %203, %202 : vector<32x32xf32>
    %205 = arith.addf %164, %204 : vector<32x32xf32>
    %cst_56 = arith.constant dense<0.000000e+00> : vector<32x32xf32>
    %206 = tpu.matmul %0, %205, %cst_56 {dimension_numbers = #tpu.dot_dimension_numbers<[1], [0], [0], [1], [0, 0, 1, 1], [], []>} : vector<32x32xf32>, vector<32x32xf32>, vector<32x32xf32> -> vector<32x32xf32>
    %207 = vector.broadcast %1 : vector<32x1xf32> to vector<32x32xf32>
    %208 = arith.addf %206, %207 : vector<32x32xf32>
    %209 = math.tanh %208 : vector<32x32xf32>
    %cst_57 = arith.constant 5.000000e-02 : f32
    %210 = vector.broadcast %cst_57 : f32 to vector<32x32xf32>
    %211 = arith.mulf %210, %209 : vector<32x32xf32>
    %212 = arith.addf %164, %211 : vector<32x32xf32>
    %cst_58 = arith.constant dense<0.000000e+00> : vector<32x32xf32>
    %213 = tpu.matmul %0, %212, %cst_58 {dimension_numbers = #tpu.dot_dimension_numbers<[1], [0], [0], [1], [0, 0, 1, 1], [], []>} : vector<32x32xf32>, vector<32x32xf32>, vector<32x32xf32> -> vector<32x32xf32>
    %214 = vector.broadcast %1 : vector<32x1xf32> to vector<32x32xf32>
    %215 = arith.addf %213, %214 : vector<32x32xf32>
    %216 = math.tanh %215 : vector<32x32xf32>
    %cst_59 = arith.constant 1.000000e-01 : f32
    %217 = vector.broadcast %cst_59 : f32 to vector<32x32xf32>
    %218 = arith.mulf %217, %216 : vector<32x32xf32>
    %219 = arith.addf %164, %218 : vector<32x32xf32>
    %cst_60 = arith.constant dense<0.000000e+00> : vector<32x32xf32>
    %220 = tpu.matmul %0, %219, %cst_60 {dimension_numbers = #tpu.dot_dimension_numbers<[1], [0], [0], [1], [0, 0, 1, 1], [], []>} : vector<32x32xf32>, vector<32x32xf32>, vector<32x32xf32> -> vector<32x32xf32>
    %221 = vector.broadcast %1 : vector<32x1xf32> to vector<32x32xf32>
    %222 = arith.addf %220, %221 : vector<32x32xf32>
    %223 = math.tanh %222 : vector<32x32xf32>
    %cst_61 = arith.constant 2.000000e+00 : f32
    %224 = vector.broadcast %cst_61 : f32 to vector<32x32xf32>
    %225 = arith.mulf %224, %209 : vector<32x32xf32>
    %226 = arith.addf %202, %225 : vector<32x32xf32>
    %cst_62 = arith.constant 2.000000e+00 : f32
    %227 = vector.broadcast %cst_62 : f32 to vector<32x32xf32>
    %228 = arith.mulf %227, %216 : vector<32x32xf32>
    %229 = arith.addf %226, %228 : vector<32x32xf32>
    %230 = arith.addf %229, %223 : vector<32x32xf32>
    %cst_63 = arith.constant 0.0166666675 : f32
    %231 = vector.broadcast %cst_63 : f32 to vector<32x32xf32>
    %232 = arith.mulf %231, %230 : vector<32x32xf32>
    %233 = arith.addf %164, %232 : vector<32x32xf32>
    %234 = vector.extract_strided_slice %233 {offsets = [0, 0], sizes = [32, 24], strides = [1, 1]} : vector<32x32xf32> to vector<32x24xf32>
    %cst_64 = arith.constant dense<0.000000e+00> : vector<4x24xf32>
    %235 = tpu.matmul %2, %234, %cst_64 {dimension_numbers = #tpu.dot_dimension_numbers<[1], [0], [0], [1], [0, 0, 1, 1], [], []>} : vector<4x32xf32>, vector<32x24xf32>, vector<4x24xf32> -> vector<4x24xf32>
    %236 = vector.broadcast %3 : vector<4x1xf32> to vector<4x24xf32>
    %237 = arith.addf %235, %236 : vector<4x24xf32>
    %cst_65 = arith.constant 0.000000e+00 : f32
    %238 = vector.broadcast %cst_65 : f32 to vector<4x24xf32>
    %239 = arith.maximumf %237, %238 : vector<4x24xf32>
    %240 = vector.broadcast %4 : vector<4x1xf32> to vector<4x24xf32>
    %241 = arith.mulf %239, %240 : vector<4x24xf32>
    %cst_66 = arith.constant dense<0.000000e+00> : vector<24xf32>
    %242 = vector.multi_reduction <add>, %241, %cst_66 [0] : vector<4x24xf32> to vector<24xf32>
    %243 = vector.shape_cast %242 : vector<24xf32> to vector<1x24xf32>
    %244 = vector.broadcast %5 : f32 to vector<1x24xf32>
    %245 = arith.addf %243, %244 : vector<1x24xf32>
    %246 = vector.extract_strided_slice %245 {offsets = [0, 0], sizes = [1, 8], strides = [1, 1]} : vector<1x24xf32> to vector<1x8xf32>
    %247 = vector.extract_strided_slice %245 {offsets = [0, 8], sizes = [1, 8], strides = [1, 1]} : vector<1x24xf32> to vector<1x8xf32>
    %248 = vector.extract_strided_slice %245 {offsets = [0, 16], sizes = [1, 8], strides = [1, 1]} : vector<1x24xf32> to vector<1x8xf32>
    %249 = arith.maximumf %246, %247 : vector<1x8xf32>
    %250 = arith.maximumf %249, %248 : vector<1x8xf32>
    %251 = arith.subf %246, %250 : vector<1x8xf32>
    %252 = math.exp %251 : vector<1x8xf32>
    %253 = arith.subf %247, %250 : vector<1x8xf32>
    %254 = math.exp %253 : vector<1x8xf32>
    %255 = arith.subf %248, %250 : vector<1x8xf32>
    %256 = math.exp %255 : vector<1x8xf32>
    %257 = arith.addf %252, %254 : vector<1x8xf32>
    %258 = arith.addf %257, %256 : vector<1x8xf32>
    %259 = tpu.reciprocal %258 {approx = true} : vector<1x8xf32> -> vector<1x8xf32>
    %260 = arith.mulf %252, %259 : vector<1x8xf32>
    %261 = arith.mulf %254, %259 : vector<1x8xf32>
    %262 = arith.mulf %256, %259 : vector<1x8xf32>
    %263 = tpu.concatenate %260, %261, %262 in 0 : vector<1x8xf32>, vector<1x8xf32>, vector<1x8xf32> -> vector<3x8xf32>
    %264 = arith.index_cast %c3_i32 : i32 to index
    %c0_67 = arith.constant 0 : index
    %c0_68 = arith.constant 0 : index
    %265 = vector.load %arg10[%264, %c0_67, %c0_68] : memref<8x3x8xf32, #tpu.memory_space<vmem>>, vector<1x3x8xf32>
    %266 = vector.shape_cast %265 : vector<1x3x8xf32> to vector<3x8xf32>
    %267 = vector.shape_cast %263 : vector<3x8xf32> to vector<1x3x8xf32>
    tpu.vector_store %arg10[%264, %c0_67, %c0_68], %267 {strides = array<i32>} : memref<8x3x8xf32, #tpu.memory_space<vmem>>, vector<1x3x8xf32>,
    %c4_i32 = arith.constant 4 : i32
    %cst_69 = arith.constant dense<0.000000e+00> : vector<32x32xf32>
    %268 = tpu.matmul %0, %233, %cst_69 {dimension_numbers = #tpu.dot_dimension_numbers<[1], [0], [0], [1], [0, 0, 1, 1], [], []>} : vector<32x32xf32>, vector<32x32xf32>, vector<32x32xf32> -> vector<32x32xf32>
    %269 = vector.broadcast %1 : vector<32x1xf32> to vector<32x32xf32>
    %270 = arith.addf %268, %269 : vector<32x32xf32>
    %271 = math.tanh %270 : vector<32x32xf32>
    %cst_70 = arith.constant 5.000000e-02 : f32
    %272 = vector.broadcast %cst_70 : f32 to vector<32x32xf32>
    %273 = arith.mulf %272, %271 : vector<32x32xf32>
    %274 = arith.addf %233, %273 : vector<32x32xf32>
    %cst_71 = arith.constant dense<0.000000e+00> : vector<32x32xf32>
    %275 = tpu.matmul %0, %274, %cst_71 {dimension_numbers = #tpu.dot_dimension_numbers<[1], [0], [0], [1], [0, 0, 1, 1], [], []>} : vector<32x32xf32>, vector<32x32xf32>, vector<32x32xf32> -> vector<32x32xf32>
    %276 = vector.broadcast %1 : vector<32x1xf32> to vector<32x32xf32>
    %277 = arith.addf %275, %276 : vector<32x32xf32>
    %278 = math.tanh %277 : vector<32x32xf32>
    %cst_72 = arith.constant 5.000000e-02 : f32
    %279 = vector.broadcast %cst_72 : f32 to vector<32x32xf32>
    %280 = arith.mulf %279, %278 : vector<32x32xf32>
    %281 = arith.addf %233, %280 : vector<32x32xf32>
    %cst_73 = arith.constant dense<0.000000e+00> : vector<32x32xf32>
    %282 = tpu.matmul %0, %281, %cst_73 {dimension_numbers = #tpu.dot_dimension_numbers<[1], [0], [0], [1], [0, 0, 1, 1], [], []>} : vector<32x32xf32>, vector<32x32xf32>, vector<32x32xf32> -> vector<32x32xf32>
    %283 = vector.broadcast %1 : vector<32x1xf32> to vector<32x32xf32>
    %284 = arith.addf %282, %283 : vector<32x32xf32>
    %285 = math.tanh %284 : vector<32x32xf32>
    %cst_74 = arith.constant 1.000000e-01 : f32
    %286 = vector.broadcast %cst_74 : f32 to vector<32x32xf32>
    %287 = arith.mulf %286, %285 : vector<32x32xf32>
    %288 = arith.addf %233, %287 : vector<32x32xf32>
    %cst_75 = arith.constant dense<0.000000e+00> : vector<32x32xf32>
    %289 = tpu.matmul %0, %288, %cst_75 {dimension_numbers = #tpu.dot_dimension_numbers<[1], [0], [0], [1], [0, 0, 1, 1], [], []>} : vector<32x32xf32>, vector<32x32xf32>, vector<32x32xf32> -> vector<32x32xf32>
    %290 = vector.broadcast %1 : vector<32x1xf32> to vector<32x32xf32>
    %291 = arith.addf %289, %290 : vector<32x32xf32>
    %292 = math.tanh %291 : vector<32x32xf32>
    %cst_76 = arith.constant 2.000000e+00 : f32
    %293 = vector.broadcast %cst_76 : f32 to vector<32x32xf32>
    %294 = arith.mulf %293, %278 : vector<32x32xf32>
    %295 = arith.addf %271, %294 : vector<32x32xf32>
    %cst_77 = arith.constant 2.000000e+00 : f32
    %296 = vector.broadcast %cst_77 : f32 to vector<32x32xf32>
    %297 = arith.mulf %296, %285 : vector<32x32xf32>
    %298 = arith.addf %295, %297 : vector<32x32xf32>
    %299 = arith.addf %298, %292 : vector<32x32xf32>
    %cst_78 = arith.constant 0.0166666675 : f32
    %300 = vector.broadcast %cst_78 : f32 to vector<32x32xf32>
    %301 = arith.mulf %300, %299 : vector<32x32xf32>
    %302 = arith.addf %233, %301 : vector<32x32xf32>
    %303 = vector.extract_strided_slice %302 {offsets = [0, 0], sizes = [32, 24], strides = [1, 1]} : vector<32x32xf32> to vector<32x24xf32>
    %cst_79 = arith.constant dense<0.000000e+00> : vector<4x24xf32>
    %304 = tpu.matmul %2, %303, %cst_79 {dimension_numbers = #tpu.dot_dimension_numbers<[1], [0], [0], [1], [0, 0, 1, 1], [], []>} : vector<4x32xf32>, vector<32x24xf32>, vector<4x24xf32> -> vector<4x24xf32>
    %305 = vector.broadcast %3 : vector<4x1xf32> to vector<4x24xf32>
    %306 = arith.addf %304, %305 : vector<4x24xf32>
    %cst_80 = arith.constant 0.000000e+00 : f32
    %307 = vector.broadcast %cst_80 : f32 to vector<4x24xf32>
    %308 = arith.maximumf %306, %307 : vector<4x24xf32>
    %309 = vector.broadcast %4 : vector<4x1xf32> to vector<4x24xf32>
    %310 = arith.mulf %308, %309 : vector<4x24xf32>
    %cst_81 = arith.constant dense<0.000000e+00> : vector<24xf32>
    %311 = vector.multi_reduction <add>, %310, %cst_81 [0] : vector<4x24xf32> to vector<24xf32>
    %312 = vector.shape_cast %311 : vector<24xf32> to vector<1x24xf32>
    %313 = vector.broadcast %5 : f32 to vector<1x24xf32>
    %314 = arith.addf %312, %313 : vector<1x24xf32>
    %315 = vector.extract_strided_slice %314 {offsets = [0, 0], sizes = [1, 8], strides = [1, 1]} : vector<1x24xf32> to vector<1x8xf32>
    %316 = vector.extract_strided_slice %314 {offsets = [0, 8], sizes = [1, 8], strides = [1, 1]} : vector<1x24xf32> to vector<1x8xf32>
    %317 = vector.extract_strided_slice %314 {offsets = [0, 16], sizes = [1, 8], strides = [1, 1]} : vector<1x24xf32> to vector<1x8xf32>
    %318 = arith.maximumf %315, %316 : vector<1x8xf32>
    %319 = arith.maximumf %318, %317 : vector<1x8xf32>
    %320 = arith.subf %315, %319 : vector<1x8xf32>
    %321 = math.exp %320 : vector<1x8xf32>
    %322 = arith.subf %316, %319 : vector<1x8xf32>
    %323 = math.exp %322 : vector<1x8xf32>
    %324 = arith.subf %317, %319 : vector<1x8xf32>
    %325 = math.exp %324 : vector<1x8xf32>
    %326 = arith.addf %321, %323 : vector<1x8xf32>
    %327 = arith.addf %326, %325 : vector<1x8xf32>
    %328 = tpu.reciprocal %327 {approx = true} : vector<1x8xf32> -> vector<1x8xf32>
    %329 = arith.mulf %321, %328 : vector<1x8xf32>
    %330 = arith.mulf %323, %328 : vector<1x8xf32>
    %331 = arith.mulf %325, %328 : vector<1x8xf32>
    %332 = tpu.concatenate %329, %330, %331 in 0 : vector<1x8xf32>, vector<1x8xf32>, vector<1x8xf32> -> vector<3x8xf32>
    %333 = arith.index_cast %c4_i32 : i32 to index
    %c0_82 = arith.constant 0 : index
    %c0_83 = arith.constant 0 : index
    %334 = vector.load %arg10[%333, %c0_82, %c0_83] : memref<8x3x8xf32, #tpu.memory_space<vmem>>, vector<1x3x8xf32>
    %335 = vector.shape_cast %334 : vector<1x3x8xf32> to vector<3x8xf32>
    %336 = vector.shape_cast %332 : vector<3x8xf32> to vector<1x3x8xf32>
    tpu.vector_store %arg10[%333, %c0_82, %c0_83], %336 {strides = array<i32>} : memref<8x3x8xf32, #tpu.memory_space<vmem>>, vector<1x3x8xf32>,
    %c5_i32 = arith.constant 5 : i32
    %cst_84 = arith.constant dense<0.000000e+00> : vector<32x32xf32>
    %337 = tpu.matmul %0, %302, %cst_84 {dimension_numbers = #tpu.dot_dimension_numbers<[1], [0], [0], [1], [0, 0, 1, 1], [], []>} : vector<32x32xf32>, vector<32x32xf32>, vector<32x32xf32> -> vector<32x32xf32>
    %338 = vector.broadcast %1 : vector<32x1xf32> to vector<32x32xf32>
    %339 = arith.addf %337, %338 : vector<32x32xf32>
    %340 = math.tanh %339 : vector<32x32xf32>
    %cst_85 = arith.constant 5.000000e-02 : f32
    %341 = vector.broadcast %cst_85 : f32 to vector<32x32xf32>
    %342 = arith.mulf %341, %340 : vector<32x32xf32>
    %343 = arith.addf %302, %342 : vector<32x32xf32>
    %cst_86 = arith.constant dense<0.000000e+00> : vector<32x32xf32>
    %344 = tpu.matmul %0, %343, %cst_86 {dimension_numbers = #tpu.dot_dimension_numbers<[1], [0], [0], [1], [0, 0, 1, 1], [], []>} : vector<32x32xf32>, vector<32x32xf32>, vector<32x32xf32> -> vector<32x32xf32>
    %345 = vector.broadcast %1 : vector<32x1xf32> to vector<32x32xf32>
    %346 = arith.addf %344, %345 : vector<32x32xf32>
    %347 = math.tanh %346 : vector<32x32xf32>
    %cst_87 = arith.constant 5.000000e-02 : f32
    %348 = vector.broadcast %cst_87 : f32 to vector<32x32xf32>
    %349 = arith.mulf %348, %347 : vector<32x32xf32>
    %350 = arith.addf %302, %349 : vector<32x32xf32>
    %cst_88 = arith.constant dense<0.000000e+00> : vector<32x32xf32>
    %351 = tpu.matmul %0, %350, %cst_88 {dimension_numbers = #tpu.dot_dimension_numbers<[1], [0], [0], [1], [0, 0, 1, 1], [], []>} : vector<32x32xf32>, vector<32x32xf32>, vector<32x32xf32> -> vector<32x32xf32>
    %352 = vector.broadcast %1 : vector<32x1xf32> to vector<32x32xf32>
    %353 = arith.addf %351, %352 : vector<32x32xf32>
    %354 = math.tanh %353 : vector<32x32xf32>
    %cst_89 = arith.constant 1.000000e-01 : f32
    %355 = vector.broadcast %cst_89 : f32 to vector<32x32xf32>
    %356 = arith.mulf %355, %354 : vector<32x32xf32>
    %357 = arith.addf %302, %356 : vector<32x32xf32>
    %cst_90 = arith.constant dense<0.000000e+00> : vector<32x32xf32>
    %358 = tpu.matmul %0, %357, %cst_90 {dimension_numbers = #tpu.dot_dimension_numbers<[1], [0], [0], [1], [0, 0, 1, 1], [], []>} : vector<32x32xf32>, vector<32x32xf32>, vector<32x32xf32> -> vector<32x32xf32>
    %359 = vector.broadcast %1 : vector<32x1xf32> to vector<32x32xf32>
    %360 = arith.addf %358, %359 : vector<32x32xf32>
    %361 = math.tanh %360 : vector<32x32xf32>
    %cst_91 = arith.constant 2.000000e+00 : f32
    %362 = vector.broadcast %cst_91 : f32 to vector<32x32xf32>
    %363 = arith.mulf %362, %347 : vector<32x32xf32>
    %364 = arith.addf %340, %363 : vector<32x32xf32>
    %cst_92 = arith.constant 2.000000e+00 : f32
    %365 = vector.broadcast %cst_92 : f32 to vector<32x32xf32>
    %366 = arith.mulf %365, %354 : vector<32x32xf32>
    %367 = arith.addf %364, %366 : vector<32x32xf32>
    %368 = arith.addf %367, %361 : vector<32x32xf32>
    %cst_93 = arith.constant 0.0166666675 : f32
    %369 = vector.broadcast %cst_93 : f32 to vector<32x32xf32>
    %370 = arith.mulf %369, %368 : vector<32x32xf32>
    %371 = arith.addf %302, %370 : vector<32x32xf32>
    %372 = vector.extract_strided_slice %371 {offsets = [0, 0], sizes = [32, 24], strides = [1, 1]} : vector<32x32xf32> to vector<32x24xf32>
    %cst_94 = arith.constant dense<0.000000e+00> : vector<4x24xf32>
    %373 = tpu.matmul %2, %372, %cst_94 {dimension_numbers = #tpu.dot_dimension_numbers<[1], [0], [0], [1], [0, 0, 1, 1], [], []>} : vector<4x32xf32>, vector<32x24xf32>, vector<4x24xf32> -> vector<4x24xf32>
    %374 = vector.broadcast %3 : vector<4x1xf32> to vector<4x24xf32>
    %375 = arith.addf %373, %374 : vector<4x24xf32>
    %cst_95 = arith.constant 0.000000e+00 : f32
    %376 = vector.broadcast %cst_95 : f32 to vector<4x24xf32>
    %377 = arith.maximumf %375, %376 : vector<4x24xf32>
    %378 = vector.broadcast %4 : vector<4x1xf32> to vector<4x24xf32>
    %379 = arith.mulf %377, %378 : vector<4x24xf32>
    %cst_96 = arith.constant dense<0.000000e+00> : vector<24xf32>
    %380 = vector.multi_reduction <add>, %379, %cst_96 [0] : vector<4x24xf32> to vector<24xf32>
    %381 = vector.shape_cast %380 : vector<24xf32> to vector<1x24xf32>
    %382 = vector.broadcast %5 : f32 to vector<1x24xf32>
    %383 = arith.addf %381, %382 : vector<1x24xf32>
    %384 = vector.extract_strided_slice %383 {offsets = [0, 0], sizes = [1, 8], strides = [1, 1]} : vector<1x24xf32> to vector<1x8xf32>
    %385 = vector.extract_strided_slice %383 {offsets = [0, 8], sizes = [1, 8], strides = [1, 1]} : vector<1x24xf32> to vector<1x8xf32>
    %386 = vector.extract_strided_slice %383 {offsets = [0, 16], sizes = [1, 8], strides = [1, 1]} : vector<1x24xf32> to vector<1x8xf32>
    %387 = arith.maximumf %384, %385 : vector<1x8xf32>
    %388 = arith.maximumf %387, %386 : vector<1x8xf32>
    %389 = arith.subf %384, %388 : vector<1x8xf32>
    %390 = math.exp %389 : vector<1x8xf32>
    %391 = arith.subf %385, %388 : vector<1x8xf32>
    %392 = math.exp %391 : vector<1x8xf32>
    %393 = arith.subf %386, %388 : vector<1x8xf32>
    %394 = math.exp %393 : vector<1x8xf32>
    %395 = arith.addf %390, %392 : vector<1x8xf32>
    %396 = arith.addf %395, %394 : vector<1x8xf32>
    %397 = tpu.reciprocal %396 {approx = true} : vector<1x8xf32> -> vector<1x8xf32>
    %398 = arith.mulf %390, %397 : vector<1x8xf32>
    %399 = arith.mulf %392, %397 : vector<1x8xf32>
    %400 = arith.mulf %394, %397 : vector<1x8xf32>
    %401 = tpu.concatenate %398, %399, %400 in 0 : vector<1x8xf32>, vector<1x8xf32>, vector<1x8xf32> -> vector<3x8xf32>
    %402 = arith.index_cast %c5_i32 : i32 to index
    %c0_97 = arith.constant 0 : index
    %c0_98 = arith.constant 0 : index
    %403 = vector.load %arg10[%402, %c0_97, %c0_98] : memref<8x3x8xf32, #tpu.memory_space<vmem>>, vector<1x3x8xf32>
    %404 = vector.shape_cast %403 : vector<1x3x8xf32> to vector<3x8xf32>
    %405 = vector.shape_cast %401 : vector<3x8xf32> to vector<1x3x8xf32>
    tpu.vector_store %arg10[%402, %c0_97, %c0_98], %405 {strides = array<i32>} : memref<8x3x8xf32, #tpu.memory_space<vmem>>, vector<1x3x8xf32>,
    %c6_i32 = arith.constant 6 : i32
    %cst_99 = arith.constant dense<0.000000e+00> : vector<32x32xf32>
    %406 = tpu.matmul %0, %371, %cst_99 {dimension_numbers = #tpu.dot_dimension_numbers<[1], [0], [0], [1], [0, 0, 1, 1], [], []>} : vector<32x32xf32>, vector<32x32xf32>, vector<32x32xf32> -> vector<32x32xf32>
    %407 = vector.broadcast %1 : vector<32x1xf32> to vector<32x32xf32>
    %408 = arith.addf %406, %407 : vector<32x32xf32>
    %409 = math.tanh %408 : vector<32x32xf32>
    %cst_100 = arith.constant 5.000000e-02 : f32
    %410 = vector.broadcast %cst_100 : f32 to vector<32x32xf32>
    %411 = arith.mulf %410, %409 : vector<32x32xf32>
    %412 = arith.addf %371, %411 : vector<32x32xf32>
    %cst_101 = arith.constant dense<0.000000e+00> : vector<32x32xf32>
    %413 = tpu.matmul %0, %412, %cst_101 {dimension_numbers = #tpu.dot_dimension_numbers<[1], [0], [0], [1], [0, 0, 1, 1], [], []>} : vector<32x32xf32>, vector<32x32xf32>, vector<32x32xf32> -> vector<32x32xf32>
    %414 = vector.broadcast %1 : vector<32x1xf32> to vector<32x32xf32>
    %415 = arith.addf %413, %414 : vector<32x32xf32>
    %416 = math.tanh %415 : vector<32x32xf32>
    %cst_102 = arith.constant 5.000000e-02 : f32
    %417 = vector.broadcast %cst_102 : f32 to vector<32x32xf32>
    %418 = arith.mulf %417, %416 : vector<32x32xf32>
    %419 = arith.addf %371, %418 : vector<32x32xf32>
    %cst_103 = arith.constant dense<0.000000e+00> : vector<32x32xf32>
    %420 = tpu.matmul %0, %419, %cst_103 {dimension_numbers = #tpu.dot_dimension_numbers<[1], [0], [0], [1], [0, 0, 1, 1], [], []>} : vector<32x32xf32>, vector<32x32xf32>, vector<32x32xf32> -> vector<32x32xf32>
    %421 = vector.broadcast %1 : vector<32x1xf32> to vector<32x32xf32>
    %422 = arith.addf %420, %421 : vector<32x32xf32>
    %423 = math.tanh %422 : vector<32x32xf32>
    %cst_104 = arith.constant 1.000000e-01 : f32
    %424 = vector.broadcast %cst_104 : f32 to vector<32x32xf32>
    %425 = arith.mulf %424, %423 : vector<32x32xf32>
    %426 = arith.addf %371, %425 : vector<32x32xf32>
    %cst_105 = arith.constant dense<0.000000e+00> : vector<32x32xf32>
    %427 = tpu.matmul %0, %426, %cst_105 {dimension_numbers = #tpu.dot_dimension_numbers<[1], [0], [0], [1], [0, 0, 1, 1], [], []>} : vector<32x32xf32>, vector<32x32xf32>, vector<32x32xf32> -> vector<32x32xf32>
    %428 = vector.broadcast %1 : vector<32x1xf32> to vector<32x32xf32>
    %429 = arith.addf %427, %428 : vector<32x32xf32>
    %430 = math.tanh %429 : vector<32x32xf32>
    %cst_106 = arith.constant 2.000000e+00 : f32
    %431 = vector.broadcast %cst_106 : f32 to vector<32x32xf32>
    %432 = arith.mulf %431, %416 : vector<32x32xf32>
    %433 = arith.addf %409, %432 : vector<32x32xf32>
    %cst_107 = arith.constant 2.000000e+00 : f32
    %434 = vector.broadcast %cst_107 : f32 to vector<32x32xf32>
    %435 = arith.mulf %434, %423 : vector<32x32xf32>
    %436 = arith.addf %433, %435 : vector<32x32xf32>
    %437 = arith.addf %436, %430 : vector<32x32xf32>
    %cst_108 = arith.constant 0.0166666675 : f32
    %438 = vector.broadcast %cst_108 : f32 to vector<32x32xf32>
    %439 = arith.mulf %438, %437 : vector<32x32xf32>
    %440 = arith.addf %371, %439 : vector<32x32xf32>
    %441 = vector.extract_strided_slice %440 {offsets = [0, 0], sizes = [32, 24], strides = [1, 1]} : vector<32x32xf32> to vector<32x24xf32>
    %cst_109 = arith.constant dense<0.000000e+00> : vector<4x24xf32>
    %442 = tpu.matmul %2, %441, %cst_109 {dimension_numbers = #tpu.dot_dimension_numbers<[1], [0], [0], [1], [0, 0, 1, 1], [], []>} : vector<4x32xf32>, vector<32x24xf32>, vector<4x24xf32> -> vector<4x24xf32>
    %443 = vector.broadcast %3 : vector<4x1xf32> to vector<4x24xf32>
    %444 = arith.addf %442, %443 : vector<4x24xf32>
    %cst_110 = arith.constant 0.000000e+00 : f32
    %445 = vector.broadcast %cst_110 : f32 to vector<4x24xf32>
    %446 = arith.maximumf %444, %445 : vector<4x24xf32>
    %447 = vector.broadcast %4 : vector<4x1xf32> to vector<4x24xf32>
    %448 = arith.mulf %446, %447 : vector<4x24xf32>
    %cst_111 = arith.constant dense<0.000000e+00> : vector<24xf32>
    %449 = vector.multi_reduction <add>, %448, %cst_111 [0] : vector<4x24xf32> to vector<24xf32>
    %450 = vector.shape_cast %449 : vector<24xf32> to vector<1x24xf32>
    %451 = vector.broadcast %5 : f32 to vector<1x24xf32>
    %452 = arith.addf %450, %451 : vector<1x24xf32>
    %453 = vector.extract_strided_slice %452 {offsets = [0, 0], sizes = [1, 8], strides = [1, 1]} : vector<1x24xf32> to vector<1x8xf32>
    %454 = vector.extract_strided_slice %452 {offsets = [0, 8], sizes = [1, 8], strides = [1, 1]} : vector<1x24xf32> to vector<1x8xf32>
    %455 = vector.extract_strided_slice %452 {offsets = [0, 16], sizes = [1, 8], strides = [1, 1]} : vector<1x24xf32> to vector<1x8xf32>
    %456 = arith.maximumf %453, %454 : vector<1x8xf32>
    %457 = arith.maximumf %456, %455 : vector<1x8xf32>
    %458 = arith.subf %453, %457 : vector<1x8xf32>
    %459 = math.exp %458 : vector<1x8xf32>
    %460 = arith.subf %454, %457 : vector<1x8xf32>
    %461 = math.exp %460 : vector<1x8xf32>
    %462 = arith.subf %455, %457 : vector<1x8xf32>
    %463 = math.exp %462 : vector<1x8xf32>
    %464 = arith.addf %459, %461 : vector<1x8xf32>
    %465 = arith.addf %464, %463 : vector<1x8xf32>
    %466 = tpu.reciprocal %465 {approx = true} : vector<1x8xf32> -> vector<1x8xf32>
    %467 = arith.mulf %459, %466 : vector<1x8xf32>
    %468 = arith.mulf %461, %466 : vector<1x8xf32>
    %469 = arith.mulf %463, %466 : vector<1x8xf32>
    %470 = tpu.concatenate %467, %468, %469 in 0 : vector<1x8xf32>, vector<1x8xf32>, vector<1x8xf32> -> vector<3x8xf32>
    %471 = arith.index_cast %c6_i32 : i32 to index
    %c0_112 = arith.constant 0 : index
    %c0_113 = arith.constant 0 : index
    %472 = vector.load %arg10[%471, %c0_112, %c0_113] : memref<8x3x8xf32, #tpu.memory_space<vmem>>, vector<1x3x8xf32>
    %473 = vector.shape_cast %472 : vector<1x3x8xf32> to vector<3x8xf32>
    %474 = vector.shape_cast %470 : vector<3x8xf32> to vector<1x3x8xf32>
    tpu.vector_store %arg10[%471, %c0_112, %c0_113], %474 {strides = array<i32>} : memref<8x3x8xf32, #tpu.memory_space<vmem>>, vector<1x3x8xf32>,
    %c7_i32 = arith.constant 7 : i32
    %cst_114 = arith.constant dense<0.000000e+00> : vector<32x32xf32>
    %475 = tpu.matmul %0, %440, %cst_114 {dimension_numbers = #tpu.dot_dimension_numbers<[1], [0], [0], [1], [0, 0, 1, 1], [], []>} : vector<32x32xf32>, vector<32x32xf32>, vector<32x32xf32> -> vector<32x32xf32>
    %476 = vector.broadcast %1 : vector<32x1xf32> to vector<32x32xf32>
    %477 = arith.addf %475, %476 : vector<32x32xf32>
    %478 = math.tanh %477 : vector<32x32xf32>
    %cst_115 = arith.constant 5.000000e-02 : f32
    %479 = vector.broadcast %cst_115 : f32 to vector<32x32xf32>
    %480 = arith.mulf %479, %478 : vector<32x32xf32>
    %481 = arith.addf %440, %480 : vector<32x32xf32>
    %cst_116 = arith.constant dense<0.000000e+00> : vector<32x32xf32>
    %482 = tpu.matmul %0, %481, %cst_116 {dimension_numbers = #tpu.dot_dimension_numbers<[1], [0], [0], [1], [0, 0, 1, 1], [], []>} : vector<32x32xf32>, vector<32x32xf32>, vector<32x32xf32> -> vector<32x32xf32>
    %483 = vector.broadcast %1 : vector<32x1xf32> to vector<32x32xf32>
    %484 = arith.addf %482, %483 : vector<32x32xf32>
    %485 = math.tanh %484 : vector<32x32xf32>
    %cst_117 = arith.constant 5.000000e-02 : f32
    %486 = vector.broadcast %cst_117 : f32 to vector<32x32xf32>
    %487 = arith.mulf %486, %485 : vector<32x32xf32>
    %488 = arith.addf %440, %487 : vector<32x32xf32>
    %cst_118 = arith.constant dense<0.000000e+00> : vector<32x32xf32>
    %489 = tpu.matmul %0, %488, %cst_118 {dimension_numbers = #tpu.dot_dimension_numbers<[1], [0], [0], [1], [0, 0, 1, 1], [], []>} : vector<32x32xf32>, vector<32x32xf32>, vector<32x32xf32> -> vector<32x32xf32>
    %490 = vector.broadcast %1 : vector<32x1xf32> to vector<32x32xf32>
    %491 = arith.addf %489, %490 : vector<32x32xf32>
    %492 = math.tanh %491 : vector<32x32xf32>
    %cst_119 = arith.constant 1.000000e-01 : f32
    %493 = vector.broadcast %cst_119 : f32 to vector<32x32xf32>
    %494 = arith.mulf %493, %492 : vector<32x32xf32>
    %495 = arith.addf %440, %494 : vector<32x32xf32>
    %cst_120 = arith.constant dense<0.000000e+00> : vector<32x32xf32>
    %496 = tpu.matmul %0, %495, %cst_120 {dimension_numbers = #tpu.dot_dimension_numbers<[1], [0], [0], [1], [0, 0, 1, 1], [], []>} : vector<32x32xf32>, vector<32x32xf32>, vector<32x32xf32> -> vector<32x32xf32>
    %497 = vector.broadcast %1 : vector<32x1xf32> to vector<32x32xf32>
    %498 = arith.addf %496, %497 : vector<32x32xf32>
    %499 = math.tanh %498 : vector<32x32xf32>
    %cst_121 = arith.constant 2.000000e+00 : f32
    %500 = vector.broadcast %cst_121 : f32 to vector<32x32xf32>
    %501 = arith.mulf %500, %485 : vector<32x32xf32>
    %502 = arith.addf %478, %501 : vector<32x32xf32>
    %cst_122 = arith.constant 2.000000e+00 : f32
    %503 = vector.broadcast %cst_122 : f32 to vector<32x32xf32>
    %504 = arith.mulf %503, %492 : vector<32x32xf32>
    %505 = arith.addf %502, %504 : vector<32x32xf32>
    %506 = arith.addf %505, %499 : vector<32x32xf32>
    %cst_123 = arith.constant 0.0166666675 : f32
    %507 = vector.broadcast %cst_123 : f32 to vector<32x32xf32>
    %508 = arith.mulf %507, %506 : vector<32x32xf32>
    %509 = arith.addf %440, %508 : vector<32x32xf32>
    %510 = vector.extract_strided_slice %509 {offsets = [0, 0], sizes = [32, 24], strides = [1, 1]} : vector<32x32xf32> to vector<32x24xf32>
    %cst_124 = arith.constant dense<0.000000e+00> : vector<4x24xf32>
    %511 = tpu.matmul %2, %510, %cst_124 {dimension_numbers = #tpu.dot_dimension_numbers<[1], [0], [0], [1], [0, 0, 1, 1], [], []>} : vector<4x32xf32>, vector<32x24xf32>, vector<4x24xf32> -> vector<4x24xf32>
    %512 = vector.broadcast %3 : vector<4x1xf32> to vector<4x24xf32>
    %513 = arith.addf %511, %512 : vector<4x24xf32>
    %cst_125 = arith.constant 0.000000e+00 : f32
    %514 = vector.broadcast %cst_125 : f32 to vector<4x24xf32>
    %515 = arith.maximumf %513, %514 : vector<4x24xf32>
    %516 = vector.broadcast %4 : vector<4x1xf32> to vector<4x24xf32>
    %517 = arith.mulf %515, %516 : vector<4x24xf32>
    %cst_126 = arith.constant dense<0.000000e+00> : vector<24xf32>
    %518 = vector.multi_reduction <add>, %517, %cst_126 [0] : vector<4x24xf32> to vector<24xf32>
    %519 = vector.shape_cast %518 : vector<24xf32> to vector<1x24xf32>
    %520 = vector.broadcast %5 : f32 to vector<1x24xf32>
    %521 = arith.addf %519, %520 : vector<1x24xf32>
    %522 = vector.extract_strided_slice %521 {offsets = [0, 0], sizes = [1, 8], strides = [1, 1]} : vector<1x24xf32> to vector<1x8xf32>
    %523 = vector.extract_strided_slice %521 {offsets = [0, 8], sizes = [1, 8], strides = [1, 1]} : vector<1x24xf32> to vector<1x8xf32>
    %524 = vector.extract_strided_slice %521 {offsets = [0, 16], sizes = [1, 8], strides = [1, 1]} : vector<1x24xf32> to vector<1x8xf32>
    %525 = arith.maximumf %522, %523 : vector<1x8xf32>
    %526 = arith.maximumf %525, %524 : vector<1x8xf32>
    %527 = arith.subf %522, %526 : vector<1x8xf32>
    %528 = math.exp %527 : vector<1x8xf32>
    %529 = arith.subf %523, %526 : vector<1x8xf32>
    %530 = math.exp %529 : vector<1x8xf32>
    %531 = arith.subf %524, %526 : vector<1x8xf32>
    %532 = math.exp %531 : vector<1x8xf32>
    %533 = arith.addf %528, %530 : vector<1x8xf32>
    %534 = arith.addf %533, %532 : vector<1x8xf32>
    %535 = tpu.reciprocal %534 {approx = true} : vector<1x8xf32> -> vector<1x8xf32>
    %536 = arith.mulf %528, %535 : vector<1x8xf32>
    %537 = arith.mulf %530, %535 : vector<1x8xf32>
    %538 = arith.mulf %532, %535 : vector<1x8xf32>
    %539 = tpu.concatenate %536, %537, %538 in 0 : vector<1x8xf32>, vector<1x8xf32>, vector<1x8xf32> -> vector<3x8xf32>
    %540 = arith.index_cast %c7_i32 : i32 to index
    %c0_127 = arith.constant 0 : index
    %c0_128 = arith.constant 0 : index
    %541 = vector.load %arg10[%540, %c0_127, %c0_128] : memref<8x3x8xf32, #tpu.memory_space<vmem>>, vector<1x3x8xf32>
    %542 = vector.shape_cast %541 : vector<1x3x8xf32> to vector<3x8xf32>
    %543 = vector.shape_cast %539 : vector<3x8xf32> to vector<1x3x8xf32>
    tpu.vector_store %arg10[%540, %c0_127, %c0_128], %543 {strides = array<i32>} : memref<8x3x8xf32, #tpu.memory_space<vmem>>, vector<1x3x8xf32>,
    %c7_i32_129 = arith.constant 7 : i32
    return
  }
  func.func @transform_0(%arg0: i32) -> (i32, i32) {
    %c0_i32 = arith.constant 0 : i32
    %c0_i32_0 = arith.constant 0 : i32
    return %c0_i32, %arg0 : i32, i32
  }
  func.func @transform_1(%arg0: i32) -> (i32, i32) {
    %c0_i32 = arith.constant 0 : i32
    %c0_i32_0 = arith.constant 0 : i32
    %c0_i32_1 = arith.constant 0 : i32
    return %c0_i32, %c0_i32_0 : i32, i32
  }
  func.func @transform_2(%arg0: i32) -> (i32, i32) {
    %c0_i32 = arith.constant 0 : i32
    %c0_i32_0 = arith.constant 0 : i32
    %c0_i32_1 = arith.constant 0 : i32
    return %c0_i32, %c0_i32_0 : i32, i32
  }
  func.func @transform_3(%arg0: i32) -> (i32, i32) {
    %c0_i32 = arith.constant 0 : i32
    %c0_i32_0 = arith.constant 0 : i32
    %c0_i32_1 = arith.constant 0 : i32
    return %c0_i32, %c0_i32_0 : i32, i32
  }
  func.func @transform_4(%arg0: i32) -> (i32, i32) {
    %c0_i32 = arith.constant 0 : i32
    %c0_i32_0 = arith.constant 0 : i32
    %c0_i32_1 = arith.constant 0 : i32
    return %c0_i32, %c0_i32_0 : i32, i32
  }
  func.func @transform_5(%arg0: i32) -> (i32, i32) {
    %c0_i32 = arith.constant 0 : i32
    %c0_i32_0 = arith.constant 0 : i32
    %c0_i32_1 = arith.constant 0 : i32
    return %c0_i32, %c0_i32_0 : i32, i32
  }
  func.func @transform_6(%arg0: i32) -> (i32, i32) {
    %c0_i32 = arith.constant 0 : i32
    %c0_i32_0 = arith.constant 0 : i32
    %c0_i32_1 = arith.constant 0 : i32
    return %c0_i32, %c0_i32_0 : i32, i32
  }
  func.func @transform_7(%arg0: i32) -> (i32, i32) {
    %c0_i32 = arith.constant 0 : i32
    %c0_i32_0 = arith.constant 0 : i32
    %c0_i32_1 = arith.constant 0 : i32
    return %c0_i32, %c0_i32_0 : i32, i32
  }
  func.func @transform_8(%arg0: i32) -> i32 {
    %c0_i32 = arith.constant 0 : i32
    %c0_i32_0 = arith.constant 0 : i32
    return %c0_i32 : i32
  }
  func.func @transform_9(%arg0: i32) -> (i32, i32, i32) {
    %c0_i32 = arith.constant 0 : i32
    %c0_i32_0 = arith.constant 0 : i32
    %c0_i32_1 = arith.constant 0 : i32
    return %c0_i32, %c0_i32_0, %arg0 : i32, i32, i32
  }
}

</mosaic_0001>

<bundles_post_ra>
// kernel: tpu_custom_call.1
= control target key start
LH: loop header
LB: loop body
LE: loop exit
PB: predicated region body
PF: predicated region fallthrough
CT: control target
= control target key end

     0   :  { %v2678_v0 = vmov 0   ;;  %vm145_vm0 = vcmask 1044480   ;;  %s2680_s11 = smov 8   ;;  %vm167_vm1 = vcmask 64512   ;;  %vm172_vm2 = vcmask 130048   ;;  %s2681_s12 = smov 112   ;;  %s3963_s2 = inlined_call_operand.vmem [shape: f32[32,1], index: 2, kind: input, shape index: {}]   ;;  %s3964_s1 = inlined_call_operand.vmem [shape: f32[32,1], index: 1, kind: input, shape index: {}]   ;;  %s3965_s0 = inlined_call_operand.vmem [shape: f32[35,8], index: 0, kind: input, shape index: {}]   ;;  %s3966_s4 = inlined_call_operand.vmem [shape: f32[32,1], index: 4, kind: input, shape index: {}]   ;;  %s3967_s7 = inlined_call_operand.vmem [shape: f32[4,1], index: 7, kind: input, shape index: {}]   ;;  %s3968_s6 = inlined_call_operand.vmem [shape: f32[4,1], index: 6, kind: input, shape index: {}]   ;;  %s3969_s5 = inlined_call_operand.vmem [shape: f32[4,32], index: 5, kind: input, shape index: {}]   ;;  %s3970_s3 = inlined_call_operand.vmem [shape: f32[32,32], index: 3, kind: input, shape index: {}]   ;;  %s3971_s8 = inlined_call_operand.<no memory space> [shape: f32[1], index: 8, kind: input, shape index: {}]   ;;  %s3972_s9 = inlined_call_operand.vmem [shape: f32[8,3,8], index: 9, kind: output, shape index: {}]  }
   0x1   :  { %2378 = vset.pattern.permute.xlu1 %v2678_v0  ;;  %2377 = vset.pattern.permute.xlu0 %v2678_v0  ;;  %v57_v1 = vld [vmem:[%s3963_s2 + $0x18] sm:$0xff]  ;;  %v56_v3 = vld [vmem:[%s3963_s2 + $0x10] sm:$0xff]  ;;  %v51_v5 = vld [vmem:[%s3964_s1 + $0x8] sm:$0xff]  ;;  %vm177_vm3 = vcmask 195584   ;;  %vm187_vm4 = vcmask 261120   ;;  %vm218_vm5 = vcmask 191488  }
   0x2   :  { %v53_v2 = vld [vmem:[%s3964_s1 + $0x18] sm:$0xff]  ;;  %100 = vperm.xlu1 %2378, %v57_v1   ;;  %2379 = vset.pattern.permute.xlu2 %v2678_v0  ;;  %v52_v4 = vld [vmem:[%s3964_s1 + $0x10] sm:$0xff]  ;;  %v50_v6 = vld [vmem:[%s3964_s1] sm:$0xff]  ;;  %s2679_s1 = smov 24   ;;  %s2682_s13 = smov 120   ;;  %vm284_vm6 = vcmask 1040384  }
   0x3   :  { %75 = vperm.xlu0 %2377, %v53_v2   ;;  %95 = vperm.xlu2 %2379, %v56_v3   ;;  %v55_v7 = vld [vmem:[%s3963_s2 + $0x8] sm:$0xff]  ;;  %v54_v8 = vld [vmem:[%s3963_s2] sm:$0xff]  ;;  %v48_v9 = vld [vmem:[%s3965_s0 + $0x18] sm:$0xff]  ;;  %vm286_vm7 = vcmask 1041408   ;;  %vm288_vm8 = vcmask 59392  }
   0x4   :  { %v49_v10 = vld [vmem:[%s3965_s0 + $0x20] sm:$0x7]  ;;  %v151_v11 = vrot.slane %v48_v9, 3  ;;  %v47_v14 = vld [vmem:[%s3965_s0 + $0x10] sm:$0xff]  ;;  %v46_v37 = vld [vmem:[%s3965_s0 + $0x8] sm:$0xff] }
   0x5   :  { %v153_v12 = vrot.slane %v49_v10, 3  ;;  %v149_v15 = vrot.slane %v47_v14, 3  ;;  %v45_v17 = vld [vmem:[%s3965_s0] sm:$0xff]  ;;  %v147_v44 = vrot.slane %v46_v37, 3  ;;  %v40_v52 = vld [vmem:[%s3966_s4 + $0x18] sm:$0xff]  ;;  %v38_v53 = vld [vmem:[%s3966_s4 + $0x8] sm:$0xff] }
   0x6   :  { %v78_v18 = vperm.slane %v45_v17, 0  ;;  %v111_v19 = vperm.slane %v45_v17, 1  ;;  %v146_v43 = vrot.slane %v45_v17, 3  ;;  %v39_v54 = vld [vmem:[%s3966_s4 + $0x10] sm:$0xff]  ;;  %v37_v55 = vld [vmem:[%s3966_s4] sm:$0xff] }
   0x7   :  { %v154_v13 = vsel %vm145_vm0, %v151_v11, %v153_v12  ;;  %v152_v16 = vsel %vm145_vm0, %v149_v15, %v151_v11  ;;  %v150_v51 = vsel %vm145_vm0, %v147_v44, %v149_v15  ;;  %v43_v56 = vld [vmem:[%s3967_s7] sm:$0xf] }
   0x8   :  { %v148_v50 = vsel %vm145_vm0, %v146_v43, %v147_v44  ;;  %v42_v57 = vld [vmem:[%s3968_s6] sm:$0xf] }
   0xa   :  { %65 = vperm.xlu1 %2378, %v51_v5  }
   0xb   :  { %70 = vperm.xlu0 %2377, %v52_v4   ;;  %60 = vperm.xlu2 %2379, %v50_v6  }
  0x12   :  { %85 = vperm.xlu1 %2378, %v54_v8  }
  0x13   :  { %90 = vperm.xlu0 %2377, %v55_v7  }
  0x1a   :  { %161 = vrot.lane.b32.xlu1 %v154_v13, %s2679_s1 }
  0x1b   :  { %159 = vrot.lane.b32.xlu0 %v152_v16, %s2679_s1 }
  0x5d   :  { %v96_v24 = vpop.permute.xlu2 %95 }
  0x65   :  { %v61_v35 = vpop.permute.xlu2 %60 }
  0x66   :  { %v79_v38 = vmul.f32 %v78_v18, %v61_v35  ;;  %v112_v39 = vmul.f32 %v111_v19, %v61_v35 }
  0x74   :  { %v101_v20 = vpop.permute.xlu1 %100 }
  0x75   :  { %v76_v21 = vpop.permute.xlu0 %75 }
  0x76   :  { %v82_v22 = vmul.f32 %v78_v18, %v76_v21  ;;  %v115_v23 = vmul.f32 %v111_v19, %v76_v21  ;;  %v2848_v21 = vld [vmem:[%s3970_s3 + $0x8] sm:$0xff] }
  0x78   :  { %v106_v25 = vadd.f32 %v101_v20, %v82_v22  ;;  %v119_v26 = vadd.f32 %v115_v23, %v101_v20  ;;  %v2855_v22 = vld [vmem:[%s3970_s3 + $0x10] sm:$0xff]  ;;  %v2862_v23 = vld [vmem:[%s3970_s3 + $0x18] sm:$0xff] }
  0x7a   :  { %v123_v27 = vmax.f32 %v119_v26, 0.0  ;;  %v110_v58 = vmax.f32 %v106_v25, 0.0 }
  0x7c   :  { %134 = vrot.lane.b32.xlu2 %v123_v27, %s2680_s11  ;;  %v66_v29 = vpop.permute.xlu1 %65 }
  0x7d   :  { %v71_v28 = vpop.permute.xlu0 %70  ;;  %v80_v32 = vmul.f32 %v78_v18, %v66_v29  ;;  %v113_v40 = vmul.f32 %v111_v19, %v66_v29 }
  0x7e   :  { %v81_v30 = vmul.f32 %v78_v18, %v71_v28  ;;  %v114_v31 = vmul.f32 %v111_v19, %v71_v28  ;;  %v2829_v18 = vld [vmem:[%s3969_s5] sm:$0xf] }
  0x7f   :  { %v2834_v19 = vld [vmem:[%s3970_s3] sm:$0xff] }
  0x80   :  { %v105_v33 = vadd.f32 %v96_v24, %v81_v30  ;;  %v118_v34 = vadd.f32 %v114_v31, %v96_v24 }
  0x82   :  { %v122_v36 = vmax.f32 %v118_v34, 0.0  ;;  %v109_v3 = vmax.f32 %v105_v33, 0.0 }
  0x84   :  { %132 = vrot.lane.b32.xlu0 %v122_v36, %s2680_s11  ;;  %v86_v42 = vpop.permute.xlu1 %85 }
  0x85   :  { %v91_v41 = vpop.permute.xlu0 %90  ;;  %v103_v46 = vadd.f32 %v86_v42, %v79_v38  ;;  %v116_v47 = vadd.f32 %v112_v39, %v86_v42  ;;  %v2882_v42 = vstv %s3971_s8  ;;  %s2683_s8 = smov 16  }
  0x86   :  { %v117_v45 = vadd.f32 %v113_v40, %v91_v41  ;;  %v104_v2 = vadd.f32 %v91_v41, %v80_v32 }
  0x87   :  { %v120_v49 = vmax.f32 %v116_v47, 0.0  ;;  %v107_v12 = vmax.f32 %v103_v46, 0.0 }
  0x88   :  { %v121_v48 = vmax.f32 %v117_v45, 0.0  ;;  %v108_v4 = vmax.f32 %v104_v2, 0.0 }
  0x89   :  { %128 = vrot.lane.b32.xlu1 %v120_v49, %s2680_s11 }
  0x8a   :  { %130 = vrot.lane.b32.xlu2 %v121_v48, %s2680_s11 }
  0x8c   :  { %155 = vrot.lane.b32.xlu0 %v148_v50, %s2679_s1  ;;  %v162_v60 = vpop.permute.xlu1 %161 }
  0x8d   :  { %v160_v0 = vpop.permute.xlu0 %159 }
  0x91   :  { %307 = vperm.xlu1 %2378, %v40_v52  }
  0x92   :  { %157 = vrot.lane.b32.xlu2 %v150_v51, %s2679_s1 }
  0x94   :  { %297 = vperm.xlu0 %2377, %v38_v53  }
  0x99   :  { %292 = vperm.xlu1 %2378, %v37_v55  }
  0x9a   :  { %302 = vperm.xlu2 %2379, %v39_v54  }
  0x9c   :  { %214 = vperm.xlu0 %2377, %v43_v56  }
  0xa2   :  { %184 = vperm.xlu2 %2379, %v42_v57  }
  0xd6   :  { %v135_v59 = vpop.permute.xlu2 %134 }
  0xd7   :  { %v171_v61 = vsel %vm167_vm1, %v110_v58, %v135_v59 }
  0xd8   :  { %v176_v62 = vsel %vm172_vm2, %v171_v61, 0.0 }
  0xd9   :  { %v2806_v63 = vsel %vm177_vm3, %v176_v62, %v162_v60 }
  0xda   :  { %203 = vmatpush.msra.mxu0 %v2806_v63  ;;  %334 = vmatpush.msra.mxu1 %v2806_v63 }
  0xe4   :  { %v131_v1 = vpop.permute.xlu2 %130 }
  0xe5   :  { %v169_v6 = vsel %vm167_vm1, %v108_v4, %v131_v1 }
  0xe6   :  { %v174_v11 = vsel %vm172_vm2, %v169_v6, 0.0 }
  0xec   :  { %v158_v8 = vpop.permute.xlu2 %157 }
  0xed   :  { %v2820_v13 = vsel %vm177_vm3, %v174_v11, %v158_v8 }
  0xf4   :  { %v2866_v24 = vpop.permute.xlu2 %302 }
  0xf6   :  { %v133_v5 = vpop.permute.xlu0 %132 }
  0xf7   :  { %v170_v7 = vsel %vm167_vm1, %v109_v3, %v133_v5 }
  0xf8   :  { %v175_v9 = vsel %vm172_vm2, %v170_v7, 0.0 }
  0xf9   :  { %v2814_v10 = vsel %vm177_vm3, %v175_v9, %v160_v0 }
  0xfa   :  { %204 = vmatpush.msra.mxu0 %v2814_v10  ;;  %335 = vmatpush.msra.mxu1 %v2814_v10 }
  0xfb   :  { %v129_v14 = vpop.permute.xlu1 %128 }
  0xfc   :  { %205 = vmatpush.msra.mxu0 %v2820_v13  ;;  %336 = vmatpush.msra.mxu1 %v2820_v13  ;;  %v168_v15 = vsel %vm167_vm1, %v107_v12, %v129_v14  ;;  %v2870_v26 = vpop.permute.xlu2 %184 }
  0xfd   :  { %v173_v16 = vsel %vm172_vm2, %v168_v15, 0.0 }
  0xfe   :  { %v156_v17 = vpop.permute.xlu0 %155 }
  0xff   :  { %v2837_v20 = vsel %vm177_vm3, %v173_v16, %v156_v17 }
 0x100   :  { %206 = vmatpush.msra.mxu0 %v2837_v20  ;;  %337 = vmatpush.msra.mxu1 %v2837_v20 }
 0x101   :  { %2244 = vmatmul.msk.f32.vlgmr.msra.gmra.mxu0 %vm187_vm4, %v2829_v18  ;;  %2245 = vmatmul.msk.f32.vlgmr.msra.gmra.mxu1 %vm187_vm4, %v2834_v19 }
 0x103   :  { %v2877_v38 = vpop.permute.xlu1 %307 }
 0x106   :  { %v2868_v25 = vpop.permute.xlu0 %297 }
 0x109   :  { %2246 = vmatmul.msk.f32.gmra.mxu1 %vm187_vm4, %v2848_v21 }
 0x10b   :  { %v2893_v47 = vpop.permute.xlu1 %292 }
 0x10e   :  { %v2873_v31 = vpop.permute.xlu0 %214 }
 0x111   :  { %2247 = vmatmul.msk.f32.gmra.mxu1 %vm187_vm4, %v2855_v22 }
 0x119   :  { %2248 = vmatmul.msk.f32.gmra.mxu1 %vm187_vm4, %v2862_v23 }
 0x17e   :  { %v208_v27 = vpop.f32.mrf.mxu0  ;;  %v339_v28 = vpop.f32.mrf.mxu1 }
 0x17f   :  { %v209_v29 = vadd.f32 %v208_v27, %v2870_v26  ;;  %v340_v49 = vadd.f32 %v339_v28, %v2893_v47 }
 0x181   :  { %v211_v30 = vmax.f32 %v209_v29, 0.0 }
 0x183   :  { %v217_v32 = vmul.f32 %v2873_v31, %v211_v30 }
 0x185   :  { %v219_v33 = vsel %vm218_vm5, %v217_v32, 0.0 }
 0x186   :  { %v220_v34 = vrot.slane %v219_v33, 4  ;;  %v342_v35 = vpop.f32.mrf.mxu1 }
 0x187   :  { %v343_v46 = vadd.f32 %v342_v35, %v2868_v25 }
 0x188   :  { %v221_v36 = vadd.f32 %v220_v34, %v219_v33 }
 0x18a   :  { %v222_v37 = vrot.slane %v221_v36, 2 }
 0x18c   :  { %v223_v39 = vadd.f32 %v222_v37, %v221_v36 }
 0x18e   :  { %v224_v40 = vrot.slane %v223_v39, 1  ;;  %v345_v41 = vpop.f32.mrf.mxu1 }
 0x18f   :  { %v346_v45 = vadd.f32 %v345_v41, %v2866_v24 }
 0x190   :  { %v225_v43 = vadd.f32 %v224_v40, %v223_v39 }
 0x191   :  { %2380 = vtanh.f32 %v346_v45 }
 0x192   :  { %v2885_v44 = vadd.f32 %v2882_v42, %v225_v43  ;;  %2382 = vtanh.f32 %v343_v46 }
 0x194   :  { %233 = vrot.lane.b32.xlu2 %v2885_v44, %s2681_s12  ;;  %229 = vrot.lane.b32.xlu1 %v2885_v44, %s2682_s13 }
 0x196   :  { %v348_v48 = vpop.f32.mrf.mxu1 }
 0x197   :  { %v349_v50 = vadd.f32 %v348_v48, %v2877_v38  ;;  %v2897_v51 = vpop.eup %2380 }
 0x198   :  { %v2899_v52 = vpop.eup %2382  ;;  %v357_v55 = vmul.f32 0.05, %v2897_v51 }
 0x199   :  { %2384 = vtanh.f32 %v349_v50  ;;  %v356_v58 = vmul.f32 0.05, %v2899_v52 }
 0x19a   :  { %2386 = vtanh.f32 %v340_v49  ;;  %v361_v59 = vadd.f32 %v357_v55, %v2814_v10 }
 0x19b   :  { %v360_v61 = vadd.f32 %v356_v58, %v2820_v13 }
 0x19f   :  { %v2901_v53 = vpop.eup %2384 }
 0x1a0   :  { %v358_v54 = vmul.f32 0.05, %v2901_v53  ;;  %v2905_v56 = vpop.eup %2386 }
 0x1a1   :  { %v355_v60 = vmul.f32 0.05, %v2905_v56 }
 0x1a2   :  { %v362_v57 = vadd.f32 %v358_v54, %v2806_v63 }
 0x1a3   :  { %v359_v62 = vadd.f32 %v355_v60, %v2837_v20 }
 0x1a4   :  { %375 = vmatpush.msra.mxu2 %v362_v57 }
 0x1a6   :  { %376 = vmatpush.msra.mxu2 %v361_v59 }
 0x1a8   :  { %377 = vmatpush.msra.mxu2 %v360_v61 }
 0x1aa   :  { %378 = vmatpush.msra.mxu2 %v359_v62 }
 0x1ab   :  { %2249 = vmatmul.msk.f32.vlgmr.msra.gmra.mxu2 %vm187_vm4, %v2834_v19 }
 0x1b3   :  { %2250 = vmatmul.msk.f32.gmra.mxu2 %vm187_vm4, %v2848_v21 }
 0x1bb   :  { %2251 = vmatmul.msk.f32.gmra.mxu2 %vm187_vm4, %v2855_v22 }
 0x1c3   :  { %2252 = vmatmul.msk.f32.gmra.mxu2 %vm187_vm4, %v2862_v23 }
 0x1ee   :  { %v234_v2 = vpop.permute.xlu2 %233 }
 0x206   :  { %v230_v0 = vpop.permute.xlu1 %229 }
 0x207   :  { %v232_v1 = vmax.f32 %v2885_v44, %v230_v0 }
 0x209   :  { %v2922_v3 = vmax.f32 %v232_v1, %v234_v2 }
 0x20b   :  { %247 = vrot.lane.b32.xlu1 %v2922_v3, %s2683_s8  ;;  %241 = vrot.lane.b32.xlu0 %v2922_v3, %s2680_s11 }
 0x22e   :  { %v380_v4 = vpop.f32.mrf.mxu2 }
 0x22f   :  { %v381_v11 = vadd.f32 %v380_v4, %v2893_v47 }
 0x236   :  { %v383_v5 = vpop.f32.mrf.mxu2 }
 0x237   :  { %v384_v8 = vadd.f32 %v383_v5, %v2868_v25 }
 0x23e   :  { %v386_v6 = vpop.f32.mrf.mxu2 }
 0x23f   :  { %v387_v7 = vadd.f32 %v386_v6, %v2866_v24 }
 0x241   :  { %2388 = vtanh.f32 %v387_v7 }
 0x242   :  { %2390 = vtanh.f32 %v384_v8 }
 0x246   :  { %v389_v9 = vpop.f32.mrf.mxu2 }
 0x247   :  { %v390_v12 = vadd.f32 %v389_v9, %v2877_v38  ;;  %v2389_v14 = vpop.eup %2388 }
 0x248   :  { %v2391_v15 = vpop.eup %2390  ;;  %v398_v27 = vmul.f32 0.05, %v2389_v14  ;;  %v480_v1 = vmul.f32 2.0, %v2389_v14 }
 0x249   :  { %2392 = vtanh.f32 %v390_v12  ;;  %v397_v30 = vmul.f32 0.05, %v2391_v15  ;;  %v479_v57 = vmul.f32 2.0, %v2391_v15 }
 0x24a   :  { %2394 = vtanh.f32 %v381_v11  ;;  %v402_v32 = vadd.f32 %v398_v27, %v2814_v10 }
 0x24b   :  { %v401_v34 = vadd.f32 %v397_v30, %v2820_v13  ;;  %v483_v61 = vadd.f32 %v2899_v52, %v479_v57 }
 0x24f   :  { %v2393_v16 = vpop.eup %2392 }
 0x250   :  { %v399_v17 = vmul.f32 0.05, %v2393_v16  ;;  %v2395_v28 = vpop.eup %2394  ;;  %v481_v8 = vmul.f32 2.0, %v2393_v16 }
 0x251   :  { %v396_v33 = vmul.f32 0.05, %v2395_v28  ;;  %v478_v45 = vmul.f32 2.0, %v2395_v28 }
 0x252   :  { %v403_v29 = vadd.f32 %v399_v17, %v2806_v63  ;;  %v485_v11 = vadd.f32 %v2901_v53, %v481_v8 }
 0x253   :  { %v400_v35 = vadd.f32 %v396_v33, %v2837_v20  ;;  %v482_v50 = vadd.f32 %v2905_v56, %v478_v45  ;;  %v484_v56 = vadd.f32 %v2897_v51, %v480_v1 }
 0x254   :  { %416 = vmatpush.msra.mxu3 %v403_v29 }
 0x256   :  { %417 = vmatpush.msra.mxu3 %v402_v32 }
 0x258   :  { %418 = vmatpush.msra.mxu3 %v401_v34 }
 0x25a   :  { %419 = vmatpush.msra.mxu3 %v400_v35 }
 0x25b   :  { %2253 = vmatmul.msk.f32.vlgmr.msra.gmra.mxu3 %vm187_vm4, %v2834_v19 }
 0x263   :  { %2254 = vmatmul.msk.f32.gmra.mxu3 %vm187_vm4, %v2848_v21 }
 0x26b   :  { %2255 = vmatmul.msk.f32.gmra.mxu3 %vm187_vm4, %v2855_v22 }
 0x273   :  { %2256 = vmatmul.msk.f32.gmra.mxu3 %vm187_vm4, %v2862_v23 }
 0x27d   :  { %v242_v36 = vpop.permute.xlu0 %241 }
 0x27e   :  { %v244_v37 = vsub.f32 %v2885_v44, %v242_v36 }
 0x280   :  { %v245_v39 = vmul.f32 1.442695, %v244_v37 }
 0x282   :  { %2396 = vpow2.f32 %v245_v39 }
 0x288   :  { %v2945_v40 = vpop.eup %2396 }
 0x289   :  { %254 = vrot.lane.b32.xlu2 %v2945_v40, %s2682_s13 }
 0x2de   :  { %v421_v41 = vpop.f32.mrf.mxu3 }
 0x2df   :  { %v422_v43 = vadd.f32 %v421_v41, %v2893_v47 }
 0x2e1   :  { %2398 = vtanh.f32 %v422_v43 }
 0x2e6   :  { %v424_v46 = vpop.f32.mrf.mxu3 }
 0x2e7   :  { %v2399_v48 = vpop.eup %2398  ;;  %v425_v49 = vadd.f32 %v424_v46, %v2868_v25 }
 0x2e8   :  { %v486_v54 = vmul.f32 2.0, %v2399_v48  ;;  %v437_v29 = vmul.f32 0.1, %v2399_v48 }
 0x2e9   :  { %2400 = vtanh.f32 %v425_v49 }
 0x2ea   :  { %v490_v55 = vadd.f32 %v486_v54, %v482_v50  ;;  %v441_v16 = vadd.f32 %v437_v29, %v2837_v20 }
 0x2ee   :  { %v427_v58 = vpop.f32.mrf.mxu3 }
 0x2ef   :  { %v2401_v59 = vpop.eup %2400  ;;  %v428_v60 = vadd.f32 %v427_v58, %v2866_v24 }
 0x2f0   :  { %v487_v62 = vmul.f32 2.0, %v2401_v59  ;;  %v438_v27 = vmul.f32 0.1, %v2401_v59 }
 0x2f1   :  { %2402 = vtanh.f32 %v428_v60 }
 0x2f2   :  { %v491_v0 = vadd.f32 %v487_v62, %v483_v61  ;;  %v442_v51 = vadd.f32 %v438_v27, %v2820_v13 }
 0x2f6   :  { %v430_v2 = vpop.f32.mrf.mxu3 }
 0x2f7   :  { %v2403_v4 = vpop.eup %2402  ;;  %v431_v5 = vadd.f32 %v430_v2, %v2877_v38 }
 0x2f8   :  { %v488_v6 = vmul.f32 2.0, %v2403_v4  ;;  %v439_v52 = vmul.f32 0.1, %v2403_v4 }
 0x2f9   :  { %2404 = vtanh.f32 %v431_v5 }
 0x2fa   :  { %v492_v7 = vadd.f32 %v488_v6, %v484_v56  ;;  %v443_v28 = vadd.f32 %v439_v52, %v2814_v10 }
 0x2ff   :  { %v2405_v9 = vpop.eup %2404 }
 0x300   :  { %v489_v12 = vmul.f32 2.0, %v2405_v9  ;;  %v440_v15 = vmul.f32 0.1, %v2405_v9 }
 0x302   :  { %v444_v17 = vadd.f32 %v440_v15, %v2806_v63  ;;  %v493_v14 = vadd.f32 %v489_v12, %v485_v11 }
 0x304   :  { %457 = vmatpush.msrb.mxu0 %v444_v17 }
 0x306   :  { %458 = vmatpush.msrb.mxu0 %v443_v28 }
 0x308   :  { %459 = vmatpush.msrb.mxu0 %v442_v51 }
 0x30a   :  { %460 = vmatpush.msrb.mxu0 %v441_v16 }
 0x30b   :  { %2257 = vmatmul.msk.f32.vlgmr.msrb.gmra.mxu0 %vm187_vm4, %v2834_v19 }
 0x313   :  { %2258 = vmatmul.msk.f32.gmra.mxu0 %vm187_vm4, %v2848_v21 }
 0x31b   :  { %2259 = vmatmul.msk.f32.gmra.mxu0 %vm187_vm4, %v2855_v22 }
 0x323   :  { %2260 = vmatmul.msk.f32.gmra.mxu0 %vm187_vm4, %v2862_v23 }
 0x388   :  { %v462_v53 = vpop.f32.mrf.mxu0 }
 0x389   :  { %v463_v35 = vadd.f32 %v462_v53, %v2893_v47 }
 0x390   :  { %v465_v30 = vpop.f32.mrf.mxu0 }
 0x391   :  { %v466_v34 = vadd.f32 %v465_v30, %v2868_v25 }
 0x398   :  { %v468_v32 = vpop.f32.mrf.mxu0 }
 0x399   :  { %v469_v33 = vadd.f32 %v468_v32, %v2866_v24 }
 0x39b   :  { %2406 = vtanh.f32 %v469_v33 }
 0x39c   :  { %2408 = vtanh.f32 %v466_v34 }
 0x39d   :  { %2410 = vtanh.f32 %v463_v35 }
 0x3a0   :  { %v471_v36 = vpop.f32.mrf.mxu0 }
 0x3a1   :  { %v472_v37 = vadd.f32 %v471_v36, %v2877_v38  ;;  %v2407_v39 = vpop.eup %2406 }
 0x3a2   :  { %v2409_v41 = vpop.eup %2408  ;;  %v496_v45 = vadd.f32 %v2407_v39, %v492_v7 }
 0x3a3   :  { %2412 = vtanh.f32 %v472_v37  ;;  %v2411_v43 = vpop.eup %2410  ;;  %v495_v48 = vadd.f32 %v2409_v41, %v491_v0 }
 0x3a4   :  { %v494_v50 = vadd.f32 %v2411_v43, %v490_v55  ;;  %v500_v54 = vmul.f32 0.016666668, %v496_v45 }
 0x3a5   :  { %v499_v58 = vmul.f32 0.016666668, %v495_v48 }
 0x3a6   :  { %v498_v60 = vmul.f32 0.016666668, %v494_v50  ;;  %v2977_v61 = vadd.f32 %v500_v54, %v2814_v10 }
 0x3a7   :  { %v2982_v62 = vadd.f32 %v499_v58, %v2820_v13 }
 0x3a8   :  { %v2987_v55 = vadd.f32 %v498_v60, %v2837_v20 }
 0x3a9   :  { %v2413_v46 = vpop.eup %2412 }
 0x3aa   :  { %v497_v49 = vadd.f32 %v2413_v46, %v493_v14 }
 0x3ac   :  { %v501_v57 = vmul.f32 0.016666668, %v497_v49 }
 0x3ae   :  { %v2974_v59 = vadd.f32 %v501_v57, %v2806_v63 }
 0x3b0   :  { %518 = vmatpush.msrb.mxu1 %v2974_v59  ;;  %608 = vmatpush.msrb.mxu2 %v2974_v59 }
 0x3b2   :  { %519 = vmatpush.msrb.mxu1 %v2977_v61  ;;  %609 = vmatpush.msrb.mxu2 %v2977_v61 }
 0x3b4   :  { %520 = vmatpush.msrb.mxu1 %v2982_v62  ;;  %610 = vmatpush.msrb.mxu2 %v2982_v62 }
 0x3b6   :  { %521 = vmatpush.msrb.mxu1 %v2987_v55  ;;  %611 = vmatpush.msrb.mxu2 %v2987_v55 }
 0x3b7   :  { %2261 = vmatmul.msk.f32.vlgmr.msrb.gmra.mxu1 %vm187_vm4, %v2829_v18  ;;  %2263 = vmatmul.msk.f32.vlgmr.msrb.gmra.mxu2 %vm187_vm4, %v2834_v19 }
 0x3bf   :  { %2264 = vmatmul.msk.f32.gmra.mxu2 %vm187_vm4, %v2848_v21 }
 0x3c7   :  { %2265 = vmatmul.msk.f32.gmra.mxu2 %vm187_vm4, %v2855_v22 }
 0x3cf   :  { %2266 = vmatmul.msk.f32.gmra.mxu2 %vm187_vm4, %v2862_v23 }
 0x434   :  { %v523_v63 = vpop.f32.mrf.mxu1 }
 0x435   :  { %v524_v10 = vadd.f32 %v523_v63, %v2870_v26 }
 0x437   :  { %v526_v13 = vmax.f32 %v524_v10, 0.0 }
 0x439   :  { %v527_v20 = vmul.f32 %v526_v13, %v2873_v31 }
 0x43a   :  { %v613_v0 = vpop.f32.mrf.mxu2 }
 0x43b   :  { %v528_v1 = vsel %vm218_vm5, %v527_v20, 0.0  ;;  %v614_v17 = vadd.f32 %v613_v0, %v2893_v47 }
 0x43c   :  { %v529_v2 = vrot.slane %v528_v1, 4 }
 0x43e   :  { %v530_v4 = vadd.f32 %v529_v2, %v528_v1 }
 0x440   :  { %v531_v5 = vrot.slane %v530_v4, 2 }
 0x442   :  { %v532_v56 = vadd.f32 %v531_v5, %v530_v4  ;;  %v616_v6 = vpop.f32.mrf.mxu2 }
 0x443   :  { %v617_v15 = vadd.f32 %v616_v6, %v2868_v25 }
 0x444   :  { %v533_v7 = vrot.slane %v532_v56, 1 }
 0x446   :  { %v534_v8 = vadd.f32 %v533_v7, %v532_v56 }
 0x448   :  { %v3007_v9 = vadd.f32 %v534_v8, %v2882_v42 }
 0x44a   :  { %v619_v11 = vpop.f32.mrf.mxu2  ;;  %541 = vrot.lane.b32.xlu1 %v3007_v9, %s2681_s12  ;;  %537 = vrot.lane.b32.xlu0 %v3007_v9, %s2682_s13 }
 0x44b   :  { %v620_v12 = vadd.f32 %v619_v11, %v2866_v24 }
 0x44d   :  { %2414 = vtanh.f32 %v620_v12 }
 0x44e   :  { %2416 = vtanh.f32 %v617_v15 }
 0x452   :  { %v622_v52 = vpop.f32.mrf.mxu2 }
 0x453   :  { %v623_v27 = vadd.f32 %v622_v52, %v2877_v38  ;;  %v3017_v14 = vpop.eup %2414 }
 0x454   :  { %v3019_v28 = vpop.eup %2416  ;;  %v631_v16 = vmul.f32 0.05, %v3017_v14 }
 0x455   :  { %2418 = vtanh.f32 %v623_v27  ;;  %v630_v32 = vmul.f32 0.05, %v3019_v28 }
 0x456   :  { %2420 = vtanh.f32 %v614_v17  ;;  %v635_v33 = vadd.f32 %v631_v16, %v2977_v61 }
 0x457   :  { %v634_v35 = vadd.f32 %v630_v32, %v2982_v62 }
 0x45b   :  { %v3021_v29 = vpop.eup %2418 }
 0x45c   :  { %v632_v51 = vmul.f32 0.05, %v3021_v29  ;;  %v2421_v53 = vpop.eup %2420 }
 0x45d   :  { %v629_v34 = vmul.f32 0.05, %v2421_v53 }
 0x45e   :  { %v636_v30 = vadd.f32 %v632_v51, %v2974_v59 }
 0x45f   :  { %v633_v36 = vadd.f32 %v629_v34, %v2987_v55 }
 0x460   :  { %649 = vmatpush.msrb.mxu3 %v636_v30 }
 0x462   :  { %650 = vmatpush.msrb.mxu3 %v635_v33 }
 0x464   :  { %651 = vmatpush.msrb.mxu3 %v634_v35 }
 0x466   :  { %652 = vmatpush.msrb.mxu3 %v633_v36 }
 0x467   :  { %2267 = vmatmul.msk.f32.vlgmr.msrb.gmra.mxu3 %vm187_vm4, %v2834_v19 }
 0x46f   :  { %2268 = vmatmul.msk.f32.gmra.mxu3 %vm187_vm4, %v2848_v21 }
 0x477   :  { %2269 = vmatmul.msk.f32.gmra.mxu3 %vm187_vm4, %v2855_v22 }
 0x47f   :  { %2270 = vmatmul.msk.f32.gmra.mxu3 %vm187_vm4, %v2862_v23 }
 0x4ea   :  { %v654_v37 = vpop.f32.mrf.mxu3 }
 0x4eb   :  { %v655_v48 = vadd.f32 %v654_v37, %v2893_v47 }
 0x4f2   :  { %v657_v39 = vpop.f32.mrf.mxu3 }
 0x4f3   :  { %v658_v45 = vadd.f32 %v657_v39, %v2868_v25 }
 0x4fa   :  { %v660_v41 = vpop.f32.mrf.mxu3 }
 0x4fb   :  { %v661_v43 = vadd.f32 %v660_v41, %v2866_v24 }
 0x4fd   :  { %2422 = vtanh.f32 %v661_v43 }
 0x4fe   :  { %2424 = vtanh.f32 %v658_v45 }
 0x502   :  { %v663_v46 = vpop.f32.mrf.mxu3 }
 0x503   :  { %v664_v49 = vadd.f32 %v663_v46, %v2877_v38  ;;  %v2423_v50 = vpop.eup %2422 }
 0x504   :  { %v2425_v54 = vpop.eup %2424  ;;  %v672_v60 = vmul.f32 0.05, %v2423_v50  ;;  %v754_v33 = vmul.f32 2.0, %v2423_v50 }
 0x505   :  { %2426 = vtanh.f32 %v664_v49  ;;  %v671_v13 = vmul.f32 0.05, %v2425_v54  ;;  %v753_v52 = vmul.f32 2.0, %v2425_v54 }
 0x506   :  { %2428 = vtanh.f32 %v655_v48  ;;  %v676_v20 = vadd.f32 %v672_v60, %v2977_v61 }
 0x507   :  { %v675_v1 = vadd.f32 %v671_v13, %v2982_v62  ;;  %v757_v16 = vadd.f32 %v3019_v28, %v753_v52 }
 0x50b   :  { %v2427_v57 = vpop.eup %2426 }
 0x50c   :  { %v673_v58 = vmul.f32 0.05, %v2427_v57  ;;  %v2429_v63 = vpop.eup %2428  ;;  %v755_v41 = vmul.f32 2.0, %v2427_v57 }
 0x50d   :  { %v670_v0 = vmul.f32 0.05, %v2429_v63  ;;  %v752_v56 = vmul.f32 2.0, %v2429_v63 }
 0x50e   :  { %v677_v10 = vadd.f32 %v673_v58, %v2974_v59  ;;  %v759_v45 = vadd.f32 %v3021_v29, %v755_v41 }
 0x50f   :  { %v674_v2 = vadd.f32 %v670_v0, %v2987_v55  ;;  %v756_v11 = vadd.f32 %v2421_v53, %v752_v56  ;;  %v758_v53 = vadd.f32 %v3017_v14, %v754_v33 }
 0x510   :  { %690 = vmatpush.msra.mxu0 %v677_v10 }
 0x512   :  { %691 = vmatpush.msra.mxu0 %v676_v20 }
 0x514   :  { %692 = vmatpush.msra.mxu0 %v675_v1 }
 0x516   :  { %693 = vmatpush.msra.mxu0 %v674_v2 }
 0x517   :  { %2271 = vmatmul.msk.f32.vlgmr.msra.gmra.mxu0 %vm187_vm4, %v2834_v19 }
 0x51f   :  { %2272 = vmatmul.msk.f32.gmra.mxu0 %vm187_vm4, %v2848_v21 }
 0x527   :  { %2273 = vmatmul.msk.f32.gmra.mxu0 %vm187_vm4, %v2855_v22 }
 0x52f   :  { %2274 = vmatmul.msk.f32.gmra.mxu0 %vm187_vm4, %v2862_v23 }
 0x594   :  { %v695_v4 = vpop.f32.mrf.mxu0 }
 0x595   :  { %v696_v5 = vadd.f32 %v695_v4, %v2893_v47 }
 0x597   :  { %2430 = vtanh.f32 %v696_v5 }
 0x59c   :  { %v698_v6 = vpop.f32.mrf.mxu0 }
 0x59d   :  { %v2431_v7 = vpop.eup %2430  ;;  %v699_v8 = vadd.f32 %v698_v6, %v2868_v25 }
 0x59e   :  { %v760_v12 = vmul.f32 2.0, %v2431_v7  ;;  %v711_v60 = vmul.f32 0.1, %v2431_v7 }
 0x59f   :  { %2432 = vtanh.f32 %v699_v8 }
 0x5a0   :  { %v764_v15 = vadd.f32 %v760_v12, %v756_v11  ;;  %v715_v57 = vadd.f32 %v711_v60, %v2987_v55 }
 0x5a4   :  { %v701_v17 = vpop.f32.mrf.mxu0 }
 0x5a5   :  { %v2433_v27 = vpop.eup %2432  ;;  %v702_v51 = vadd.f32 %v701_v17, %v2866_v24 }
 0x5a6   :  { %v761_v30 = vmul.f32 2.0, %v2433_v27  ;;  %v712_v54 = vmul.f32 0.1, %v2433_v27 }
 0x5a7   :  { %2434 = vtanh.f32 %v702_v51 }
 0x5a8   :  { %v765_v32 = vadd.f32 %v761_v30, %v757_v16  ;;  %v716_v14 = vadd.f32 %v712_v54, %v2982_v62 }
 0x5ac   :  { %v704_v34 = vpop.f32.mrf.mxu0 }
 0x5ad   :  { %v2435_v35 = vpop.eup %2434  ;;  %v705_v36 = vadd.f32 %v704_v34, %v2877_v38 }
 0x5ae   :  { %v762_v37 = vmul.f32 2.0, %v2435_v35  ;;  %v713_v28 = vmul.f32 0.1, %v2435_v35 }
 0x5af   :  { %2436 = vtanh.f32 %v705_v36 }
 0x5b0   :  { %v766_v39 = vadd.f32 %v762_v37, %v758_v53  ;;  %v717_v58 = vadd.f32 %v713_v28, %v2977_v61 }
 0x5b5   :  { %v2437_v43 = vpop.eup %2436 }
 0x5b6   :  { %v714_v46 = vmul.f32 0.1, %v2437_v43  ;;  %v763_v48 = vmul.f32 2.0, %v2437_v43 }
 0x5b8   :  { %v718_v49 = vadd.f32 %v714_v46, %v2974_v59  ;;  %v767_v50 = vadd.f32 %v763_v48, %v759_v45 }
 0x5ba   :  { %731 = vmatpush.msra.mxu1 %v718_v49 }
 0x5bc   :  { %732 = vmatpush.msra.mxu1 %v717_v58 }
 0x5be   :  { %733 = vmatpush.msra.mxu1 %v716_v14 }
 0x5c0   :  { %734 = vmatpush.msra.mxu1 %v715_v57 }
 0x5c1   :  { %2275 = vmatmul.msk.f32.vlgmr.msra.gmra.mxu1 %vm187_vm4, %v2834_v19 }
 0x5c9   :  { %2276 = vmatmul.msk.f32.gmra.mxu1 %vm187_vm4, %v2848_v21 }
 0x5d1   :  { %2277 = vmatmul.msk.f32.gmra.mxu1 %vm187_vm4, %v2855_v22 }
 0x5d9   :  { %2278 = vmatmul.msk.f32.gmra.mxu1 %vm187_vm4, %v2862_v23 }
 0x63e   :  { %v736_v29 = vpop.f32.mrf.mxu1 }
 0x63f   :  { %v737_v0 = vadd.f32 %v736_v29, %v2893_v47 }
 0x646   :  { %v739_v63 = vpop.f32.mrf.mxu1 }
 0x647   :  { %v740_v20 = vadd.f32 %v739_v63, %v2868_v25 }
 0x64e   :  { %v742_v10 = vpop.f32.mrf.mxu1 }
 0x64f   :  { %v743_v13 = vadd.f32 %v742_v10, %v2866_v24 }
 0x651   :  { %2438 = vtanh.f32 %v743_v13 }
 0x652   :  { %2440 = vtanh.f32 %v740_v20 }
 0x653   :  { %2442 = vtanh.f32 %v737_v0 }
 0x656   :  { %v745_v1 = vpop.f32.mrf.mxu1 }
 0x657   :  { %v746_v2 = vadd.f32 %v745_v1, %v2877_v38  ;;  %v2439_v4 = vpop.eup %2438 }
 0x658   :  { %v2441_v5 = vpop.eup %2440  ;;  %v770_v6 = vadd.f32 %v2439_v4, %v766_v39 }
 0x659   :  { %2444 = vtanh.f32 %v746_v2  ;;  %v2443_v56 = vpop.eup %2442  ;;  %v769_v8 = vadd.f32 %v2441_v5, %v765_v32 }
 0x65a   :  { %v768_v12 = vadd.f32 %v2443_v56, %v764_v15  ;;  %v774_v52 = vmul.f32 0.016666668, %v770_v6 }
 0x65b   :  { %v773_v27 = vmul.f32 0.016666668, %v769_v8 }
 0x65c   :  { %v772_v16 = vmul.f32 0.016666668, %v768_v12  ;;  %v3081_v30 = vadd.f32 %v774_v52, %v2977_v61 }
 0x65d   :  { %v3086_v33 = vadd.f32 %v773_v27, %v2982_v62 }
 0x65e   :  { %v3091_v15 = vadd.f32 %v772_v16, %v2987_v55 }
 0x65f   :  { %v2445_v7 = vpop.eup %2444 }
 0x660   :  { %v771_v11 = vadd.f32 %v2445_v7, %v767_v50 }
 0x662   :  { %v775_v17 = vmul.f32 0.016666668, %v771_v11 }
 0x664   :  { %v3078_v51 = vadd.f32 %v775_v17, %v2974_v59 }
 0x666   :  { %792 = vmatpush.msra.mxu2 %v3078_v51  ;;  %882 = vmatpush.msra.mxu3 %v3078_v51 }
 0x668   :  { %793 = vmatpush.msra.mxu2 %v3081_v30  ;;  %883 = vmatpush.msra.mxu3 %v3081_v30 }
 0x66a   :  { %794 = vmatpush.msra.mxu2 %v3086_v33  ;;  %884 = vmatpush.msra.mxu3 %v3086_v33 }
 0x66c   :  { %795 = vmatpush.msra.mxu2 %v3091_v15  ;;  %885 = vmatpush.msra.mxu3 %v3091_v15 }
 0x66d   :  { %2279 = vmatmul.msk.f32.vlgmr.msra.gmra.mxu2 %vm187_vm4, %v2829_v18  ;;  %2281 = vmatmul.msk.f32.vlgmr.msra.gmra.mxu3 %vm187_vm4, %v2834_v19 }
 0x675   :  { %2282 = vmatmul.msk.f32.gmra.mxu3 %vm187_vm4, %v2848_v21 }
 0x67d   :  { %2283 = vmatmul.msk.f32.gmra.mxu3 %vm187_vm4, %v2855_v22 }
 0x685   :  { %2284 = vmatmul.msk.f32.gmra.mxu3 %vm187_vm4, %v2862_v23 }
 0x6f0   :  { %v797_v59 = vpop.f32.mrf.mxu2  ;;  %v887_v61 = vpop.f32.mrf.mxu3 }
 0x6f1   :  { %v798_v62 = vadd.f32 %v797_v59, %v2870_v26  ;;  %v888_v49 = vadd.f32 %v887_v61, %v2893_v47 }
 0x6f3   :  { %v800_v55 = vmax.f32 %v798_v62, 0.0 }
 0x6f5   :  { %v801_v32 = vmul.f32 %v800_v55, %v2873_v31 }
 0x6f7   :  { %v802_v18 = vsel %vm218_vm5, %v801_v32, 0.0 }
 0x6f8   :  { %v803_v34 = vrot.slane %v802_v18, 4  ;;  %v890_v35 = vpop.f32.mrf.mxu3 }
 0x6f9   :  { %v891_v48 = vadd.f32 %v890_v35, %v2868_v25 }
 0x6fa   :  { %v804_v36 = vadd.f32 %v803_v34, %v802_v18 }
 0x6fc   :  { %v805_v53 = vrot.slane %v804_v36, 2 }
 0x6fe   :  { %v806_v37 = vadd.f32 %v805_v53, %v804_v36 }
 0x700   :  { %v807_v39 = vrot.slane %v806_v37, 1  ;;  %v893_v41 = vpop.f32.mrf.mxu3 }
 0x701   :  { %v894_v46 = vadd.f32 %v893_v41, %v2866_v24 }
 0x702   :  { %v808_v43 = vadd.f32 %v807_v39, %v806_v37 }
 0x703   :  { %2446 = vtanh.f32 %v894_v46 }
 0x704   :  { %v3111_v45 = vadd.f32 %v808_v43, %v2882_v42  ;;  %2448 = vtanh.f32 %v891_v48 }
 0x706   :  { %811 = vrot.lane.b32.xlu1 %v3111_v45, %s2682_s13  ;;  %815 = vrot.lane.b32.xlu2 %v3111_v45, %s2681_s12 }
 0x708   :  { %v896_v28 = vpop.f32.mrf.mxu3 }
 0x709   :  { %v897_v54 = vadd.f32 %v896_v28, %v2877_v38  ;;  %v3121_v50 = vpop.eup %2446 }
 0x70a   :  { %v3123_v58 = vpop.eup %2448  ;;  %v905_v57 = vmul.f32 0.05, %v3121_v50 }
 0x70b   :  { %2450 = vtanh.f32 %v897_v54  ;;  %v904_v10 = vmul.f32 0.05, %v3123_v58 }
 0x70c   :  { %2452 = vtanh.f32 %v888_v49  ;;  %v909_v13 = vadd.f32 %v905_v57, %v3081_v30 }
 0x70d   :  { %v908_v0 = vadd.f32 %v904_v10, %v3086_v33 }
 0x711   :  { %v3125_v60 = vpop.eup %2450 }
 0x712   :  { %v906_v14 = vmul.f32 0.05, %v3125_v60  ;;  %v2453_v29 = vpop.eup %2452 }
 0x713   :  { %v903_v20 = vmul.f32 0.05, %v2453_v29 }
 0x714   :  { %v910_v63 = vadd.f32 %v906_v14, %v3078_v51 }
 0x715   :  { %v907_v1 = vadd.f32 %v903_v20, %v3091_v15 }
 0x716   :  { %923 = vmatpush.msrb.mxu0 %v910_v63 }
 0x718   :  { %924 = vmatpush.msrb.mxu0 %v909_v13 }
 0x71a   :  { %925 = vmatpush.msrb.mxu0 %v908_v0 }
 0x71c   :  { %926 = vmatpush.msrb.mxu0 %v907_v1 }
 0x71d   :  { %2285 = vmatmul.msk.f32.vlgmr.msrb.gmra.mxu0 %vm187_vm4, %v2834_v19 }
 0x725   :  { %2286 = vmatmul.msk.f32.gmra.mxu0 %vm187_vm4, %v2848_v21 }
 0x72d   :  { %2287 = vmatmul.msk.f32.gmra.mxu0 %vm187_vm4, %v2855_v22 }
 0x735   :  { %2288 = vmatmul.msk.f32.gmra.mxu0 %vm187_vm4, %v2862_v23 }
 0x79a   :  { %v928_v2 = vpop.f32.mrf.mxu0 }
 0x79b   :  { %v929_v8 = vadd.f32 %v928_v2, %v2893_v47 }
 0x7a2   :  { %v931_v4 = vpop.f32.mrf.mxu0 }
 0x7a3   :  { %v932_v6 = vadd.f32 %v931_v4, %v2868_v25 }
 0x7aa   :  { %v934_v5 = vpop.f32.mrf.mxu0 }
 0x7ab   :  { %v935_v56 = vadd.f32 %v934_v5, %v2866_v24 }
 0x7ad   :  { %2454 = vtanh.f32 %v935_v56 }
 0x7ae   :  { %2456 = vtanh.f32 %v932_v6 }
 0x7b2   :  { %v937_v7 = vpop.f32.mrf.mxu0 }
 0x7b3   :  { %v938_v11 = vadd.f32 %v937_v7, %v2877_v38  ;;  %v2455_v12 = vpop.eup %2454 }
 0x7b4   :  { %v2457_v52 = vpop.eup %2456  ;;  %v946_v16 = vmul.f32 0.05, %v2455_v12  ;;  %v1028_v13 = vmul.f32 2.0, %v2455_v12 }
 0x7b5   :  { %2458 = vtanh.f32 %v938_v11  ;;  %v945_v62 = vmul.f32 0.05, %v2457_v52  ;;  %v1027_v28 = vmul.f32 2.0, %v2457_v52 }
 0x7b6   :  { %2460 = vtanh.f32 %v929_v8  ;;  %v950_v55 = vadd.f32 %v946_v16, %v3081_v30 }
 0x7b7   :  { %v949_v18 = vadd.f32 %v945_v62, %v3086_v33  ;;  %v1031_v57 = vadd.f32 %v3123_v58, %v1027_v28 }
 0x7bb   :  { %v2459_v17 = vpop.eup %2458 }
 0x7bc   :  { %v947_v27 = vmul.f32 0.05, %v2459_v17  ;;  %v2461_v59 = vpop.eup %2460  ;;  %v1029_v5 = vmul.f32 2.0, %v2459_v17 }
 0x7bd   :  { %v944_v32 = vmul.f32 0.05, %v2461_v59  ;;  %v1026_v53 = vmul.f32 2.0, %v2461_v59 }
 0x7be   :  { %v951_v61 = vadd.f32 %v947_v27, %v3078_v51  ;;  %v1033_v6 = vadd.f32 %v3125_v60, %v1029_v5 }
 0x7bf   :  { %v948_v34 = vadd.f32 %v944_v32, %v3091_v15  ;;  %v1030_v43 = vadd.f32 %v2453_v29, %v1026_v53  ;;  %v1032_v29 = vadd.f32 %v3121_v50, %v1028_v13 }
 0x7c0   :  { %964 = vmatpush.msrb.mxu1 %v951_v61 }
 0x7c2   :  { %965 = vmatpush.msrb.mxu1 %v950_v55 }
 0x7c4   :  { %966 = vmatpush.msrb.mxu1 %v949_v18 }
 0x7c6   :  { %967 = vmatpush.msrb.mxu1 %v948_v34 }
 0x7c7   :  { %2289 = vmatmul.msk.f32.vlgmr.msrb.gmra.mxu1 %vm187_vm4, %v2834_v19 }
 0x7cf   :  { %2290 = vmatmul.msk.f32.gmra.mxu1 %vm187_vm4, %v2848_v21 }
 0x7d7   :  { %2291 = vmatmul.msk.f32.gmra.mxu1 %vm187_vm4, %v2855_v22 }
 0x7df   :  { %2292 = vmatmul.msk.f32.gmra.mxu1 %vm187_vm4, %v2862_v23 }
 0x844   :  { %v969_v35 = vpop.f32.mrf.mxu1 }
 0x845   :  { %v970_v36 = vadd.f32 %v969_v35, %v2893_v47 }
 0x847   :  { %2462 = vtanh.f32 %v970_v36 }
 0x84c   :  { %v972_v37 = vpop.f32.mrf.mxu1 }
 0x84d   :  { %v2463_v39 = vpop.eup %2462  ;;  %v973_v41 = vadd.f32 %v972_v37, %v2868_v25 }
 0x84e   :  { %v1034_v46 = vmul.f32 2.0, %v2463_v39  ;;  %v985_v16 = vmul.f32 0.1, %v2463_v39 }
 0x84f   :  { %2464 = vtanh.f32 %v973_v41 }
 0x850   :  { %v1038_v48 = vadd.f32 %v1034_v46, %v1030_v43  ;;  %v989_v17 = vadd.f32 %v985_v16, %v3091_v15 }
 0x854   :  { %v975_v49 = vpop.f32.mrf.mxu1 }
 0x855   :  { %v2465_v54 = vpop.eup %2464  ;;  %v976_v14 = vadd.f32 %v975_v49, %v2866_v24 }
 0x856   :  { %v1035_v63 = vmul.f32 2.0, %v2465_v54  ;;  %v986_v52 = vmul.f32 0.1, %v2465_v54 }
 0x857   :  { %2466 = vtanh.f32 %v976_v14  ;;  %v3232_v14 = vld [vmem:[%s3970_s3 + $0x18] sm:$0xff] }
 0x858   :  { %v1039_v10 = vadd.f32 %v1035_v63, %v1031_v57  ;;  %v990_v50 = vadd.f32 %v986_v52, %v3086_v33 }
 0x85c   :  { %v978_v20 = vpop.f32.mrf.mxu1 }
 0x85d   :  { %v2467_v0 = vpop.eup %2466  ;;  %v979_v1 = vadd.f32 %v978_v20, %v2877_v38 }
 0x85e   :  { %v1036_v2 = vmul.f32 2.0, %v2467_v0  ;;  %v987_v58 = vmul.f32 0.1, %v2467_v0 }
 0x85f   :  { %2468 = vtanh.f32 %v979_v1 }
 0x860   :  { %v1040_v4 = vadd.f32 %v1036_v2, %v1032_v29  ;;  %v991_v27 = vadd.f32 %v987_v58, %v3081_v30 }
 0x865   :  { %v2469_v56 = vpop.eup %2468 }
 0x866   :  { %v988_v7 = vmul.f32 0.1, %v2469_v56  ;;  %v1037_v8 = vmul.f32 2.0, %v2469_v56 }
 0x868   :  { %v992_v11 = vadd.f32 %v988_v7, %v3078_v51  ;;  %v1041_v12 = vadd.f32 %v1037_v8, %v1033_v6 }
 0x86a   :  { %1005 = vmatpush.msrb.mxu2 %v992_v11 }
 0x86c   :  { %1006 = vmatpush.msrb.mxu2 %v991_v27 }
 0x86e   :  { %1007 = vmatpush.msrb.mxu2 %v990_v50 }
 0x870   :  { %1008 = vmatpush.msrb.mxu2 %v989_v17 }
 0x871   :  { %2293 = vmatmul.msk.f32.vlgmr.msrb.gmra.mxu2 %vm187_vm4, %v2834_v19 }
 0x879   :  { %2294 = vmatmul.msk.f32.gmra.mxu2 %vm187_vm4, %v2848_v21 }
 0x881   :  { %2295 = vmatmul.msk.f32.gmra.mxu2 %vm187_vm4, %v2855_v22 }
 0x889   :  { %2296 = vmatmul.msk.f32.gmra.mxu2 %vm187_vm4, %v2862_v23 }
 0x8f4   :  { %v1010_v60 = vpop.f32.mrf.mxu2 }
 0x8f5   :  { %v1011_v32 = vadd.f32 %v1010_v60, %v2893_v47 }
 0x8fc   :  { %v1013_v59 = vpop.f32.mrf.mxu2 }
 0x8fd   :  { %v1014_v55 = vadd.f32 %v1013_v59, %v2868_v25 }
 0x904   :  { %v1016_v61 = vpop.f32.mrf.mxu2 }
 0x905   :  { %v1017_v62 = vadd.f32 %v1016_v61, %v2866_v24 }
 0x907   :  { %2470 = vtanh.f32 %v1017_v62 }
 0x908   :  { %2472 = vtanh.f32 %v1014_v55 }
 0x909   :  { %2474 = vtanh.f32 %v1011_v32 }
 0x90c   :  { %v1019_v19 = vpop.f32.mrf.mxu2 }
 0x90d   :  { %v1020_v21 = vadd.f32 %v1019_v19, %v2877_v38  ;;  %v2471_v22 = vpop.eup %2470 }
 0x90e   :  { %v2473_v18 = vpop.eup %2472  ;;  %v1044_v23 = vadd.f32 %v2471_v22, %v1040_v4 }
 0x90f   :  { %2476 = vtanh.f32 %v1020_v21  ;;  %v2475_v34 = vpop.eup %2474  ;;  %v1043_v36 = vadd.f32 %v2473_v18, %v1039_v10 }
 0x910   :  { %v1042_v37 = vadd.f32 %v2475_v34, %v1038_v48  ;;  %v1048_v39 = vmul.f32 0.016666668, %v1044_v23 }
 0x911   :  { %v1047_v43 = vmul.f32 0.016666668, %v1043_v36 }
 0x912   :  { %v1046_v28 = vmul.f32 0.016666668, %v1042_v37  ;;  %v3185_v49 = vadd.f32 %v1048_v39, %v3081_v30  ;;  %v3211_v30 = vld [vmem:[%s3970_s3] sm:$0xff] }
 0x913   :  { %v3190_v54 = vadd.f32 %v1047_v43, %v3086_v33  ;;  %v3218_v33 = vld [vmem:[%s3970_s3 + $0x8] sm:$0xff] }
 0x914   :  { %v3195_v48 = vadd.f32 %v1046_v28, %v3091_v15  ;;  %v3225_v15 = vld [vmem:[%s3970_s3 + $0x10] sm:$0xff] }
 0x915   :  { %v2477_v35 = vpop.eup %2476 }
 0x916   :  { %v1045_v53 = vadd.f32 %v2477_v35, %v1041_v12 }
 0x918   :  { %v1049_v41 = vmul.f32 0.016666668, %v1045_v53 }
 0x91a   :  { %v3182_v46 = vadd.f32 %v1049_v41, %v3078_v51  ;;  %v3204_v51 = vld [vmem:[%s3969_s5] sm:$0xf] }
 0x91c   :  { %1066 = vmatpush.msrb.mxu3 %v3182_v46  ;;  %1156 = vmatpush.msra.mxu0 %v3182_v46 }
 0x91e   :  { %1067 = vmatpush.msrb.mxu3 %v3185_v49  ;;  %1157 = vmatpush.msra.mxu0 %v3185_v49 }
 0x920   :  { %1068 = vmatpush.msrb.mxu3 %v3190_v54  ;;  %1158 = vmatpush.msra.mxu0 %v3190_v54 }
 0x922   :  { %1069 = vmatpush.msrb.mxu3 %v3195_v48  ;;  %1159 = vmatpush.msra.mxu0 %v3195_v48 }
 0x923   :  { %2297 = vmatmul.msk.f32.vlgmr.msrb.gmra.mxu3 %vm187_vm4, %v3204_v51  ;;  %2299 = vmatmul.msk.f32.vlgmr.msra.gmra.mxu0 %vm187_vm4, %v3211_v30 }
 0x92b   :  { %2300 = vmatmul.msk.f32.gmra.mxu0 %vm187_vm4, %v3218_v33 }
 0x933   :  { %2301 = vmatmul.msk.f32.gmra.mxu0 %vm187_vm4, %v3225_v15 }
 0x93b   :  { %2302 = vmatmul.msk.f32.gmra.mxu0 %vm187_vm4, %v3232_v14 }
 0x9a0   :  { %v1161_v57 = vpop.f32.mrf.mxu0 }
 0x9a1   :  { %v1162_v52 = vadd.f32 %v1161_v57, %v2893_v47 }
 0x9a6   :  { %v1071_v63 = vpop.f32.mrf.mxu3 }
 0x9a7   :  { %v1072_v10 = vadd.f32 %v1071_v63, %v2870_v26 }
 0x9a8   :  { %v1164_v13 = vpop.f32.mrf.mxu0 }
 0x9a9   :  { %v1074_v20 = vmax.f32 %v1072_v10, 0.0  ;;  %v1165_v8 = vadd.f32 %v1164_v13, %v2868_v25 }
 0x9ab   :  { %v1075_v0 = vmul.f32 %v1074_v20, %v2873_v31 }
 0x9ad   :  { %v1076_v1 = vsel %vm218_vm5, %v1075_v0, 0.0 }
 0x9ae   :  { %v1077_v29 = vrot.slane %v1076_v1, 4 }
 0x9b0   :  { %v1078_v2 = vadd.f32 %v1077_v29, %v1076_v1  ;;  %v1167_v4 = vpop.f32.mrf.mxu0 }
 0x9b1   :  { %v1168_v6 = vadd.f32 %v1167_v4, %v2866_v24 }
 0x9b2   :  { %v1079_v5 = vrot.slane %v1078_v2, 2 }
 0x9b3   :  { %2478 = vtanh.f32 %v1168_v6 }
 0x9b4   :  { %v1080_v56 = vadd.f32 %v1079_v5, %v1078_v2  ;;  %2480 = vtanh.f32 %v1165_v8 }
 0x9b6   :  { %v1081_v7 = vrot.slane %v1080_v56, 1 }
 0x9b8   :  { %v1082_v58 = vadd.f32 %v1081_v7, %v1080_v56  ;;  %v1170_v11 = vpop.f32.mrf.mxu0 }
 0x9b9   :  { %v1171_v12 = vadd.f32 %v1170_v11, %v2877_v38  ;;  %v3250_v16 = vpop.eup %2478 }
 0x9ba   :  { %v3244_v27 = vadd.f32 %v1082_v58, %v2882_v42  ;;  %v3252_v50 = vpop.eup %2480  ;;  %v1179_v59 = vmul.f32 0.05, %v3250_v16 }
 0x9bb   :  { %2482 = vtanh.f32 %v1171_v12  ;;  %v1178_v55 = vmul.f32 0.05, %v3252_v50 }
 0x9bc   :  { %1089 = vrot.lane.b32.xlu0 %v3244_v27, %s2681_s12  ;;  %1085 = vrot.lane.b32.xlu2 %v3244_v27, %s2682_s13  ;;  %2484 = vtanh.f32 %v1162_v52  ;;  %v1183_v32 = vadd.f32 %v1179_v59, %v3185_v49 }
 0x9bd   :  { %v1182_v21 = vadd.f32 %v1178_v55, %v3190_v54 }
 0x9c1   :  { %v3254_v17 = vpop.eup %2482 }
 0x9c2   :  { %v1180_v60 = vmul.f32 0.05, %v3254_v17  ;;  %v2485_v61 = vpop.eup %2484 }
 0x9c3   :  { %v1177_v19 = vmul.f32 0.05, %v2485_v61 }
 0x9c4   :  { %v1184_v62 = vadd.f32 %v1180_v60, %v3182_v46 }
 0x9c5   :  { %v1181_v22 = vadd.f32 %v1177_v19, %v3195_v48 }
 0x9c6   :  { %1197 = vmatpush.msra.mxu1 %v1184_v62 }
 0x9c8   :  { %1198 = vmatpush.msra.mxu1 %v1183_v32 }
 0x9ca   :  { %1199 = vmatpush.msra.mxu1 %v1182_v21 }
 0x9cc   :  { %1200 = vmatpush.msra.mxu1 %v1181_v22 }
 0x9cd   :  { %2303 = vmatmul.msk.f32.vlgmr.msra.gmra.mxu1 %vm187_vm4, %v3211_v30 }
 0x9d5   :  { %2304 = vmatmul.msk.f32.gmra.mxu1 %vm187_vm4, %v3218_v33 }
 0x9dd   :  { %2305 = vmatmul.msk.f32.gmra.mxu1 %vm187_vm4, %v3225_v15 }
 0x9e5   :  { %2306 = vmatmul.msk.f32.gmra.mxu1 %vm187_vm4, %v3232_v14 }
 0xa4a   :  { %v1202_v18 = vpop.f32.mrf.mxu1 }
 0xa4b   :  { %v1203_v37 = vadd.f32 %v1202_v18, %v2893_v47 }
 0xa52   :  { %v1205_v34 = vpop.f32.mrf.mxu1 }
 0xa53   :  { %v1206_v36 = vadd.f32 %v1205_v34, %v2868_v25 }
 0xa5a   :  { %v1208_v23 = vpop.f32.mrf.mxu1 }
 0xa5b   :  { %v1209_v35 = vadd.f32 %v1208_v23, %v2866_v24 }
 0xa5d   :  { %2486 = vtanh.f32 %v1209_v35 }
 0xa5e   :  { %2488 = vtanh.f32 %v1206_v36 }
 0xa62   :  { %v1211_v53 = vpop.f32.mrf.mxu1 }
 0xa63   :  { %v1212_v39 = vadd.f32 %v1211_v53, %v2877_v38  ;;  %v2487_v41 = vpop.eup %2486 }
 0xa64   :  { %v2489_v43 = vpop.eup %2488  ;;  %v1220_v63 = vmul.f32 0.05, %v2487_v41  ;;  %v1302_v21 = vmul.f32 2.0, %v2487_v41 }
 0xa65   :  { %2490 = vtanh.f32 %v1212_v39  ;;  %v1219_v20 = vmul.f32 0.05, %v2489_v43  ;;  %v1301_v12 = vmul.f32 2.0, %v2489_v43 }
 0xa66   :  { %2492 = vtanh.f32 %v1203_v37  ;;  %v1224_v0 = vadd.f32 %v1220_v63, %v3185_v49 }
 0xa67   :  { %v1223_v29 = vadd.f32 %v1219_v20, %v3190_v54  ;;  %v1305_v55 = vadd.f32 %v3252_v50, %v1301_v12 }
 0xa6b   :  { %v2491_v28 = vpop.eup %2490 }
 0xa6c   :  { %v1221_v57 = vmul.f32 0.05, %v2491_v28  ;;  %v2493_v10 = vpop.eup %2492  ;;  %v1303_v36 = vmul.f32 2.0, %v2491_v28 }
 0xa6d   :  { %v1218_v1 = vmul.f32 0.05, %v2493_v10  ;;  %v1300_v56 = vmul.f32 2.0, %v2493_v10 }
 0xa6e   :  { %v1225_v13 = vadd.f32 %v1221_v57, %v3182_v46  ;;  %v1307_v37 = vadd.f32 %v3254_v17, %v1303_v36 }
 0xa6f   :  { %v1222_v2 = vadd.f32 %v1218_v1, %v3195_v48  ;;  %v1304_v58 = vadd.f32 %v2485_v61, %v1300_v56  ;;  %v1306_v61 = vadd.f32 %v3250_v16, %v1302_v21 }
 0xa70   :  { %1238 = vmatpush.msra.mxu2 %v1225_v13 }
 0xa72   :  { %1239 = vmatpush.msra.mxu2 %v1224_v0 }
 0xa74   :  { %1240 = vmatpush.msra.mxu2 %v1223_v29 }
 0xa76   :  { %1241 = vmatpush.msra.mxu2 %v1222_v2 }
 0xa77   :  { %2307 = vmatmul.msk.f32.vlgmr.msra.gmra.mxu2 %vm187_vm4, %v3211_v30 }
 0xa7f   :  { %2308 = vmatmul.msk.f32.gmra.mxu2 %vm187_vm4, %v3218_v33 }
 0xa87   :  { %2309 = vmatmul.msk.f32.gmra.mxu2 %vm187_vm4, %v3225_v15 }
 0xa8f   :  { %2310 = vmatmul.msk.f32.gmra.mxu2 %vm187_vm4, %v3232_v14 }
 0xafa   :  { %v1243_v4 = vpop.f32.mrf.mxu2 }
 0xafb   :  { %v1244_v5 = vadd.f32 %v1243_v4, %v2893_v47 }
 0xafd   :  { %2494 = vtanh.f32 %v1244_v5 }
 0xb02   :  { %v1246_v6 = vpop.f32.mrf.mxu2 }
 0xb03   :  { %v2495_v7 = vpop.eup %2494  ;;  %v1247_v8 = vadd.f32 %v1246_v6, %v2868_v25 }
 0xb04   :  { %v1308_v11 = vmul.f32 2.0, %v2495_v7  ;;  %v1259_v13 = vmul.f32 0.1, %v2495_v7 }
 0xb05   :  { %2496 = vtanh.f32 %v1247_v8 }
 0xb06   :  { %v1312_v52 = vadd.f32 %v1308_v11, %v1304_v58  ;;  %v1263_v28 = vadd.f32 %v1259_v13, %v3195_v48 }
 0xb0a   :  { %v1249_v60 = vpop.f32.mrf.mxu2 }
 0xb0b   :  { %v2497_v59 = vpop.eup %2496  ;;  %v1250_v62 = vadd.f32 %v1249_v60, %v2866_v24 }
 0xb0c   :  { %v1309_v32 = vmul.f32 2.0, %v2497_v59  ;;  %v1260_v63 = vmul.f32 0.1, %v2497_v59 }
 0xb0d   :  { %2498 = vtanh.f32 %v1250_v62 }
 0xb0e   :  { %v1313_v19 = vadd.f32 %v1309_v32, %v1305_v55  ;;  %v1264_v16 = vadd.f32 %v1260_v63, %v3190_v54 }
 0xb12   :  { %v1252_v22 = vpop.f32.mrf.mxu2 }
 0xb13   :  { %v2499_v18 = vpop.eup %2498  ;;  %v1253_v34 = vadd.f32 %v1252_v22, %v2877_v38 }
 0xb14   :  { %v1310_v23 = vmul.f32 2.0, %v2499_v18  ;;  %v1261_v50 = vmul.f32 0.1, %v2499_v18 }
 0xb15   :  { %2500 = vtanh.f32 %v1253_v34 }
 0xb16   :  { %v1314_v35 = vadd.f32 %v1310_v23, %v1306_v61  ;;  %v1265_v10 = vadd.f32 %v1261_v50, %v3185_v49 }
 0xb1b   :  { %v2501_v53 = vpop.eup %2500 }
 0xb1c   :  { %v1262_v39 = vmul.f32 0.1, %v2501_v53  ;;  %v1311_v43 = vmul.f32 2.0, %v2501_v53 }
 0xb1e   :  { %v1266_v57 = vadd.f32 %v1262_v39, %v3182_v46  ;;  %v1315_v41 = vadd.f32 %v1311_v43, %v1307_v37 }
 0xb20   :  { %1279 = vmatpush.msra.mxu3 %v1266_v57 }
 0xb22   :  { %1280 = vmatpush.msra.mxu3 %v1265_v10 }
 0xb24   :  { %1281 = vmatpush.msra.mxu3 %v1264_v16 }
 0xb26   :  { %1282 = vmatpush.msra.mxu3 %v1263_v28 }
 0xb27   :  { %2311 = vmatmul.msk.f32.vlgmr.msra.gmra.mxu3 %vm187_vm4, %v3211_v30 }
 0xb2f   :  { %2312 = vmatmul.msk.f32.gmra.mxu3 %vm187_vm4, %v3218_v33 }
 0xb37   :  { %2313 = vmatmul.msk.f32.gmra.mxu3 %vm187_vm4, %v3225_v15 }
 0xb3f   :  { %2314 = vmatmul.msk.f32.gmra.mxu3 %vm187_vm4, %v3232_v14 }
 0xbaa   :  { %v1284_v17 = vpop.f32.mrf.mxu3 }
 0xbab   :  { %v1285_v2 = vadd.f32 %v1284_v17, %v2893_v47 }
 0xbb2   :  { %v1287_v20 = vpop.f32.mrf.mxu3 }
 0xbb3   :  { %v1288_v29 = vadd.f32 %v1287_v20, %v2868_v25 }
 0xbba   :  { %v1290_v0 = vpop.f32.mrf.mxu3 }
 0xbbb   :  { %v1291_v1 = vadd.f32 %v1290_v0, %v2866_v24 }
 0xbbd   :  { %2502 = vtanh.f32 %v1291_v1 }
 0xbbe   :  { %2504 = vtanh.f32 %v1288_v29 }
 0xbbf   :  { %2506 = vtanh.f32 %v1285_v2 }
 0xbc2   :  { %v1293_v4 = vpop.f32.mrf.mxu3 }
 0xbc3   :  { %v1294_v5 = vadd.f32 %v1293_v4, %v2877_v38  ;;  %v2503_v56 = vpop.eup %2502 }
 0xbc4   :  { %v2505_v6 = vpop.eup %2504  ;;  %v1318_v8 = vadd.f32 %v2503_v56, %v1314_v35 }
 0xbc5   :  { %2508 = vtanh.f32 %v1294_v5  ;;  %v2507_v7 = vpop.eup %2506  ;;  %v1317_v11 = vadd.f32 %v2505_v6, %v1313_v19 }
 0xbc6   :  { %v1316_v60 = vadd.f32 %v2507_v7, %v1312_v52  ;;  %v1322_v59 = vmul.f32 0.016666668, %v1318_v8 }
 0xbc7   :  { %v1321_v55 = vmul.f32 0.016666668, %v1317_v11 }
 0xbc8   :  { %v1320_v21 = vmul.f32 0.016666668, %v1316_v60  ;;  %v3314_v22 = vadd.f32 %v1322_v59, %v3185_v49 }
 0xbc9   :  { %v3319_v18 = vadd.f32 %v1321_v55, %v3190_v54 }
 0xbca   :  { %v3324_v52 = vadd.f32 %v1320_v21, %v3195_v48 }
 0xbcb   :  { %v2509_v58 = vpop.eup %2508 }
 0xbcc   :  { %v1319_v12 = vadd.f32 %v2509_v58, %v1315_v41 }
 0xbce   :  { %v1323_v62 = vmul.f32 0.016666668, %v1319_v12 }
 0xbd0   :  { %v3311_v32 = vadd.f32 %v1323_v62, %v3182_v46 }
 0xbd2   :  { %1340 = vmatpush.msrb.mxu0 %v3311_v32  ;;  %1430 = vmatpush.msrb.mxu1 %v3311_v32 }
 0xbd4   :  { %1341 = vmatpush.msrb.mxu0 %v3314_v22  ;;  %1431 = vmatpush.msrb.mxu1 %v3314_v22 }
 0xbd6   :  { %1342 = vmatpush.msrb.mxu0 %v3319_v18  ;;  %1432 = vmatpush.msrb.mxu1 %v3319_v18 }
 0xbd8   :  { %1343 = vmatpush.msrb.mxu0 %v3324_v52  ;;  %1433 = vmatpush.msrb.mxu1 %v3324_v52 }
 0xbd9   :  { %2315 = vmatmul.msk.f32.vlgmr.msrb.gmra.mxu0 %vm187_vm4, %v3204_v51  ;;  %2317 = vmatmul.msk.f32.vlgmr.msrb.gmra.mxu1 %vm187_vm4, %v3211_v30 }
 0xbe1   :  { %2318 = vmatmul.msk.f32.gmra.mxu1 %vm187_vm4, %v3218_v33 }
 0xbe9   :  { %2319 = vmatmul.msk.f32.gmra.mxu1 %vm187_vm4, %v3225_v15 }
 0xbf1   :  { %2320 = vmatmul.msk.f32.gmra.mxu1 %vm187_vm4, %v3232_v14 }
 0xc56   :  { %v1345_v46 = vpop.f32.mrf.mxu0  ;;  %v1435_v49 = vpop.f32.mrf.mxu1 }
 0xc57   :  { %v1346_v54 = vadd.f32 %v1345_v46, %v2870_v26  ;;  %v1436_v10 = vadd.f32 %v1435_v49, %v2893_v47 }
 0xc59   :  { %v1348_v48 = vmax.f32 %v1346_v54, 0.0 }
 0xc5b   :  { %v1349_v19 = vmul.f32 %v1348_v48, %v2873_v31 }
 0xc5d   :  { %v1350_v34 = vsel %vm218_vm5, %v1349_v19, 0.0 }
 0xc5e   :  { %v1351_v61 = vrot.slane %v1350_v34, 4  ;;  %v1438_v23 = vpop.f32.mrf.mxu1 }
 0xc5f   :  { %v1439_v63 = vadd.f32 %v1438_v23, %v2868_v25 }
 0xc60   :  { %v1352_v35 = vadd.f32 %v1351_v61, %v1350_v34 }
 0xc62   :  { %v1353_v36 = vrot.slane %v1352_v35, 2 }
 0xc64   :  { %v1354_v53 = vadd.f32 %v1353_v36, %v1352_v35 }
 0xc66   :  { %v1355_v37 = vrot.slane %v1354_v53, 1  ;;  %v1441_v39 = vpop.f32.mrf.mxu1 }
 0xc67   :  { %v1442_v57 = vadd.f32 %v1441_v39, %v2866_v24 }
 0xc68   :  { %v1356_v43 = vadd.f32 %v1355_v37, %v1354_v53 }
 0xc69   :  { %2510 = vtanh.f32 %v1442_v57 }
 0xc6a   :  { %v3344_v50 = vadd.f32 %v1356_v43, %v2882_v42  ;;  %2512 = vtanh.f32 %v1439_v63 }
 0xc6c   :  { %1363 = vrot.lane.b32.xlu1 %v3344_v50, %s2681_s12  ;;  %1359 = vrot.lane.b32.xlu0 %v3344_v50, %s2682_s13 }
 0xc6e   :  { %v1444_v41 = vpop.f32.mrf.mxu1 }
 0xc6f   :  { %v1445_v13 = vadd.f32 %v1444_v41, %v2877_v38  ;;  %v3354_v16 = vpop.eup %2510 }
 0xc70   :  { %v3356_v28 = vpop.eup %2512  ;;  %v1453_v0 = vmul.f32 0.05, %v3354_v16 }
 0xc71   :  { %2514 = vtanh.f32 %v1445_v13  ;;  %v1452_v2 = vmul.f32 0.05, %v3356_v28 }
 0xc72   :  { %2516 = vtanh.f32 %v1436_v10  ;;  %v1457_v4 = vadd.f32 %v1453_v0, %v3314_v22 }
 0xc73   :  { %v1456_v56 = vadd.f32 %v1452_v2, %v3319_v18 }
 0xc77   :  { %v3358_v17 = vpop.eup %2514 }
 0xc78   :  { %v1454_v20 = vmul.f32 0.05, %v3358_v17  ;;  %v2517_v1 = vpop.eup %2516 }
 0xc79   :  { %v1451_v5 = vmul.f32 0.05, %v2517_v1 }
 0xc7a   :  { %v1458_v29 = vadd.f32 %v1454_v20, %v3311_v32 }
 0xc7b   :  { %v1455_v6 = vadd.f32 %v1451_v5, %v3324_v52 }
 0xc7c   :  { %1471 = vmatpush.msrb.mxu2 %v1458_v29 }
 0xc7e   :  { %1472 = vmatpush.msrb.mxu2 %v1457_v4 }
 0xc80   :  { %1473 = vmatpush.msrb.mxu2 %v1456_v56 }
 0xc82   :  { %1474 = vmatpush.msrb.mxu2 %v1455_v6 }
 0xc83   :  { %2321 = vmatmul.msk.f32.vlgmr.msrb.gmra.mxu2 %vm187_vm4, %v3211_v30 }
 0xc8b   :  { %2322 = vmatmul.msk.f32.gmra.mxu2 %vm187_vm4, %v3218_v33 }
 0xc93   :  { %2323 = vmatmul.msk.f32.gmra.mxu2 %vm187_vm4, %v3225_v15 }
 0xc9b   :  { %2324 = vmatmul.msk.f32.gmra.mxu2 %vm187_vm4, %v3232_v14 }
 0xd06   :  { %v1476_v7 = vpop.f32.mrf.mxu2 }
 0xd07   :  { %v1477_v59 = vadd.f32 %v1476_v7, %v2893_v47 }
 0xd0e   :  { %v1479_v8 = vpop.f32.mrf.mxu2 }
 0xd0f   :  { %v1480_v12 = vadd.f32 %v1479_v8, %v2868_v25 }
 0xd16   :  { %v1482_v58 = vpop.f32.mrf.mxu2 }
 0xd17   :  { %v1483_v11 = vadd.f32 %v1482_v58, %v2866_v24 }
 0xd19   :  { %2518 = vtanh.f32 %v1483_v11 }
 0xd1a   :  { %2520 = vtanh.f32 %v1480_v12 }
 0xd1e   :  { %v1485_v60 = vpop.f32.mrf.mxu2 }
 0xd1f   :  { %v1486_v62 = vadd.f32 %v1485_v60, %v2877_v38  ;;  %v2519_v55 = vpop.eup %2518 }
 0xd20   :  { %v2521_v21 = vpop.eup %2520  ;;  %v1494_v54 = vmul.f32 0.05, %v2519_v55  ;;  %v1576_v6 = vmul.f32 2.0, %v2519_v55 }
 0xd21   :  { %2522 = vtanh.f32 %v1486_v62  ;;  %v1493_v34 = vmul.f32 0.05, %v2521_v21  ;;  %v1575_v20 = vmul.f32 2.0, %v2521_v21 }
 0xd22   :  { %2524 = vtanh.f32 %v1477_v59  ;;  %v1498_v61 = vadd.f32 %v1494_v54, %v3314_v22 }
 0xd23   :  { %v1497_v35 = vadd.f32 %v1493_v34, %v3319_v18  ;;  %v1579_v4 = vadd.f32 %v3356_v28, %v1575_v20 }
 0xd27   :  { %v2523_v46 = vpop.eup %2522 }
 0xd28   :  { %v1495_v49 = vmul.f32 0.05, %v2523_v46  ;;  %v2525_v48 = vpop.eup %2524  ;;  %v1577_v60 = vmul.f32 2.0, %v2523_v46 }
 0xd29   :  { %v1492_v23 = vmul.f32 0.05, %v2525_v48  ;;  %v1574_v39 = vmul.f32 2.0, %v2525_v48 }
 0xd2a   :  { %v1499_v19 = vadd.f32 %v1495_v49, %v3311_v32  ;;  %v1581_v62 = vadd.f32 %v3358_v17, %v1577_v60 }
 0xd2b   :  { %v1496_v36 = vadd.f32 %v1492_v23, %v3324_v52  ;;  %v1578_v41 = vadd.f32 %v2517_v1, %v1574_v39  ;;  %v1580_v1 = vadd.f32 %v3354_v16, %v1576_v6 }
 0xd2c   :  { %1512 = vmatpush.msrb.mxu3 %v1499_v19 }
 0xd2e   :  { %1513 = vmatpush.msrb.mxu3 %v1498_v61 }
 0xd30   :  { %1514 = vmatpush.msrb.mxu3 %v1497_v35 }
 0xd32   :  { %1515 = vmatpush.msrb.mxu3 %v1496_v36 }
 0xd33   :  { %2325 = vmatmul.msk.f32.vlgmr.msrb.gmra.mxu3 %vm187_vm4, %v3211_v30 }
 0xd3b   :  { %2326 = vmatmul.msk.f32.gmra.mxu3 %vm187_vm4, %v3218_v33 }
 0xd43   :  { %2327 = vmatmul.msk.f32.gmra.mxu3 %vm187_vm4, %v3225_v15 }
 0xd4b   :  { %2328 = vmatmul.msk.f32.gmra.mxu3 %vm187_vm4, %v3232_v14 }
 0xdb6   :  { %v1517_v53 = vpop.f32.mrf.mxu3 }
 0xdb7   :  { %v1518_v37 = vadd.f32 %v1517_v53, %v2893_v47 }
 0xdb9   :  { %2526 = vtanh.f32 %v1518_v37 }
 0xdbe   :  { %v1520_v43 = vpop.f32.mrf.mxu3 }
 0xdbf   :  { %v2527_v57 = vpop.eup %2526  ;;  %v1521_v63 = vadd.f32 %v1520_v43, %v2868_v25 }
 0xdc0   :  { %v1582_v10 = vmul.f32 2.0, %v2527_v57  ;;  %v1533_v34 = vmul.f32 0.1, %v2527_v57 }
 0xdc1   :  { %2528 = vtanh.f32 %v1521_v63 }
 0xdc2   :  { %v1586_v13 = vadd.f32 %v1582_v10, %v1578_v41  ;;  %v1537_v46 = vadd.f32 %v1533_v34, %v3324_v52 }
 0xdc6   :  { %v1523_v0 = vpop.f32.mrf.mxu3 }
 0xdc7   :  { %v2529_v29 = vpop.eup %2528  ;;  %v1524_v2 = vadd.f32 %v1523_v0, %v2866_v24 }
 0xdc8   :  { %v1583_v5 = vmul.f32 2.0, %v2529_v29  ;;  %v1534_v48 = vmul.f32 0.1, %v2529_v29 }
 0xdc9   :  { %2530 = vtanh.f32 %v1524_v2 }
 0xdca   :  { %v1587_v56 = vadd.f32 %v1583_v5, %v1579_v4  ;;  %v1538_v16 = vadd.f32 %v1534_v48, %v3319_v18 }
 0xdce   :  { %v1526_v7 = vpop.f32.mrf.mxu3 }
 0xdcf   :  { %v2531_v8 = vpop.eup %2530  ;;  %v1527_v58 = vadd.f32 %v1526_v7, %v2877_v38 }
 0xdd0   :  { %v1584_v11 = vmul.f32 2.0, %v2531_v8  ;;  %v1535_v28 = vmul.f32 0.1, %v2531_v8 }
 0xdd1   :  { %2532 = vtanh.f32 %v1527_v58 }
 0xdd2   :  { %v1588_v12 = vadd.f32 %v1584_v11, %v1580_v1  ;;  %v1539_v19 = vadd.f32 %v1535_v28, %v3314_v22 }
 0xdd7   :  { %v2533_v59 = vpop.eup %2532 }
 0xdd8   :  { %v1536_v21 = vmul.f32 0.1, %v2533_v59  ;;  %v1585_v49 = vmul.f32 2.0, %v2533_v59 }
 0xdda   :  { %v1540_v54 = vadd.f32 %v1536_v21, %v3311_v32  ;;  %v1589_v55 = vadd.f32 %v1585_v49, %v1581_v62 }
 0xddc   :  { %1553 = vmatpush.msra.mxu0 %v1540_v54 }
 0xdde   :  { %1554 = vmatpush.msra.mxu0 %v1539_v19 }
 0xde0   :  { %1555 = vmatpush.msra.mxu0 %v1538_v16 }
 0xde2   :  { %1556 = vmatpush.msra.mxu0 %v1537_v46 }
 0xde3   :  { %2329 = vmatmul.msk.f32.vlgmr.msra.gmra.mxu0 %vm187_vm4, %v3211_v30 }
 0xdeb   :  { %2330 = vmatmul.msk.f32.gmra.mxu0 %vm187_vm4, %v3218_v33 }
 0xdf3   :  { %2331 = vmatmul.msk.f32.gmra.mxu0 %vm187_vm4, %v3225_v15 }
 0xdfb   :  { %2332 = vmatmul.msk.f32.gmra.mxu0 %vm187_vm4, %v3232_v14 }
 0xe60   :  { %v1558_v17 = vpop.f32.mrf.mxu0 }
 0xe61   :  { %v1559_v53 = vadd.f32 %v1558_v17, %v2893_v47 }
 0xe68   :  { %v1561_v61 = vpop.f32.mrf.mxu0 }
 0xe69   :  { %v1562_v36 = vadd.f32 %v1561_v61, %v2868_v25 }
 0xe70   :  { %v1564_v23 = vpop.f32.mrf.mxu0 }
 0xe71   :  { %v1565_v35 = vadd.f32 %v1564_v23, %v2866_v24 }
 0xe73   :  { %2534 = vtanh.f32 %v1565_v35 }
 0xe74   :  { %2536 = vtanh.f32 %v1562_v36 }
 0xe75   :  { %2538 = vtanh.f32 %v1559_v53 }
 0xe78   :  { %v1567_v37 = vpop.f32.mrf.mxu0 }
 0xe79   :  { %v1568_v39 = vadd.f32 %v1567_v37, %v2877_v38  ;;  %v2535_v43 = vpop.eup %2534 }
 0xe7a   :  { %v2537_v57 = vpop.eup %2536  ;;  %v1592_v41 = vadd.f32 %v2535_v43, %v1588_v12 }
 0xe7b   :  { %2540 = vtanh.f32 %v1568_v39  ;;  %v2539_v63 = vpop.eup %2538  ;;  %v1591_v20 = vadd.f32 %v2537_v57, %v1587_v56 }
 0xe7c   :  { %v1590_v29 = vadd.f32 %v2539_v63, %v1586_v13  ;;  %v1596_v2 = vmul.f32 0.016666668, %v1592_v41 }
 0xe7d   :  { %v1595_v5 = vmul.f32 0.016666668, %v1591_v20 }
 0xe7e   :  { %v1594_v7 = vmul.f32 0.016666668, %v1590_v29  ;;  %v3418_v8 = vadd.f32 %v1596_v2, %v3314_v22 }
 0xe7f   :  { %v3423_v58 = vadd.f32 %v1595_v5, %v3319_v18 }
 0xe80   :  { %v3428_v13 = vadd.f32 %v1594_v7, %v3324_v52 }
 0xe81   :  { %v2541_v10 = vpop.eup %2540 }
 0xe82   :  { %v1593_v0 = vadd.f32 %v2541_v10, %v1589_v55 }
 0xe84   :  { %v1597_v4 = vmul.f32 0.016666668, %v1593_v0 }
 0xe86   :  { %v3415_v6 = vadd.f32 %v1597_v4, %v3311_v32 }
 0xe88   :  { %1614 = vmatpush.msra.mxu1 %v3415_v6  ;;  %1704 = vmatpush.msra.mxu2 %v3415_v6 }
 0xe8a   :  { %1615 = vmatpush.msra.mxu1 %v3418_v8  ;;  %1705 = vmatpush.msra.mxu2 %v3418_v8 }
 0xe8c   :  { %1616 = vmatpush.msra.mxu1 %v3423_v58  ;;  %1706 = vmatpush.msra.mxu2 %v3423_v58 }
 0xe8e   :  { %1617 = vmatpush.msra.mxu1 %v3428_v13  ;;  %1707 = vmatpush.msra.mxu2 %v3428_v13 }
 0xe8f   :  { %2333 = vmatmul.msk.f32.vlgmr.msra.gmra.mxu1 %vm187_vm4, %v3204_v51  ;;  %2335 = vmatmul.msk.f32.vlgmr.msra.gmra.mxu2 %vm187_vm4, %v3211_v30 }
 0xe97   :  { %2336 = vmatmul.msk.f32.gmra.mxu2 %vm187_vm4, %v3218_v33 }
 0xe9f   :  { %2337 = vmatmul.msk.f32.gmra.mxu2 %vm187_vm4, %v3225_v15 }
 0xea7   :  { %2338 = vmatmul.msk.f32.gmra.mxu2 %vm187_vm4, %v3232_v14 }
 0xf0c   :  { %v1619_v32 = vpop.f32.mrf.mxu1 }
 0xf0d   :  { %v1620_v22 = vadd.f32 %v1619_v32, %v2870_v26 }
 0xf0f   :  { %v1622_v18 = vmax.f32 %v1620_v22, 0.0 }
 0xf11   :  { %v1623_v52 = vmul.f32 %v1622_v18, %v2873_v31 }
 0xf12   :  { %v1709_v56 = vpop.f32.mrf.mxu2 }
 0xf13   :  { %v1624_v1 = vsel %vm218_vm5, %v1623_v52, 0.0  ;;  %v1710_v34 = vadd.f32 %v1709_v56, %v2893_v47 }
 0xf14   :  { %v1625_v11 = vrot.slane %v1624_v1, 4 }
 0xf16   :  { %v1626_v12 = vadd.f32 %v1625_v11, %v1624_v1 }
 0xf18   :  { %v1627_v60 = vrot.slane %v1626_v12, 2 }
 0xf1a   :  { %v1628_v59 = vadd.f32 %v1627_v60, %v1626_v12  ;;  %v1712_v62 = vpop.f32.mrf.mxu2 }
 0xf1b   :  { %v1713_v55 = vadd.f32 %v1712_v62, %v2868_v25 }
 0xf1c   :  { %v1629_v21 = vrot.slane %v1628_v59, 1 }
 0xf1e   :  { %v1630_v49 = vadd.f32 %v1629_v21, %v1628_v59 }
 0xf20   :  { %v3448_v28 = vadd.f32 %v1630_v49, %v2882_v42 }
 0xf22   :  { %v1715_v54 = vpop.f32.mrf.mxu2  ;;  %1633 = vrot.lane.b32.xlu1 %v3448_v28, %s2682_s13 }
 0xf23   :  { %v1716_v48 = vadd.f32 %v1715_v54, %v2866_v24 }
 0xf25   :  { %2542 = vtanh.f32 %v1716_v48 }
 0xf26   :  { %2544 = vtanh.f32 %v1713_v55 }
 0xf2a   :  { %v1718_v19 = vpop.f32.mrf.mxu2 }
 0xf2b   :  { %v1719_v16 = vadd.f32 %v1718_v19, %v2877_v38  ;;  %v3456_v46 = vpop.eup %2542 }
 0xf2c   :  { %v3458_v17 = vpop.eup %2544  ;;  %v1727_v35 = vmul.f32 0.05, %v3456_v46 }
 0xf2d   :  { %2546 = vtanh.f32 %v1719_v16  ;;  %v1726_v37 = vmul.f32 0.05, %v3458_v17 }
 0xf2e   :  { %2548 = vtanh.f32 %v1710_v34  ;;  %v1731_v39 = vadd.f32 %v1727_v35, %v3418_v8 }
 0xf2f   :  { %v1730_v57 = vadd.f32 %v1726_v37, %v3423_v58 }
 0xf33   :  { %v3460_v61 = vpop.eup %2546 }
 0xf34   :  { %v1728_v23 = vmul.f32 0.05, %v3460_v61  ;;  %v2549_v36 = vpop.eup %2548 }
 0xf35   :  { %v1725_v43 = vmul.f32 0.05, %v2549_v36 }
 0xf36   :  { %v1732_v53 = vadd.f32 %v1728_v23, %v3415_v6 }
 0xf37   :  { %v1729_v63 = vadd.f32 %v1725_v43, %v3428_v13 }
 0xf38   :  { %1745 = vmatpush.msra.mxu3 %v1732_v53 }
 0xf3a   :  { %1746 = vmatpush.msra.mxu3 %v1731_v39 }
 0xf3c   :  { %1747 = vmatpush.msra.mxu3 %v1730_v57 }
 0xf3e   :  { %1748 = vmatpush.msra.mxu3 %v1729_v63 }
 0xf3f   :  { %2339 = vmatmul.msk.f32.vlgmr.msra.gmra.mxu3 %vm187_vm4, %v3211_v30 }
 0xf47   :  { %2340 = vmatmul.msk.f32.gmra.mxu3 %vm187_vm4, %v3218_v33 }
 0xf4f   :  { %2341 = vmatmul.msk.f32.gmra.mxu3 %vm187_vm4, %v3225_v15 }
 0xf57   :  { %2342 = vmatmul.msk.f32.gmra.mxu3 %vm187_vm4, %v3232_v14 }
 0xfc2   :  { %v1750_v41 = vpop.f32.mrf.mxu3 }
 0xfc3   :  { %v1751_v4 = vadd.f32 %v1750_v41, %v2893_v47 }
 0xfca   :  { %v1753_v10 = vpop.f32.mrf.mxu3 }
 0xfcb   :  { %v1754_v29 = vadd.f32 %v1753_v10, %v2868_v25 }
 0xfd2   :  { %v1756_v20 = vpop.f32.mrf.mxu3 }
 0xfd3   :  { %v1757_v0 = vadd.f32 %v1756_v20, %v2866_v24 }
 0xfd5   :  { %2550 = vtanh.f32 %v1757_v0 }
 0xfd6   :  { %2552 = vtanh.f32 %v1754_v29 }
 0xfda   :  { %v1759_v2 = vpop.f32.mrf.mxu3 }
 0xfdb   :  { %v1760_v5 = vadd.f32 %v1759_v2, %v2877_v38  ;;  %v2551_v7 = vpop.eup %2550 }
 0xfdc   :  { %v2553_v32 = vpop.eup %2552  ;;  %v1768_v52 = vmul.f32 0.05, %v2551_v7  ;;  %v1850_v41 = vmul.f32 2.0, %v2551_v7 }
 0xfdd   :  { %2554 = vtanh.f32 %v1760_v5  ;;  %v1767_v11 = vmul.f32 0.05, %v2553_v32  ;;  %v1849_v35 = vmul.f32 2.0, %v2553_v32 }
 0xfde   :  { %2556 = vtanh.f32 %v1751_v4  ;;  %v1772_v12 = vadd.f32 %v1768_v52, %v3418_v8 }
 0xfdf   :  { %v1771_v59 = vadd.f32 %v1767_v11, %v3423_v58  ;;  %v1853_v43 = vadd.f32 %v3458_v17, %v1849_v35 }
 0xfe3   :  { %v2555_v22 = vpop.eup %2554 }
 0xfe4   :  { %v1769_v18 = vmul.f32 0.05, %v2555_v22  ;;  %v2557_v56 = vpop.eup %2556  ;;  %v1851_v4 = vmul.f32 2.0, %v2555_v22 }
 0xfe5   :  { %v1766_v60 = vmul.f32 0.05, %v2557_v56  ;;  %v1848_v54 = vmul.f32 2.0, %v2557_v56 }
 0xfe6   :  { %v1773_v1 = vadd.f32 %v1769_v18, %v3415_v6  ;;  %v1855_v32 = vadd.f32 %v3460_v61, %v1851_v4 }
 0xfe7   :  { %v1770_v62 = vadd.f32 %v1766_v60, %v3428_v13  ;;  %v1852_v34 = vadd.f32 %v2549_v36, %v1848_v54  ;;  %v1854_v36 = vadd.f32 %v3456_v46, %v1850_v41 }
 0xfe8   :  { %1786 = vmatpush.msrb.mxu0 %v1773_v1 }
 0xfea   :  { %1787 = vmatpush.msrb.mxu0 %v1772_v12 }
 0xfec   :  { %1788 = vmatpush.msrb.mxu0 %v1771_v59 }
 0xfee   :  { %1789 = vmatpush.msrb.mxu0 %v1770_v62 }
 0xfef   :  { %2343 = vmatmul.msk.f32.vlgmr.msrb.gmra.mxu0 %vm187_vm4, %v3211_v30 }
 0xff7   :  { %2344 = vmatmul.msk.f32.gmra.mxu0 %vm187_vm4, %v3218_v33 }
 0xfff   :  { %2345 = vmatmul.msk.f32.gmra.mxu0 %vm187_vm4, %v3225_v15 }
0x1007   :  { %2346 = vmatmul.msk.f32.gmra.mxu0 %vm187_vm4, %v3232_v14 }
0x106c   :  { %v1791_v21 = vpop.f32.mrf.mxu0 }
0x106d   :  { %v1792_v49 = vadd.f32 %v1791_v21, %v2893_v47 }
0x106f   :  { %2558 = vtanh.f32 %v1792_v49 }
0x1074   :  { %v1794_v48 = vpop.f32.mrf.mxu0 }
0x1075   :  { %v2559_v55 = vpop.eup %2558  ;;  %v1795_v19 = vadd.f32 %v1794_v48, %v2868_v25 }
0x1076   :  { %v1856_v16 = vmul.f32 2.0, %v2559_v55  ;;  %v1807_v12 = vmul.f32 0.1, %v2559_v55 }
0x1077   :  { %2560 = vtanh.f32 %v1795_v19 }
0x1078   :  { %v1860_v23 = vadd.f32 %v1856_v16, %v1852_v34  ;;  %v1811_v22 = vadd.f32 %v1807_v12, %v3428_v13 }
0x107c   :  { %v1797_v53 = vpop.f32.mrf.mxu0 }
0x107d   :  { %v2561_v37 = vpop.eup %2560  ;;  %v1798_v39 = vadd.f32 %v1797_v53, %v2866_v24 }
0x107e   :  { %v1857_v57 = vmul.f32 2.0, %v2561_v37  ;;  %v1808_v1 = vmul.f32 0.1, %v2561_v37 }
0x107f   :  { %2562 = vtanh.f32 %v1798_v39 }
0x1080   :  { %v1861_v63 = vadd.f32 %v1857_v57, %v1853_v43  ;;  %v1812_v46 = vadd.f32 %v1808_v1, %v3423_v58 }
0x1084   :  { %v1800_v10 = vpop.f32.mrf.mxu0 }
0x1085   :  { %v2563_v20 = vpop.eup %2562  ;;  %v1801_v0 = vadd.f32 %v1800_v10, %v2877_v38 }
0x1086   :  { %v1858_v29 = vmul.f32 2.0, %v2563_v20  ;;  %v1809_v17 = vmul.f32 0.1, %v2563_v20 }
0x1087   :  { %2564 = vtanh.f32 %v1801_v0 }
0x1088   :  { %v1862_v2 = vadd.f32 %v1858_v29, %v1854_v36  ;;  %v1813_v11 = vadd.f32 %v1809_v17, %v3418_v8 }
0x108d   :  { %v2565_v5 = vpop.eup %2564 }
0x108e   :  { %v1810_v18 = vmul.f32 0.1, %v2565_v5  ;;  %v1859_v52 = vmul.f32 2.0, %v2565_v5 }
0x1090   :  { %v1814_v56 = vadd.f32 %v1810_v18, %v3415_v6  ;;  %v1863_v7 = vadd.f32 %v1859_v52, %v1855_v32  ;;  %v3549_v18 = vpop.permute.xlu1 %247  ;;  %v538_v52 = vpop.permute.xlu0 %537 }
0x1092   :  { %1827 = vmatpush.msrb.mxu1 %v1814_v56 }
0x1094   :  { %1828 = vmatpush.msrb.mxu1 %v1813_v11 }
0x1096   :  { %1829 = vmatpush.msrb.mxu1 %v1812_v46 }
0x1098   :  { %1830 = vmatpush.msrb.mxu1 %v1811_v22  ;;  %v542_v12 = vpop.permute.xlu1 %541  ;;  %v1090_v46 = vpop.permute.xlu0 %1089 }
0x1099   :  { %2347 = vmatmul.msk.f32.vlgmr.msrb.gmra.mxu1 %vm187_vm4, %v3211_v30 }
0x10a1   :  { %2348 = vmatmul.msk.f32.gmra.mxu1 %vm187_vm4, %v3218_v33 }
0x10a9   :  { %2349 = vmatmul.msk.f32.gmra.mxu1 %vm187_vm4, %v3225_v15 }
0x10b1   :  { %2350 = vmatmul.msk.f32.gmra.mxu1 %vm187_vm4, %v3232_v14 }
0x1116   :  { %v1832_v61 = vpop.f32.mrf.mxu1 }
0x1117   :  { %v1833_v49 = vadd.f32 %v1832_v61, %v2893_v47  ;;  %v3564_v61 = vpop.permute.xlu2 %254 }
0x111e   :  { %v1835_v60 = vpop.f32.mrf.mxu1 }
0x111f   :  { %v1836_v21 = vadd.f32 %v1835_v60, %v2868_v25 }
0x1126   :  { %v1838_v59 = vpop.f32.mrf.mxu1 }
0x1127   :  { %v1839_v62 = vadd.f32 %v1838_v59, %v2866_v24  ;;  %v540_v59 = vmax.f32 %v3007_v9, %v538_v52 }
0x1129   :  { %2566 = vtanh.f32 %v1839_v62 }
0x112a   :  { %2568 = vtanh.f32 %v1836_v21 }
0x112b   :  { %2570 = vtanh.f32 %v1833_v49 }
0x112e   :  { %v1841_v54 = vpop.f32.mrf.mxu1 }
0x112f   :  { %v1842_v48 = vadd.f32 %v1841_v54, %v2877_v38  ;;  %v2567_v55 = vpop.eup %2566 }
0x1130   :  { %v2569_v19 = vpop.eup %2568  ;;  %v1866_v16 = vadd.f32 %v2567_v55, %v1862_v2  ;;  %v3577_v55 = vmax.f32 %v540_v59, %v542_v12 }
0x1131   :  { %2572 = vtanh.f32 %v1842_v48  ;;  %v2571_v34 = vpop.eup %2570  ;;  %v1865_v53 = vadd.f32 %v2569_v19, %v1861_v63  ;;  %v3575_v48 = vpop.permute.xlu1 %811 }
0x1132   :  { %v1864_v39 = vadd.f32 %v2571_v34, %v1860_v23  ;;  %v1870_v43 = vmul.f32 0.016666668, %v1866_v16  ;;  %v1360_v16 = vpop.permute.xlu0 %1359 }
0x1133   :  { %v1869_v41 = vmul.f32 0.016666668, %v1865_v53 }
0x1134   :  { %v1868_v20 = vmul.f32 0.016666668, %v1864_v39  ;;  %v3520_v0 = vadd.f32 %v1870_v43, %v3418_v8  ;;  %v1362_v39 = vmax.f32 %v3344_v50, %v1360_v16 }
0x1135   :  { %v3525_v36 = vadd.f32 %v1869_v41, %v3423_v58 }
0x1136   :  { %v3530_v23 = vadd.f32 %v1868_v20, %v3428_v13 }
0x1137   :  { %v2573_v35 = vpop.eup %2572 }
0x1138   :  { %v1867_v37 = vadd.f32 %v2573_v35, %v1863_v7 }
0x1139   :  { %v1364_v41 = vpop.permute.xlu1 %1363 }
0x113a   :  { %v1871_v57 = vmul.f32 0.016666668, %v1867_v37  ;;  %v3585_v37 = vpop.permute.xlu2 %815  ;;  %v3590_v20 = vmax.f32 %v1362_v39, %v1364_v41 }
0x113c   :  { %v3517_v10 = vadd.f32 %v1871_v57, %v3415_v6 }
0x113e   :  { %1888 = vmatpush.msrb.mxu2 %v3517_v10  ;;  %1978 = vmatpush.msrb.mxu3 %v3517_v10 }
0x1140   :  { %1889 = vmatpush.msrb.mxu2 %v3520_v0  ;;  %1979 = vmatpush.msrb.mxu3 %v3520_v0 }
0x1142   :  { %1890 = vmatpush.msrb.mxu2 %v3525_v36  ;;  %1980 = vmatpush.msrb.mxu3 %v3525_v36 }
0x1144   :  { %1891 = vmatpush.msrb.mxu2 %v3530_v23  ;;  %1981 = vmatpush.msrb.mxu3 %v3530_v23 }
0x1145   :  { %2351 = vmatmul.msk.f32.vlgmr.msrb.gmra.mxu2 %vm187_vm4, %v3204_v51  ;;  %2353 = vmatmul.msk.f32.vlgmr.msrb.gmra.mxu3 %vm187_vm4, %v3211_v30 }
0x114d   :  { %2354 = vmatmul.msk.f32.gmra.mxu3 %vm187_vm4, %v3218_v33 }
0x1155   :  { %2355 = vmatmul.msk.f32.gmra.mxu3 %vm187_vm4, %v3225_v15 }
0x115d   :  { %2356 = vmatmul.msk.f32.gmra.mxu3 %vm187_vm4, %v3232_v14 }
0x11c8   :  { %v1893_v6 = vpop.f32.mrf.mxu2  ;;  %v1983_v8 = vpop.f32.mrf.mxu3 }
0x11c9   :  { %v1894_v58 = vadd.f32 %v1893_v6, %v2870_v26  ;;  %v1984_v7 = vadd.f32 %v1983_v8, %v2893_v47  ;;  %v3595_v6 = vld [vmem:[%s3970_s3] sm:$0xff]  ;;  %v1086_v8 = vpop.permute.xlu2 %1085 }
0x11cb   :  { %v1896_v13 = vmax.f32 %v1894_v58, 0.0  ;;  %v1088_v58 = vmax.f32 %v3244_v27, %v1086_v8 }
0x11cd   :  { %v1897_v63 = vmul.f32 %v1896_v13, %v2873_v31  ;;  %v3602_v13 = vmax.f32 %v1088_v58, %v1090_v46 }
0x11cf   :  { %v1898_v51 = vsel %vm218_vm5, %v1897_v63, 0.0  ;;  %v3607_v63 = vld [vmem:[%s3970_s3 + $0x8] sm:$0xff] }
0x11d0   :  { %v1899_v29 = vrot.slane %v1898_v51, 4  ;;  %v1986_v30 = vpop.f32.mrf.mxu3 }
0x11d1   :  { %v1987_v56 = vadd.f32 %v1986_v30, %v2868_v25 }
0x11d2   :  { %v1900_v2 = vadd.f32 %v1899_v29, %v1898_v51  ;;  %v3616_v51 = vld [vmem:[%s3970_s3 + $0x10] sm:$0xff]  ;;  %v3623_v29 = vld [vmem:[%s3970_s3 + $0x18] sm:$0xff] }
0x11d4   :  { %v1901_v4 = vrot.slane %v1900_v2, 2 }
0x11d6   :  { %v1902_v33 = vadd.f32 %v1901_v4, %v1900_v2 }
0x11d8   :  { %v1903_v5 = vrot.slane %v1902_v33, 1  ;;  %v1989_v32 = vpop.f32.mrf.mxu3 }
0x11d9   :  { %v1990_v17 = vadd.f32 %v1989_v32, %v2866_v24 }
0x11da   :  { %v1904_v15 = vadd.f32 %v1903_v5, %v1902_v33 }
0x11db   :  { %2574 = vtanh.f32 %v1990_v17 }
0x11dc   :  { %v3552_v14 = vadd.f32 %v1904_v15, %v2882_v42  ;;  %2576 = vtanh.f32 %v1987_v56 }
0x11de   :  { %1907 = vrot.lane.b32.xlu2 %v3552_v14, %s2682_s13 }
0x11e0   :  { %v1992_v1 = vpop.f32.mrf.mxu3 }
0x11e1   :  { %v1993_v11 = vadd.f32 %v1992_v1, %v2877_v38  ;;  %v3562_v22 = vpop.eup %2574 }
0x11e2   :  { %v3566_v60 = vpop.eup %2576  ;;  %v2001_v49 = vmul.f32 0.05, %v3562_v22 }
0x11e3   :  { %2578 = vtanh.f32 %v1993_v11  ;;  %v2000_v34 = vmul.f32 0.05, %v3566_v60 }
0x11e4   :  { %2580 = vtanh.f32 %v1984_v7  ;;  %v2005_v35 = vadd.f32 %v2001_v49, %v3520_v0 }
0x11e5   :  { %v2004_v43 = vadd.f32 %v2000_v34, %v3525_v36 }
0x11e6   :  { %1637 = vrot.lane.b32.xlu2 %v3448_v28, %s2681_s12 }
0x11e9   :  { %v3569_v62 = vpop.eup %2578 }
0x11ea   :  { %v2002_v21 = vmul.f32 0.05, %v3569_v62  ;;  %v3573_v54 = vpop.eup %2580 }
0x11eb   :  { %v1999_v53 = vmul.f32 0.05, %v3573_v54 }
0x11ec   :  { %v2006_v19 = vadd.f32 %v2002_v21, %v3517_v10 }
0x11ed   :  { %v2003_v57 = vadd.f32 %v1999_v53, %v3530_v23 }
0x11ee   :  { %2019 = vmatpush.msra.mxu0 %v2006_v19  ;;  %549 = vrot.lane.b32.xlu2 %v3577_v55, %s2680_s11 }
0x11f0   :  { %2020 = vmatpush.msra.mxu0 %v2005_v35 }
0x11f2   :  { %2021 = vmatpush.msra.mxu0 %v2004_v43 }
0x11f4   :  { %2022 = vmatpush.msra.mxu0 %v2003_v57 }
0x11f5   :  { %2357 = vmatmul.msk.f32.vlgmr.msra.gmra.mxu0 %vm187_vm4, %v3595_v6 }
0x11f6   :  { %1371 = vrot.lane.b32.xlu2 %v3590_v20, %s2680_s11 }
0x11fd   :  { %2358 = vmatmul.msk.f32.gmra.mxu0 %vm187_vm4, %v3607_v63 }
0x11fe   :  { %1103 = vrot.lane.b32.xlu2 %v3602_v13, %s2683_s8 }
0x1205   :  { %2359 = vmatmul.msk.f32.gmra.mxu0 %vm187_vm4, %v3616_v51 }
0x120d   :  { %2360 = vmatmul.msk.f32.gmra.mxu0 %vm187_vm4, %v3623_v29 }
0x1272   :  { %v2024_v30 = vpop.f32.mrf.mxu0 }
0x1273   :  { %v2025_v15 = vadd.f32 %v2024_v30, %v2893_v47 }
0x127a   :  { %v2027_v2 = vpop.f32.mrf.mxu0 }
0x127b   :  { %v2028_v5 = vadd.f32 %v2027_v2, %v2868_v25 }
0x1282   :  { %v2030_v4 = vpop.f32.mrf.mxu0 }
0x1283   :  { %v2031_v33 = vadd.f32 %v2030_v4, %v2866_v24 }
0x1285   :  { %2582 = vtanh.f32 %v2031_v33 }
0x1286   :  { %2584 = vtanh.f32 %v2028_v5 }
0x128a   :  { %v2033_v32 = vpop.f32.mrf.mxu0 }
0x128b   :  { %v2034_v52 = vadd.f32 %v2033_v32, %v2877_v38  ;;  %v2583_v17 = vpop.eup %2582 }
0x128c   :  { %v2585_v56 = vpop.eup %2584  ;;  %v2042_v11 = vmul.f32 0.05, %v2583_v17 }
0x128d   :  { %2586 = vtanh.f32 %v2034_v52  ;;  %v2041_v59 = vmul.f32 0.05, %v2585_v56  ;;  %v2123_v30 = vmul.f32 2.0, %v2585_v56  ;;  %v2124_v52 = vmul.f32 2.0, %v2583_v17 }
0x128e   :  { %2588 = vtanh.f32 %v2025_v15  ;;  %v2046_v21 = vadd.f32 %v2042_v11, %v3520_v0 }
0x128f   :  { %v2045_v19 = vadd.f32 %v2041_v59, %v3525_v36  ;;  %v2127_v5 = vadd.f32 %v3566_v60, %v2123_v30 }
0x1293   :  { %v2587_v1 = vpop.eup %2586 }
0x1294   :  { %v2043_v7 = vmul.f32 0.05, %v2587_v1  ;;  %v2589_v12 = vpop.eup %2588  ;;  %v2125_v56 = vmul.f32 2.0, %v2587_v1 }
0x1295   :  { %v2040_v49 = vmul.f32 0.05, %v2589_v12  ;;  %v2122_v53 = vmul.f32 2.0, %v2589_v12 }
0x1296   :  { %v2047_v46 = vadd.f32 %v2043_v7, %v3517_v10 }
0x1297   :  { %v2044_v34 = vadd.f32 %v2040_v49, %v3530_v23  ;;  %v2126_v41 = vadd.f32 %v3573_v54, %v2122_v53  ;;  %v2128_v54 = vadd.f32 %v3562_v22, %v2124_v52  ;;  %v2129_v49 = vadd.f32 %v3569_v62, %v2125_v56 }
0x1298   :  { %2060 = vmatpush.msra.mxu1 %v2047_v46 }
0x129a   :  { %2061 = vmatpush.msra.mxu1 %v2046_v21 }
0x129c   :  { %2062 = vmatpush.msra.mxu1 %v2045_v19 }
0x129e   :  { %2063 = vmatpush.msra.mxu1 %v2044_v34 }
0x129f   :  { %2361 = vmatmul.msk.f32.vlgmr.msra.gmra.mxu1 %vm187_vm4, %v3595_v6 }
0x12a7   :  { %2362 = vmatmul.msk.f32.gmra.mxu1 %vm187_vm4, %v3607_v63 }
0x12af   :  { %2363 = vmatmul.msk.f32.gmra.mxu1 %vm187_vm4, %v3616_v51 }
0x12b7   :  { %2364 = vmatmul.msk.f32.gmra.mxu1 %vm187_vm4, %v3623_v29 }
0x131c   :  { %v2065_v16 = vpop.f32.mrf.mxu1 }
0x131d   :  { %v2066_v35 = vadd.f32 %v2065_v16, %v2893_v47 }
0x131f   :  { %2590 = vtanh.f32 %v2066_v35 }
0x1324   :  { %v2068_v39 = vpop.f32.mrf.mxu1 }
0x1325   :  { %v2591_v43 = vpop.eup %2590  ;;  %v2069_v57 = vadd.f32 %v2068_v39, %v2868_v25 }
0x1326   :  { %v2130_v8 = vmul.f32 2.0, %v2591_v43  ;;  %v2081_v39 = vmul.f32 0.1, %v2591_v43 }
0x1327   :  { %2592 = vtanh.f32 %v2069_v57 }
0x1328   :  { %v2134_v58 = vadd.f32 %v2130_v8, %v2126_v41  ;;  %v2085_v1 = vadd.f32 %v2081_v39, %v3530_v23 }
0x132c   :  { %v2071_v2 = vpop.f32.mrf.mxu1 }
0x132d   :  { %v2593_v4 = vpop.eup %2592  ;;  %v2072_v33 = vadd.f32 %v2071_v2, %v2866_v24 }
0x132e   :  { %v2131_v32 = vmul.f32 2.0, %v2593_v4  ;;  %v2082_v35 = vmul.f32 0.1, %v2593_v4 }
0x132f   :  { %2594 = vtanh.f32 %v2072_v33 }
0x1330   :  { %v2135_v15 = vadd.f32 %v2131_v32, %v2127_v5  ;;  %v2086_v22 = vadd.f32 %v2082_v35, %v3525_v36 }
0x1334   :  { %v2074_v7 = vpop.f32.mrf.mxu1 }
0x1335   :  { %v2595_v11 = vpop.eup %2594  ;;  %v2075_v12 = vadd.f32 %v2074_v7, %v2877_v38 }
0x1336   :  { %v2132_v46 = vmul.f32 2.0, %v2595_v11  ;;  %v2083_v60 = vmul.f32 0.1, %v2595_v11 }
0x1337   :  { %2596 = vtanh.f32 %v2075_v12 }
0x1338   :  { %v2136_v59 = vadd.f32 %v2132_v46, %v2128_v54  ;;  %v2087_v53 = vadd.f32 %v2083_v60, %v3520_v0 }
0x133d   :  { %v2597_v21 = vpop.eup %2596 }
0x133e   :  { %v2084_v19 = vmul.f32 0.1, %v2597_v21  ;;  %v2133_v34 = vmul.f32 2.0, %v2597_v21 }
0x1340   :  { %v2088_v16 = vadd.f32 %v2084_v19, %v3517_v10  ;;  %v2137_v17 = vadd.f32 %v2133_v34, %v2129_v49 }
0x1342   :  { %2101 = vmatpush.msra.mxu2 %v2088_v16 }
0x1344   :  { %2102 = vmatpush.msra.mxu2 %v2087_v53 }
0x1346   :  { %2103 = vmatpush.msra.mxu2 %v2086_v22 }
0x1348   :  { %2104 = vmatpush.msra.mxu2 %v2085_v1 }
0x1349   :  { %2365 = vmatmul.msk.f32.vlgmr.msra.gmra.mxu2 %vm187_vm4, %v3595_v6 }
0x1351   :  { %2366 = vmatmul.msk.f32.gmra.mxu2 %vm187_vm4, %v3607_v63 }
0x1359   :  { %2367 = vmatmul.msk.f32.gmra.mxu2 %vm187_vm4, %v3616_v51 }
0x1361   :  { %2368 = vmatmul.msk.f32.gmra.mxu2 %vm187_vm4, %v3623_v29 }
0x13cc   :  { %v2106_v62 = vpop.f32.mrf.mxu2 }
0x13cd   :  { %v2107_v30 = vadd.f32 %v2106_v62, %v2893_v47 }
0x13d4   :  { %v2109_v43 = vpop.f32.mrf.mxu2 }
0x13d5   :  { %v2110_v8 = vadd.f32 %v2109_v43, %v2868_v25  ;;  %v250_v43 = vsub.f32 %v2885_v44, %v3549_v18 }
0x13dc   :  { %v2112_v57 = vpop.f32.mrf.mxu2 }
0x13dd   :  { %v2113_v41 = vadd.f32 %v2112_v57, %v2866_v24 }
0x13df   :  { %2598 = vtanh.f32 %v2113_v41  ;;  %v251_v41 = vmul.f32 1.442695, %v250_v43 }
0x13e0   :  { %2600 = vtanh.f32 %v2110_v8 }
0x13e1   :  { %2602 = vtanh.f32 %v2107_v30 }
0x13e4   :  { %v2115_v6 = vpop.f32.mrf.mxu2 }
0x13e5   :  { %v2116_v63 = vadd.f32 %v2115_v6, %v2877_v38  ;;  %v2599_v51 = vpop.eup %2598 }
0x13e6   :  { %v2601_v2 = vpop.eup %2600  ;;  %v2140_v29 = vadd.f32 %v2599_v51, %v2136_v59 }
0x13e7   :  { %2604 = vtanh.f32 %v2116_v63  ;;  %v2603_v4 = vpop.eup %2602  ;;  %v2139_v32 = vadd.f32 %v2601_v2, %v2135_v15  ;;  %v2677_v15 = vld [vmem:[%s3969_s5] sm:$0xf] }
0x13e8   :  { %v2144_v24 = vmul.f32 0.016666668, %v2140_v29  ;;  %v2138_v7 = vadd.f32 %v2603_v4, %v2134_v58  ;;  %2606 = vpow2.f32 %v251_v41 }
0x13e9   :  { %v2143_v47 = vmul.f32 0.016666668, %v2139_v32 }
0x13ea   :  { %v2148_v11 = vadd.f32 %v2144_v24, %v3520_v0  ;;  %v2142_v12 = vmul.f32 0.016666668, %v2138_v7 }
0x13eb   :  { %v2147_v38 = vadd.f32 %v2143_v47, %v3525_v36 }
0x13ec   :  { %v2146_v54 = vadd.f32 %v2142_v12, %v3530_v23 }
0x13ed   :  { %v2605_v33 = vpop.eup %2604 }
0x13ee   :  { %v2141_v5 = vadd.f32 %v2605_v33, %v2137_v17  ;;  %v3726_v63 = vpop.eup %2606 }
0x13f0   :  { %v2145_v52 = vmul.f32 0.016666668, %v2141_v5 }
0x13f2   :  { %v2149_v25 = vadd.f32 %v2145_v52, %v3517_v10 }
0x13f4   :  { %2162 = vmatpush.msra.mxu3 %v2149_v25 }
0x13f6   :  { %2163 = vmatpush.msra.mxu3 %v2148_v11 }
0x13f8   :  { %2164 = vmatpush.msra.mxu3 %v2147_v38 }
0x13fa   :  { %2165 = vmatpush.msra.mxu3 %v2146_v54 }
0x13fb   :  { %2369 = vmatmul.msk.f32.vlgmr.msra.gmra.mxu3 %vm187_vm4, %v2677_v15 }
0x147e   :  { %v2167_v58 = vpop.f32.mrf.mxu3 }
0x147f   :  { %v2168_v10 = vadd.f32 %v2167_v58, %v2870_v26  ;;  %v1908_v26 = vpop.permute.xlu2 %1907  ;;  %v237_v58 = vsub.f32 %v2885_v44, %v2922_v3 }
0x1480   :  { %v1910_v22 = vmax.f32 %v3552_v14, %v1908_v26 }
0x1481   :  { %v2170_v46 = vmax.f32 %v2168_v10, 0.0 }
0x1483   :  { %v2171_v0 = vmul.f32 %v2170_v46, %v2873_v31  ;;  %v814_v31 = vmax.f32 %v3111_v45, %v3575_v48  ;;  %v238_v46 = vmul.f32 1.442695, %v237_v58 }
0x1485   :  { %v2172_v59 = vsel %vm218_vm5, %v2171_v0, 0.0  ;;  %v3692_v60 = vmax.f32 %v814_v31, %v3585_v37 }
0x1486   :  { %v2173_v56 = vrot.slane %v2172_v59, 4 }
0x1487   :  { %v1638_v16 = vpop.permute.xlu2 %1637 }
0x1488   :  { %v2174_v36 = vadd.f32 %v2173_v56, %v2172_v59 }
0x148a   :  { %v2175_v21 = vrot.slane %v2174_v36, 2 }
0x148c   :  { %v2176_v49 = vadd.f32 %v2175_v21, %v2174_v36 }
0x148e   :  { %v2177_v23 = vrot.slane %v2176_v49, 1 }
0x148f   :  { %v550_v57 = vpop.permute.xlu2 %549 }
0x1490   :  { %v2178_v19 = vadd.f32 %v2177_v23, %v2176_v49  ;;  %v552_v8 = vsub.f32 %v3007_v9, %v550_v57 }
0x1492   :  { %v3679_v34 = vadd.f32 %v2178_v19, %v2882_v42  ;;  %v1634_v42 = vpop.permute.xlu1 %1633  ;;  %v553_v6 = vmul.f32 1.442695, %v552_v8 }
0x1493   :  { %v1636_v35 = vmax.f32 %v3448_v28, %v1634_v42 }
0x1494   :  { %2185 = vrot.lane.b32.xlu1 %v3679_v34, %s2681_s12  ;;  %2181 = vrot.lane.b32.xlu0 %v3679_v34, %s2682_s13  ;;  %2608 = vpow2.f32 %v553_v6 }
0x1495   :  { %v3697_v17 = vmax.f32 %v1636_v35, %v1638_v16 }
0x1497   :  { %v1372_v30 = vpop.permute.xlu2 %1371 }
0x1498   :  { %v1374_v51 = vsub.f32 %v3344_v50, %v1372_v30 }
0x149a   :  { %v1375_v2 = vmul.f32 1.442695, %v1374_v51  ;;  %v3731_v4 = vpop.eup %2608 }
0x149c   :  { %1911 = vrot.lane.b32.xlu0 %v3552_v14, %s2681_s12  ;;  %1097 = vrot.lane.b32.xlu1 %v3602_v13, %s2680_s11  ;;  %2610 = vpow2.f32 %v1375_v2 }
0x149f   :  { %v1104_v18 = vpop.permute.xlu2 %1103 }
0x14a0   :  { %v1106_v29 = vsub.f32 %v3244_v27, %v1104_v18 }
0x14a2   :  { %v1107_v33 = vmul.f32 1.442695, %v1106_v29  ;;  %v3736_v5 = vpop.eup %2610 }
0x14a4   :  { %823 = vrot.lane.b32.xlu0 %v3692_v60, %s2680_s11  ;;  %2612 = vpow2.f32 %v1107_v33 }
0x14aa   :  { %v3740_v32 = vpop.eup %2612 }
0x14ac   :  { %1645 = vrot.lane.b32.xlu0 %v3697_v17, %s2680_s11 }
0x14b4   :  { %555 = vrot.lane.b32.xlu0 %v3577_v55, %s2683_s8 }
0x14bc   :  { %1377 = vrot.lane.b32.xlu0 %v3590_v20, %s2683_s8 }
0x1506   :  { %v2182_v48 = vpop.permute.xlu0 %2181  ;;  %v2186_v53 = vpop.permute.xlu1 %2185 }
0x1507   :  { %v2184_v37 = vmax.f32 %v3679_v34, %v2182_v48 }
0x1509   :  { %v3706_v39 = vmax.f32 %v2184_v37, %v2186_v53 }
0x150b   :  { %2199 = vrot.lane.b32.xlu0 %v3706_v39, %s2683_s8  ;;  %2193 = vrot.lane.b32.xlu2 %v3706_v39, %s2680_s11 }
0x150e   :  { %v1912_v1 = vpop.permute.xlu0 %1911  ;;  %v1098_v54 = vpop.permute.xlu1 %1097 }
0x150f   :  { %v3713_v62 = vmax.f32 %v1910_v22, %v1912_v1  ;;  %v1100_v23 = vsub.f32 %v3244_v27, %v1098_v54 }
0x1511   :  { %1919 = vrot.lane.b32.xlu1 %v3713_v62, %s2680_s11  ;;  %v1101_v31 = vmul.f32 1.442695, %v1100_v23  ;;  %v1093_v23 = vsub.f32 %v3244_v27, %v3602_v13  ;;  %v2189_v27 = vsub.f32 %v3679_v34, %v3706_v39 }
0x1513   :  { %1925 = vrot.lane.b32.xlu2 %v3713_v62, %s2683_s8 }
0x1516   :  { %v824_v59 = vpop.permute.xlu0 %823 }
0x1517   :  { %v826_v19 = vsub.f32 %v3111_v45, %v824_v59 }
0x1519   :  { %829 = vrot.lane.b32.xlu1 %v3692_v60, %s2683_s8  ;;  %v827_v44 = vmul.f32 1.442695, %v826_v19 }
0x151e   :  { %v1646_v26 = vpop.permute.xlu0 %1645 }
0x151f   :  { %v1648_v42 = vsub.f32 %v3448_v28, %v1646_v26  ;;  %v1094_v26 = vmul.f32 1.442695, %v1093_v23 }
0x1521   :  { %1651 = vrot.lane.b32.xlu1 %v3697_v17, %s2683_s8  ;;  %v1649_v35 = vmul.f32 1.442695, %v1648_v42 }
0x1526   :  { %v556_v16 = vpop.permute.xlu0 %555 }
0x1527   :  { %v558_v22 = vsub.f32 %v3007_v9, %v556_v16 }
0x1529   :  { %259 = vrot.lane.b32.xlu1 %v3726_v63, %s2681_s12  ;;  %v559_v43 = vmul.f32 1.442695, %v558_v22 }
0x152e   :  { %v1378_v57 = vpop.permute.xlu0 %1377 }
0x152f   :  { %v1380_v6 = vsub.f32 %v3344_v50, %v1378_v57 }
0x1531   :  { %562 = vrot.lane.b32.xlu1 %v3731_v4, %s2682_s13  ;;  %v1381_v2 = vmul.f32 1.442695, %v1380_v6 }
0x1539   :  { %1384 = vrot.lane.b32.xlu1 %v3736_v5, %s2682_s13 }
0x1541   :  { %1115 = vrot.lane.b32.xlu1 %v3740_v32, %s2681_s12 }
0x1565   :  { %v2194_v52 = vpop.permute.xlu2 %2193 }
0x1566   :  { %v2196_v24 = vsub.f32 %v3679_v34, %v2194_v52 }
0x1568   :  { %v2197_v7 = vmul.f32 1.442695, %v2196_v24 }
0x156a   :  { %2614 = vpow2.f32 %v2197_v7 }
0x156d   :  { %v1926_v25 = vpop.permute.xlu2 %1925 }
0x156e   :  { %v1928_v47 = vsub.f32 %v3552_v14, %v1926_v25 }
0x1570   :  { %v3746_v11 = vpop.eup %2614  ;;  %v1929_v12 = vmul.f32 1.442695, %v1928_v47 }
0x1571   :  { %2206 = vrot.lane.b32.xlu1 %v3746_v11, %s2682_s13 }
0x1572   :  { %2616 = vpow2.f32 %v1929_v12 }
0x1573   :  { %2618 = vpow2.f32 %v238_v46  ;;  %v545_v46 = vsub.f32 %v3007_v9, %v3577_v55 }
0x1575   :  { %v546_v59 = vmul.f32 1.442695, %v545_v46 }
0x1578   :  { %v3750_v38 = vpop.eup %2616 }
0x1579   :  { %1937 = vrot.lane.b32.xlu1 %v3750_v38, %s2681_s12  ;;  %v3756_v56 = vpop.eup %2618 }
0x157a   :  { %v257_v36 = vadd.f32 %v3756_v56, %v3564_v61 }
0x157d   :  { %v2200_v33 = vpop.permute.xlu0 %2199 }
0x157e   :  { %v2202_v24 = vsub.f32 %v3679_v34, %v2200_v33 }
0x1580   :  { %v2203_v7 = vmul.f32 1.442695, %v2202_v24 }
0x1583   :  { %v1920_v15 = vpop.permute.xlu1 %1919 }
0x1584   :  { %v1922_v61 = vsub.f32 %v3552_v14, %v1920_v15 }
0x1586   :  { %v1923_v48 = vmul.f32 1.442695, %v1922_v61 }
0x158b   :  { %v830_v10 = vpop.permute.xlu1 %829 }
0x158c   :  { %v832_v1 = vsub.f32 %v3111_v45, %v830_v10 }
0x158e   :  { %v833_v41 = vmul.f32 1.442695, %v832_v1  ;;  %v2190_v1 = vmul.f32 1.442695, %v2189_v27 }
0x1593   :  { %v1652_v0 = vpop.permute.xlu1 %1651 }
0x1594   :  { %v1654_v51 = vsub.f32 %v3448_v28, %v1652_v0 }
0x1596   :  { %v1655_v18 = vmul.f32 1.442695, %v1654_v51 }
0x159b   :  { %v260_v21 = vpop.permute.xlu1 %259 }
0x159c   :  { %v262_v49 = vadd.f32 %v260_v21, %v257_v36  ;;  %v1367_v21 = vsub.f32 %v3344_v50, %v3590_v20  ;;  %v1915_v50 = vsub.f32 %v3552_v14, %v3713_v62 }
0x159e   :  { %2620 = vrcp.f32 %v262_v49  ;;  %v1916_v16 = vmul.f32 1.442695, %v1915_v50 }
0x159f   :  { %2622 = vpow2.f32 %v1101_v31 }
0x15a0   :  { %2624 = vpow2.f32 %v827_v44 }
0x15a1   :  { %2626 = vpow2.f32 %v1649_v35 }
0x15a2   :  { %2628 = vpow2.f32 %v1923_v48 }
0x15a3   :  { %2630 = vpow2.f32 %v559_v43  ;;  %v563_v58 = vpop.permute.xlu1 %562 }
0x15a4   :  { %v3762_v3 = vpop.eup %2620  ;;  %2632 = vpow2.f32 %v833_v41 }
0x15a5   :  { %270 = vrot.lane.b32.xlu0 %v3762_v3, %s2683_s8  ;;  %266 = vrot.lane.b32.xlu2 %v3762_v3, %s2680_s11  ;;  %v3770_v37 = vpop.eup %2622  ;;  %2634 = vpow2.f32 %v1381_v2 }
0x15a6   :  { %v3772_v53 = vpop.eup %2624  ;;  %2636 = vpow2.f32 %v1655_v18 }
0x15a7   :  { %v3780_v8 = vpop.eup %2626  ;;  %2638 = vpow2.f32 %v2203_v7 }
0x15a8   :  { %v3782_v30 = vpop.eup %2628  ;;  %2640 = vpow2.f32 %v546_v59 }
0x15a9   :  { %v3790_v29 = vpop.eup %2630 }
0x15aa   :  { %v3792_v52 = vpop.eup %2632 }
0x15ab   :  { %v3799_v25 = vpop.eup %2634  ;;  %v1385_v36 = vpop.permute.xlu1 %1384 }
0x15ac   :  { %v3801_v47 = vpop.eup %2636 }
0x15ad   :  { %1110 = vrot.lane.b32.xlu0 %v3770_v37, %s2682_s13  ;;  %836 = vrot.lane.b32.xlu2 %v3772_v53, %s2682_s13  ;;  %v3807_v12 = vpop.eup %2638 }
0x15ae   :  { %v3821_v19 = vpop.eup %2640 }
0x15af   :  { %v565_v31 = vadd.f32 %v3821_v19, %v563_v58 }
0x15b3   :  { %v1116_v44 = vpop.permute.xlu1 %1115 }
0x15b5   :  { %1932 = vrot.lane.b32.xlu0 %v3782_v30, %s2682_s13  ;;  %1658 = vrot.lane.b32.xlu2 %v3780_v8, %s2682_s13 }
0x15bd   :  { %841 = vrot.lane.b32.xlu0 %v3792_v52, %s2681_s12  ;;  %567 = vrot.lane.b32.xlu2 %v3790_v29, %s2681_s12 }
0x15c5   :  { %1663 = vrot.lane.b32.xlu0 %v3801_v47, %s2681_s12  ;;  %1389 = vrot.lane.b32.xlu2 %v3799_v25, %s2681_s12 }
0x15cd   :  { %2211 = vrot.lane.b32.xlu2 %v3807_v12, %s2681_s12 }
0x15e3   :  { %v2207_v48 = vpop.permute.xlu1 %2206 }
0x15eb   :  { %v1938_v33 = vpop.permute.xlu1 %1937 }
0x15ff   :  { %v267_v54 = vpop.permute.xlu2 %266 }
0x1600   :  { %v269_v15 = vmul.f32 %v2945_v40, %v267_v54  ;;  %v1368_v40 = vmul.f32 1.442695, %v1367_v21 }
0x1602   :  { %v275_v10 = vrot.slane %v269_v15, 7  ;;  %2642 = vpow2.f32 %v1368_v40 }
0x1603   :  { %2644 = vpow2.f32 %v1094_v26 }
0x1604   :  { %276 = vrot.lane.b32.xlu0 %v275_v10, %s2682_s13 }
0x1607   :  { %v837_v0 = vpop.permute.xlu2 %836 }
0x1608   :  { %v3830_v13 = vpop.eup %2642 }
0x1609   :  { %v1387_v35 = vadd.f32 %v3830_v13, %v1385_v36  ;;  %v2645_v22 = vpop.eup %2644 }
0x160f   :  { %v3817_v49 = vpop.permute.xlu2 %1658 }
0x1617   :  { %v271_v9 = vpop.permute.xlu0 %270  ;;  %v568_v55 = vpop.permute.xlu2 %567 }
0x1618   :  { %v273_v42 = vmul.f32 %v3726_v63, %v271_v9  ;;  %v570_v61 = vadd.f32 %v568_v55, %v565_v31  ;;  %v819_v63 = vsub.f32 %v3111_v45, %v3692_v60  ;;  %v1641_v45 = vsub.f32 %v3448_v28, %v3697_v17 }
0x161a   :  { %v280_v20 = vrot.slane %v273_v42, 6  ;;  %2646 = vrcp.f32 %v570_v61  ;;  %v820_v39 = vmul.f32 1.442695, %v819_v63  ;;  %v1642_v15 = vmul.f32 1.442695, %v1641_v45 }
0x161b   :  { %2648 = vpow2.f32 %v1916_v16  ;;  %v264_v63 = vmul.f32 %v3762_v3, %v3756_v56 }
0x161c   :  { %281 = vrot.lane.b32.xlu1 %v280_v20, %s2681_s12 }
0x161f   :  { %v1111_v43 = vpop.permute.xlu0 %1110  ;;  %v1390_v14 = vpop.permute.xlu2 %1389 }
0x1620   :  { %v3835_v62 = vpop.eup %2646  ;;  %v1113_v57 = vadd.f32 %v2645_v22, %v1111_v43  ;;  %v1392_v41 = vadd.f32 %v1390_v14, %v1387_v35 }
0x1621   :  { %574 = vrot.lane.b32.xlu2 %v3835_v62, %s2680_s11  ;;  %v2649_v6 = vpop.eup %2648 }
0x1622   :  { %v1118_v34 = vadd.f32 %v1116_v44, %v1113_v57  ;;  %2650 = vrcp.f32 %v1392_v41 }
0x1623   :  { %2652 = vpow2.f32 %v2190_v1 }
0x1624   :  { %2654 = vrcp.f32 %v1118_v34 }
0x1625   :  { %2656 = vpow2.f32 %v820_v39 }
0x1627   :  { %v1933_v60 = vpop.permute.xlu0 %1932  ;;  %v2212_v54 = vpop.permute.xlu2 %2211 }
0x1628   :  { %v3841_v51 = vpop.eup %2650  ;;  %v1935_v2 = vadd.f32 %v2649_v6, %v1933_v60 }
0x1629   :  { %v3843_v18 = vpop.eup %2652  ;;  %1396 = vrot.lane.b32.xlu2 %v3841_v51, %s2680_s11 }
0x162a   :  { %v2655_v24 = vpop.eup %2654  ;;  %v1940_v7 = vadd.f32 %v1938_v33, %v1935_v2  ;;  %v2209_v58 = vadd.f32 %v3843_v18, %v2207_v48 }
0x162b   :  { %1122 = vrot.lane.b32.xlu1 %v2655_v24, %s2680_s11  ;;  %v3849_v28 = vmul.f32 %v2655_v24, %v2645_v22  ;;  %v2657_v17 = vpop.eup %2656 }
0x162c   :  { %2658 = vrcp.f32 %v1940_v7  ;;  %v2214_v10 = vadd.f32 %v2212_v54, %v2209_v58  ;;  %v839_v46 = vadd.f32 %v2657_v17, %v837_v0 }
0x162d   :  { %2660 = vpow2.f32 %v1642_v15 }
0x162e   :  { %2662 = vrcp.f32 %v2214_v10 }
0x162f   :  { %v842_v59 = vpop.permute.xlu0 %841 }
0x1630   :  { %v844_v36 = vadd.f32 %v842_v59, %v839_v46 }
0x1631   :  { %1126 = vrot.lane.b32.xlu2 %v2655_v24, %s2683_s8 }
0x1632   :  { %v2659_v21 = vpop.eup %2658  ;;  %2664 = vrcp.f32 %v844_v36 }
0x1633   :  { %1944 = vrot.lane.b32.xlu1 %v2659_v21, %s2680_s11  ;;  %v3853_v23 = vmul.f32 %v2659_v21, %v2649_v6  ;;  %v2661_v40 = vpop.eup %2660 }
0x1634   :  { %v1661_v26 = vadd.f32 %v2661_v40, %v3817_v49  ;;  %v3856_v31 = vpop.eup %2662 }
0x1637   :  { %v1664_v44 = vpop.permute.xlu0 %1663 }
0x1638   :  { %v2665_v9 = vpop.eup %2664  ;;  %v1666_v0 = vadd.f32 %v1664_v44, %v1661_v26 }
0x1639   :  { %848 = vrot.lane.b32.xlu0 %v2665_v9, %s2680_s11  ;;  %2218 = vrot.lane.b32.xlu2 %v3856_v31, %s2680_s11  ;;  %v3861_v55 = vmul.f32 %v2665_v9, %v2657_v17 }
0x163a   :  { %2666 = vrcp.f32 %v1666_v0 }
0x163b   :  { %852 = vrot.lane.b32.xlu1 %v2665_v9, %s2683_s8 }
0x1640   :  { %v2667_v42 = vpop.eup %2666 }
0x1641   :  { %1670 = vrot.lane.b32.xlu0 %v2667_v42, %s2680_s11  ;;  %1948 = vrot.lane.b32.xlu2 %v2659_v21, %s2683_s8  ;;  %v3866_v49 = vmul.f32 %v2667_v42, %v2661_v40 }
0x1643   :  { %1674 = vrot.lane.b32.xlu1 %v2667_v42, %s2683_s8 }
0x1649   :  { %578 = vrot.lane.b32.xlu0 %v3835_v62, %s2683_s8 }
0x1651   :  { %1400 = vrot.lane.b32.xlu0 %v3841_v51, %s2683_s8 }
0x1659   :  { %2222 = vrot.lane.b32.xlu0 %v3856_v31, %s2683_s8 }
0x1676   :  { %v277_v48 = vpop.permute.xlu0 %276 }
0x167b   :  { %v575_v61 = vpop.permute.xlu2 %574 }
0x167c   :  { %v577_v50 = vmul.f32 %v3731_v4, %v575_v61  ;;  %v285_v4 = vsel %vm284_vm6, %v264_v63, %v277_v48 }
0x167e   :  { %v583_v20 = vrot.slane %v577_v50, 7 }
0x1680   :  { %584 = vrot.lane.b32.xlu1 %v583_v20, %s2682_s13 }
0x1683   :  { %v1397_v27 = vpop.permute.xlu2 %1396 }
0x1684   :  { %v1399_v16 = vmul.f32 %v3736_v5, %v1397_v27 }
0x1686   :  { %v1405_v35 = vrot.slane %v1399_v16, 7 }
0x1688   :  { %1406 = vrot.lane.b32.xlu1 %v1405_v35, %s2682_s13 }
0x168b   :  { %v1127_v22 = vpop.permute.xlu2 %1126 }
0x168c   :  { %v1129_v1 = vmul.f32 %v3740_v32, %v1127_v22 }
0x168e   :  { %v1136_v43 = vrot.slane %v1129_v1, 6  ;;  %v282_v14 = vpop.permute.xlu1 %281 }
0x168f   :  { %v287_v57 = vsel %vm286_vm7, %v285_v4, %v282_v14 }
0x1690   :  { %289 = vst.msk [vmem:[%s3972_s9] sm:$0x7] %vm288_vm8, %v287_v57  ;;  %1137 = vrot.lane.b32.xlu1 %v1136_v43, %s2681_s12 }
0x1693   :  { %v2219_v5 = vpop.permute.xlu2 %2218 }
0x1694   :  { %v2221_v56 = vmul.f32 %v3746_v11, %v2219_v5 }
0x1696   :  { %v2227_v3 = vrot.slane %v2221_v56, 7 }
0x1698   :  { %2228 = vrot.lane.b32.xlu1 %v2227_v3, %s2682_s13 }
0x169b   :  { %v1949_v32 = vpop.permute.xlu2 %1948 }
0x169c   :  { %v1951_v41 = vmul.f32 %v3750_v38, %v1949_v32 }
0x169d   :  { %v1123_v34 = vpop.permute.xlu1 %1122 }
0x169e   :  { %v1958_v39 = vrot.slane %v1951_v41, 6  ;;  %v1125_v6 = vmul.f32 %v3770_v37, %v1123_v34 }
0x16a0   :  { %v1131_v45 = vrot.slane %v1125_v6, 7  ;;  %1959 = vrot.lane.b32.xlu1 %v1958_v39, %s2681_s12 }
0x16a2   :  { %1132 = vrot.lane.b32.xlu0 %v1131_v45, %s2682_s13 }
0x16a5   :  { %v1945_v60 = vpop.permute.xlu1 %1944 }
0x16a6   :  { %v1947_v2 = vmul.f32 %v3782_v30, %v1945_v60 }
0x16a8   :  { %v1953_v33 = vrot.slane %v1947_v2, 7 }
0x16aa   :  { %1954 = vrot.lane.b32.xlu0 %v1953_v33, %s2682_s13 }
0x16ab   :  { %v849_v11 = vpop.permute.xlu0 %848 }
0x16ac   :  { %v851_v24 = vmul.f32 %v3772_v53, %v849_v11 }
0x16ad   :  { %v853_v7 = vpop.permute.xlu1 %852 }
0x16ae   :  { %v857_v38 = vrot.slane %v851_v24, 7  ;;  %v855_v54 = vmul.f32 %v3792_v52, %v853_v7 }
0x16b0   :  { %v862_v15 = vrot.slane %v855_v54, 6  ;;  %858 = vrot.lane.b32.xlu2 %v857_v38, %s2682_s13 }
0x16b2   :  { %863 = vrot.lane.b32.xlu0 %v862_v15, %s2681_s12 }
0x16b3   :  { %v1671_v37 = vpop.permute.xlu0 %1670 }
0x16b4   :  { %v1673_v58 = vmul.f32 %v3780_v8, %v1671_v37 }
0x16b5   :  { %v1675_v17 = vpop.permute.xlu1 %1674 }
0x16b6   :  { %v1679_v30 = vrot.slane %v1673_v58, 7  ;;  %v1677_v10 = vmul.f32 %v3801_v47, %v1675_v17 }
0x16b8   :  { %v1684_v46 = vrot.slane %v1677_v10, 6  ;;  %1680 = vrot.lane.b32.xlu2 %v1679_v30, %s2682_s13 }
0x16ba   :  { %1685 = vrot.lane.b32.xlu0 %v1684_v46, %s2681_s12 }
0x16bb   :  { %v579_v53 = vpop.permute.xlu0 %578 }
0x16bc   :  { %v581_v52 = vmul.f32 %v3790_v29, %v579_v53 }
0x16be   :  { %v588_v59 = vrot.slane %v581_v52, 6 }
0x16c0   :  { %589 = vrot.lane.b32.xlu2 %v588_v59, %s2681_s12 }
0x16c3   :  { %v1401_v36 = vpop.permute.xlu0 %1400 }
0x16c4   :  { %v1403_v21 = vmul.f32 %v3799_v25, %v1401_v36 }
0x16c6   :  { %v1410_v40 = vrot.slane %v1403_v21, 6 }
0x16c8   :  { %1411 = vrot.lane.b32.xlu2 %v1410_v40, %s2681_s12 }
0x16cb   :  { %v2223_v8 = vpop.permute.xlu0 %2222 }
0x16cc   :  { %v2225_v47 = vmul.f32 %v3807_v12, %v2223_v8  ;;  %v572_v12 = vmul.f32 %v3835_v62, %v3821_v19  ;;  %v1394_v19 = vmul.f32 %v3841_v51, %v3830_v13  ;;  %v2216_v13 = vmul.f32 %v3856_v31, %v3843_v18 }
0x16ce   :  { %v2232_v26 = vrot.slane %v2225_v47, 6 }
0x16d0   :  { %2233 = vrot.lane.b32.xlu2 %v2232_v26, %s2681_s12 }
0x16f2   :  { %v585_v44 = vpop.permute.xlu1 %584 }
0x16f3   :  { %v592_v27 = vsel %vm284_vm6, %v572_v12, %v585_v44 }
0x16fa   :  { %v1407_v9 = vpop.permute.xlu1 %1406 }
0x16fb   :  { %v1414_v62 = vsel %vm284_vm6, %v1394_v19, %v1407_v9 }
0x1702   :  { %v1138_v0 = vpop.permute.xlu1 %1137 }
0x170a   :  { %v859_v42 = vpop.permute.xlu2 %858  ;;  %v2229_v61 = vpop.permute.xlu1 %2228 }
0x170b   :  { %v866_v43 = vsel %vm284_vm6, %v3861_v55, %v859_v42  ;;  %v2236_v51 = vsel %vm284_vm6, %v2216_v13, %v2229_v61 }
0x1712   :  { %v1681_v29 = vpop.permute.xlu2 %1680  ;;  %v1960_v48 = vpop.permute.xlu1 %1959 }
0x1713   :  { %v1688_v5 = vsel %vm284_vm6, %v3866_v49, %v1681_v29 }
0x1714   :  { %v1133_v50 = vpop.permute.xlu0 %1132 }
0x1715   :  { %v1140_v20 = vsel %vm284_vm6, %v3849_v28, %v1133_v50 }
0x1716   :  { %v1141_v25 = vsel %vm286_vm7, %v1140_v20, %v1138_v0 }
0x1717   :  { %2298 = vst.msk [vmem:[%s3972_s9 + $0xc] sm:$0x7] %vm288_vm8, %v1141_v25 }
0x171a   :  { %v590_v16 = vpop.permute.xlu2 %589 }
0x171b   :  { %v593_v35 = vsel %vm286_vm7, %v592_v27, %v590_v16 }
0x171c   :  { %2262 = vst.msk [vmem:[%s3972_s9 + $0x4] sm:$0x7] %vm288_vm8, %v593_v35  ;;  %v1955_v28 = vpop.permute.xlu0 %1954 }
0x171d   :  { %v1962_v22 = vsel %vm284_vm6, %v3853_v23, %v1955_v28 }
0x171e   :  { %v1963_v63 = vsel %vm286_vm7, %v1962_v22, %v1960_v48 }
0x171f   :  { %2352 = vst.msk [vmem:[%s3972_s9 + $0x18] sm:$0x7] %vm288_vm8, %v1963_v63 }
0x1722   :  { %v1412_v1 = vpop.permute.xlu2 %1411 }
0x1723   :  { %v1415_v4 = vsel %vm286_vm7, %v1414_v62, %v1412_v1 }
0x1724   :  { %2316 = vst.msk [vmem:[%s3972_s9 + $0x10] sm:$0x7] %vm288_vm8, %v1415_v4  ;;  %v864_v23 = vpop.permute.xlu0 %863 }
0x1725   :  { %v867_v14 = vsel %vm286_vm7, %v866_v43, %v864_v23 }
0x1726   :  { %2280 = vst.msk [vmem:[%s3972_s9 + $0x8] sm:$0x7] %vm288_vm8, %v867_v14 }
0x172a   :  { %v2234_v57 = vpop.permute.xlu2 %2233 }
0x172b   :  { %v2237_v55 = vsel %vm286_vm7, %v2236_v51, %v2234_v57 }
0x172c   :  { %2370 = vst.msk [vmem:[%s3972_s9 + $0x1c] sm:$0x7] %vm288_vm8, %v2237_v55  ;;  %v1686_v56 = vpop.permute.xlu0 %1685 }
0x172d   :  { %v1689_v3 = vsel %vm286_vm7, %v1688_v5, %v1686_v56 }
0x172e   :  { %2334 = vst.msk [vmem:[%s3972_s9 + $0x14] sm:$0x7] %vm288_vm8, %v1689_v3 }

</bundles_post_ra>
